<compile_context>
chip_gen: v7x
topology: tpu7x:2x2x1
jax: 0.10.0
libtpu: 0.0.40
codegen_flags: <defaults>
</compile_context>

<pallas_src>
import functools

import jax
import jax.numpy as jnp
import numpy as np
from jax.experimental import pallas as pl
from jax.experimental.pallas import tpu as pltpu

EPS = 1e-5
LANE = 128                       # TPU lane width; the slab channel dim is padded once to this.
STORAGE_DTYPE = jnp.bfloat16     # dense activation slab + MXU operand dtype (accumulation f32).


def _round_up(x, m):
    return (x + m - 1) // m * m


def _auto_row_tile(h):
    for cand in (32, 16, 8):
        if h % cand == 0 and h > cand:
            return cand
    return h


def _vmem_limit_bytes():
    """Per-chip VMEM budget: ~3/4 of physical, capped at 100 MiB (v5e/v6e), ~48 MiB on v7x."""
    try:
        phys = int(pltpu.get_tpu_info().vmem_capacity_bytes)
    except Exception:
        phys = 64 * 1024 * 1024          # conservative (v7x-sized) fallback
    return min(phys * 3 // 4, 100 * 1024 * 1024)


def _bn_relu_conv3x3_kernel(x_ref, scale_ref, shift_ref, w_ref, b_ref,
                            o_ref, sum_ref, ssq_ref,
                            *, H, W, TH, cin_load, c_lo, nc):
    """One (image, row-tile) step: fused BN(scale/shift) -> ReLU -> 3x3 'same' conv.

    x_ref:     (1, H, W, cin_load)      bf16  dense slab prefix (resident across row tiles)
    scale_ref: (1, cin_load)            f32   gamma * rsqrt(var + eps)   (0 on unused lanes)
    shift_ref: (1, cin_load)            f32   beta - mean * scale        (0 on unused lanes)
    w_ref:     (3, 3*cin_load, 128)     bf16  im2col weight, per-dy, K ordered (dx, cin)
    b_ref:     (1, 128)                 f32   conv bias placed at lanes [c_lo, c_lo+nc)
    o_ref:     (1, TH, W, 128)          bf16  this block's 128-lane output window (row tile)
    sum_ref:   (1, 1, 128)              f32   per-image channel sums (accumulated over tiles)
    ssq_ref:   (1, 1, 128)              f32   per-image channel sums of squares
    """
    t = pl.program_id(1)
    row0 = pl.multiple_of(t * TH, TH)

    # ---- gather TH+2 rows: the tile's rows plus one (clamped) halo row above and below ----
    prev_i = jnp.maximum(row0 - 1, 0)
    next_i = jnp.minimum(row0 + TH, H - 1)
    x_prev = x_ref[0, pl.ds(prev_i, 1)]              # (1,  W, cin_load)  bf16
    x_mid = x_ref[0, pl.ds(row0, TH)]                # (TH, W, cin_load)  bf16
    x_next = x_ref[0, pl.ds(next_i, 1)]              # (1,  W, cin_load)  bf16
    x_rows = jnp.concatenate([x_prev, x_mid, x_next], axis=0)        # (TH+2, W, cin_load)

    # ---- BN + ReLU in f32 (VPU); out-of-image halo rows zeroed AFTER the activation ----
    scale = scale_ref[...].reshape(1, 1, cin_load)
    shift = shift_ref[...].reshape(1, 1, cin_load)
    act = jnp.maximum(x_rows.astype(jnp.float32) * scale + shift, 0.0)
    g_row = row0 - 1 + jax.lax.broadcasted_iota(jnp.int32, (TH + 2, 1, 1), 0)
    act = jnp.where((g_row >= 0) & (g_row < H), act, 0.0)            # conv zero padding (H)

    # ---- im2col with per-dy accumulation: 3 MXU pushes of K = 3*cin_load each ----
    col = jax.lax.broadcasted_iota(jnp.int32, (1, W, 1), 1)          # W index for edge masking
    acc = jnp.zeros((TH * W, LANE), jnp.float32)
    for dy in range(3):
        ay = act[dy:dy + TH]                                         # (TH, W, cin_load) f32
        taps = []
        for dx in range(3):
            s = 1 - dx                                               # tap[y,x] = a[y+dy-1, x+dx-1]
            if s == 0:
                tap = ay
            else:
                tap = pltpu.roll(ay, shift=s % W, axis=1)            # XLU sublane rotation along W
                if s > 0:
                    tap = jnp.where(col >= s, tap, 0.0)              # zero wrapped left columns
                else:
                    tap = jnp.where(col < W + s, tap, 0.0)           # zero wrapped right columns
            taps.append(tap.astype(w_ref.dtype))                     # bf16 MXU operand
        # NOTE: the reshape below is a free relayout when W % 8 == 0; other W still correct,
        # just slower (materialized relayout copy).
        patches = jnp.concatenate(taps, axis=-1).reshape(TH * W, 3 * cin_load)
        acc = acc + jnp.dot(patches, w_ref[dy], preferred_element_type=jnp.float32)

    y = acc + b_ref[...]                              # (TH*W, 128) f32; only new lanes non-zero

    # ---- fused batch statistics of the new channels (f32, before the bf16 store) ----
    @pl.when(t == 0)
    def _():
        sum_ref[...] = jnp.zeros_like(sum_ref)
        ssq_ref[...] = jnp.zeros_like(ssq_ref)

    sum_ref[...] += jnp.sum(y, axis=0).reshape(1, 1, LANE)
    ssq_ref[...] += jnp.sum(y * y, axis=0).reshape(1, 1, LANE)

    # ---- write the 128-lane output window: new channels from the conv, every other lane is
    #      passed through bit-exactly from the existing slab (dense in-place concat) ----
    lane = jax.lax.broadcasted_iota(jnp.int32, (1, LANE), 1)
    new_mask = (lane >= c_lo) & (lane < c_lo + nc)
    x_win = x_mid[:, :, cin_load - LANE:].reshape(TH * W, LANE)      # existing lanes, bf16
    out = jnp.where(new_mask, y.astype(o_ref.dtype), x_win)
    o_ref[...] = out.reshape(1, TH, W, LANE)


def _conv_block(slab, scale, shift, w_mat, b_pad, *, H, W, TH, cin_load, g0, c_lo, nc):
    """Run one conv_block, writing its output channel window into `slab` in place.

    Returns (updated slab, per-image channel sums, per-image channel sums of squares).
    """
    N = slab.shape[0]
    T = H // TH
    kernel = functools.partial(_bn_relu_conv3x3_kernel,
                               H=H, W=W, TH=TH, cin_load=cin_load, c_lo=c_lo, nc=nc)
    try:
        cost = pl.CostEstimate(
            flops=2 * N * H * W * 9 * cin_load * LANE,
            transcendentals=0,
            bytes_accessed=N * H * W * (cin_load + LANE) * 2 + int(w_mat.size) * 2,
        )
    except Exception:          # advisory only; never block compilation on it
        cost = None

    return pl.pallas_call(
        kernel,
        out_shape=(
            jax.ShapeDtypeStruct(slab.shape, slab.dtype),        # dense slab (aliased, in place)
            jax.ShapeDtypeStruct((N, 1, LANE), jnp.float32),     # per-image channel sums
            jax.ShapeDtypeStruct((N, 1, LANE), jnp.float32),     # per-image channel sum-of-squares
        ),
        grid=(N, T),
        in_specs=[
            # Full-image slab prefix; index_map ignores t => DMA'd once per image, resident
            # across the row tiles of that image.
            pl.BlockSpec((1, H, W, cin_load), lambda n, t: (n, 0, 0, 0)),
            pl.BlockSpec((1, cin_load), lambda n, t: (0, 0)),            # fused BN scale
            pl.BlockSpec((1, cin_load), lambda n, t: (0, 0)),            # fused BN shift
            pl.BlockSpec((3, 3 * cin_load, LANE), lambda n, t: (0, 0, 0)),  # per-dy im2col weight
            pl.BlockSpec((1, LANE), lambda n, t: (0, 0)),                # conv bias
        ],
        out_specs=(
            # Only the 128-lane window holding the new channels is written (row-tiled).
            pl.BlockSpec((1, TH, W, LANE), lambda n, t, _g=g0: (n, t, 0, _g)),
            pl.BlockSpec((1, 1, LANE), lambda n, t: (n, 0, 0)),          # sums (resident over t)
            pl.BlockSpec((1, 1, LANE), lambda n, t: (n, 0, 0)),          # sums of squares
        ),
        input_output_aliases={0: 0},     # in-place dense concat: untouched channel groups persist
        compiler_params=pltpu.CompilerParams(
            dimension_semantics=("parallel", "arbitrary"),   # batch across cores; tiles in order
            vmem_limit_bytes=_vmem_limit_bytes(),
        ),
        cost_estimate=cost,
    )(slab, scale, shift, w_mat, b_pad)


@functools.partial(jax.jit, static_argnames=("row_tile",))
def dense_block_forward(x_nchw, params, row_tile=None):
    """DenseBlock.forward. x_nchw: (N, C0, H, W) f32; params: [(gamma, beta, w_hwio, bias), ...]."""
    N, C0, H, W = x_nchw.shape
    num_convs = len(params)
    nc = params[0][2].shape[-1]                    # growth rate
    c_total = C0 + num_convs * nc
    c_slab = _round_up(c_total, LANE)
    TH = _auto_row_tile(H) if row_tile is None else row_tile
    if H % TH != 0:
        raise ValueError(f"row_tile={TH} must divide H={H}")

    # NCHW -> NHWC (channels on lanes); one dense bf16 channel slab, padded once to 128.
    # TODO(synk): if this block sits inside a larger NHWC network, accept/return NHWC directly
    #             and drop these two full-tensor transposes.
    x_nhwc = jnp.transpose(x_nchw, (0, 2, 3, 1))
    slab = jnp.pad(x_nhwc, ((0, 0), (0, 0), (0, 0), (0, c_slab - C0))).astype(STORAGE_DTYPE)

    # Running per-channel batch stats (dense layout, f32). Channels [0, C0) = the block input.
    mean_all = jnp.zeros((c_slab,), jnp.float32)
    var_all = jnp.ones((c_slab,), jnp.float32)
    m0 = jnp.mean(x_nhwc, axis=(0, 1, 2))
    v0 = jnp.mean(jnp.square(x_nhwc - m0), axis=(0, 1, 2))
    mean_all = mean_all.at[:C0].set(m0)
    var_all = var_all.at[:C0].set(v0)

    # ---- stats-independent per-block constants, hoisted off the critical path ----
    blocks = []
    cin = C0
    for (gamma, beta, w_hwio, bias) in params:
        if nc > LANE or (cin % LANE) + nc > LANE:
            raise NotImplementedError(
                "TODO(synk): output channels straddling a 128-lane boundary need a two-group "
                "output window; not implemented.")
        g0 = cin // LANE                     # 128-lane group holding the new channels
        c_lo = cin - g0 * LANE               # offset of the new channels inside that group
        cin_load = (g0 + 1) * LANE           # slab prefix loaded (covers the output window)
        w_pad = jnp.zeros((3, 3, cin_load, LANE), jnp.float32)
        w_pad = w_pad.at[:, :, :cin, c_lo:c_lo + nc].set(w_hwio)
        w_mat = w_pad.reshape(3, 3 * cin_load, LANE).astype(STORAGE_DTYPE)   # K = (dx, cin)
        b_pad = jnp.zeros((1, LANE), jnp.float32).at[0, c_lo:c_lo + nc].set(bias.reshape(-1))
        blocks.append((gamma.reshape(-1), beta.reshape(-1), w_mat, b_pad,
                       cin, g0, c_lo, cin_load))
        cin += nc

    denom = float(N * H * W)
    for (gamma, beta, w_mat, b_pad, cin, g0, c_lo, cin_load) in blocks:
        # Fused BN scale/shift from the running batch stats (PyTorch training-mode, biased var).
        sc = gamma * jax.lax.rsqrt(var_all[:cin] + EPS)
        sh = beta - mean_all[:cin] * sc
        scale = jnp.zeros((1, cin_load), jnp.float32).at[0, :cin].set(sc)
        shift = jnp.zeros((1, cin_load), jnp.float32).at[0, :cin].set(sh)

        slab, gsum, gssq = _conv_block(slab, scale, shift, w_mat, b_pad,
                                       H=H, W=W, TH=TH, cin_load=cin_load,
                                       g0=g0, c_lo=c_lo, nc=nc)

        # Finish mean/var of the freshly produced channels from the fused in-kernel sums.
        # (Stats are taken from the f32 conv output before the bf16 store - intentional.)
        s = jnp.sum(gsum[:, 0, c_lo:c_lo + nc], axis=0) / denom
        q = jnp.sum(gssq[:, 0, c_lo:c_lo + nc], axis=0) / denom
        mean_all = mean_all.at[cin:cin + nc].set(s)
        var_all = var_all.at[cin:cin + nc].set(jnp.maximum(q - s * s, 0.0))

    out_nhwc = slab[..., :c_total].astype(jnp.float32)
    return jnp.transpose(out_nhwc, (0, 3, 1, 2))


def dense_block_reference(x_nchw, params, mxu_dtype=None, storage_dtype=None):
    """Pure-JAX reference. With mxu_dtype/storage_dtype set it mimics the kernel's quantisation."""
    f32 = jnp.float32

    def store(v):
        return v.astype(storage_dtype).astype(f32) if storage_dtype is not None else v

    mean = jnp.mean(x_nchw, axis=(0, 2, 3))
    var = jnp.mean(jnp.square(x_nchw - mean[None, :, None, None]), axis=(0, 2, 3))
    stored = store(x_nchw)
    for gamma, beta, w_hwio, bias in params:
        g, b = gamma.reshape(-1), beta.reshape(-1)
        scale = g * jax.lax.rsqrt(var + EPS)
        shift = b - mean * scale
        a = jnp.maximum(stored * scale[None, :, None, None] + shift[None, :, None, None], 0.0)
        w = w_hwio
        if mxu_dtype is not None:
            a = a.astype(mxu_dtype)
            w = w.astype(mxu_dtype)
        y = jax.lax.conv_general_dilated(
            a, w, window_strides=(1, 1), padding="SAME",
            dimension_numbers=("NCHW", "HWIO", "NCHW"),
            preferred_element_type=f32,
        ) + bias.reshape(1, -1, 1, 1)
        ymean = jnp.mean(y, axis=(0, 2, 3))
        yvar = jnp.mean(jnp.square(y - ymean[None, :, None, None]), axis=(0, 2, 3))
        mean = jnp.concatenate([mean, ymean])
        var = jnp.concatenate([var, yvar])
        stored = jnp.concatenate([stored, store(y)], axis=1)
    return stored


def init_dense_block_params(key, num_convs, input_channels, num_channels):
    """Deterministic synthetic init (PyTorch-style: gamma=1, beta=0, conv U(-k, k))."""
    params = []
    cin = input_channels
    for _ in range(num_convs):
        key, kw, kb = jax.random.split(key, 3)
        bound = 1.0 / np.sqrt(cin * 3 * 3)
        w = jax.random.uniform(kw, (3, 3, cin, num_channels), jnp.float32, -bound, bound)  # HWIO
        b = jax.random.uniform(kb, (1, num_channels), jnp.float32, -bound, bound)
        gamma = jnp.ones((1, cin), jnp.float32)
        beta = jnp.zeros((1, cin), jnp.float32)
        params.append((gamma, beta, w, b))
        cin += num_channels
    return params


if __name__ == "__main__":
    key = jax.random.PRNGKey(0)

    # --- config 1: the module's toy sizes; all channels live in one 128-lane group,
    #     grid = (N=2 images, T=2 row tiles) ---
    num_convs, c0, nc = 2, 4, 4
    N, H, W = 2, 16, 16
    key, kx = jax.random.split(key)
    x = jax.random.uniform(kx, (N, c0, H, W), jnp.float32)
    params = init_dense_block_params(key, num_convs, c0, nc)

    out = jax.block_until_ready(dense_block_forward(x, params, row_tile=8))
    assert out.shape == (N, c0 + num_convs * nc, H, W), out.shape

    # Tight check vs. a reference with the same quantisation (bf16 slab + bf16 MXU, f32 stats).
    ref_q = dense_block_reference(x, params, mxu_dtype=STORAGE_DTYPE, storage_dtype=STORAGE_DTYPE)
    np.testing.assert_allclose(np.asarray(out), np.asarray(ref_q), rtol=2e-2, atol=2e-2)
    # Looser end-to-end check vs. the pure-f32 module semantics (bf16 storage + operands).
    ref_f32 = dense_block_reference(x, params)
    np.testing.assert_allclose(np.asarray(out), np.asarray(ref_f32), rtol=5e-2, atol=5e-2)
    # The input channels must pass through the in-place dense concat bit-exactly.
    np.testing.assert_array_equal(
        np.asarray(out[:, :c0]),
        np.asarray(x.astype(STORAGE_DTYPE).astype(jnp.float32)))

    # --- config 2: three blocks spanning two 128-lane groups (exercises multi-group slab
    #     aliasing: the last block writes group 1 while group 0 must be preserved) ---
    num_convs2, c02, nc2 = 3, 4, 62
    N2, H2, W2 = 1, 8, 8
    key, kx2 = jax.random.split(key)
    x2 = jax.random.uniform(kx2, (N2, c02, H2, W2), jnp.float32)
    params2 = init_dense_block_params(key, num_convs2, c02, nc2)

    out2 = jax.block_until_ready(dense_block_forward(x2, params2))
    assert out2.shape == (N2, c02 + num_convs2 * nc2, H2, W2), out2.shape
    ref2 = dense_block_reference(x2, params2, mxu_dtype=STORAGE_DTYPE,
                                 storage_dtype=STORAGE_DTYPE)
    np.testing.assert_allclose(np.asarray(out2), np.asarray(ref2), rtol=2e-2, atol=2e-2)
    np.testing.assert_array_equal(
        np.asarray(out2[:, :c02]),
        np.asarray(x2.astype(STORAGE_DTYPE).astype(jnp.float32)))

    print("KERNEL_OK")
</pallas_src>

<mosaic_0001>
module attributes {stable_mosaic.version = 11 : i64} {
  func.func @_bn_relu_conv3x3_kernel(%arg0: i32, %arg1: i32, %arg2: memref<1x16x16x128xbf16, #tpu.memory_space<vmem>>, %arg3: memref<1x128xf32, #tpu.memory_space<vmem>>, %arg4: memref<1x128xf32, #tpu.memory_space<vmem>>, %arg5: memref<3x384x128xbf16, #tpu.memory_space<vmem>>, %arg6: memref<1x128xf32, #tpu.memory_space<vmem>>, %arg7: memref<1x8x16x128xbf16, #tpu.memory_space<vmem>>, %arg8: memref<1x1x128xf32, #tpu.memory_space<vmem>>, %arg9: memref<1x1x128xf32, #tpu.memory_space<vmem>>) attributes {dimension_semantics = [#tpu.dimension_semantics<parallel>, #tpu.dimension_semantics<arbitrary>], iteration_bounds = array<i64: 2, 2>, scalar_prefetch = 0 : i64, scratch_operands = 0 : i64, tpu.core_type = #tpu.core_type<tc>, window_params = [{transform_indices = @transform_0, window_bounds = array<i64: 1, 16, 16, 128>}, {pipeline_mode = #tpu.pipeline_mode<synchronous>, transform_indices = @transform_1, window_bounds = array<i64: 1, 128>}, {pipeline_mode = #tpu.pipeline_mode<synchronous>, transform_indices = @transform_2, window_bounds = array<i64: 1, 128>}, {pipeline_mode = #tpu.pipeline_mode<synchronous>, transform_indices = @transform_3, window_bounds = array<i64: 3, 384, 128>}, {pipeline_mode = #tpu.pipeline_mode<synchronous>, transform_indices = @transform_4, window_bounds = array<i64: 1, 128>}, {transform_indices = @transform_5, window_bounds = array<i64: 1, 8, 16, 128>}, {transform_indices = @transform_6, window_bounds = array<i64: 1, 1, 128>}, {transform_indices = @transform_7, window_bounds = array<i64: 1, 1, 128>}]} {
    %c8_i32 = arith.constant 8 : i32
    %0 = arith.muli %arg1, %c8_i32 : i32
    %1 = tpu.assume_multiple %0, 8 : i32
    %c1_i32 = arith.constant 1 : i32
    %2 = arith.subi %1, %c1_i32 : i32
    %c0_i32 = arith.constant 0 : i32
    %3 = arith.maxsi %2, %c0_i32 : i32
    %c8_i32_0 = arith.constant 8 : i32
    %4 = arith.addi %1, %c8_i32_0 : i32
    %c15_i32 = arith.constant 15 : i32
    %5 = arith.minsi %4, %c15_i32 : i32
    %c0 = arith.constant 0 : index
    %6 = arith.index_cast %3 : i32 to index
    %c0_1 = arith.constant 0 : index
    %c0_2 = arith.constant 0 : index
    %7 = vector.load %arg2[%c0, %6, %c0_1, %c0_2] : memref<1x16x16x128xbf16, #tpu.memory_space<vmem>>, vector<1x1x16x128xbf16>
    %8 = vector.shape_cast %7 : vector<1x1x16x128xbf16> to vector<1x16x128xbf16>
    %c0_3 = arith.constant 0 : index
    %9 = arith.index_cast %1 : i32 to index
    %c0_4 = arith.constant 0 : index
    %c0_5 = arith.constant 0 : index
    %10 = vector.load %arg2[%c0_3, %9, %c0_4, %c0_5] : memref<1x16x16x128xbf16, #tpu.memory_space<vmem>>, vector<1x8x16x128xbf16>
    %11 = vector.shape_cast %10 : vector<1x8x16x128xbf16> to vector<8x16x128xbf16>
    %c0_6 = arith.constant 0 : index
    %12 = arith.index_cast %5 : i32 to index
    %c0_7 = arith.constant 0 : index
    %c0_8 = arith.constant 0 : index
    %13 = vector.load %arg2[%c0_6, %12, %c0_7, %c0_8] : memref<1x16x16x128xbf16, #tpu.memory_space<vmem>>, vector<1x1x16x128xbf16>
    %14 = vector.shape_cast %13 : vector<1x1x16x128xbf16> to vector<1x16x128xbf16>
    %15 = tpu.concatenate %8, %11, %14 in 0 : vector<1x16x128xbf16>, vector<8x16x128xbf16>, vector<1x16x128xbf16> -> vector<10x16x128xbf16>
    %c0_9 = arith.constant 0 : index
    %c0_10 = arith.constant 0 : index
    %16 = vector.load %arg3[%c0_9, %c0_10] : memref<1x128xf32, #tpu.memory_space<vmem>>, vector<1x128xf32>
    %17 = vector.shape_cast %16 : vector<1x128xf32> to vector<1x1x128xf32>
    %c0_11 = arith.constant 0 : index
    %c0_12 = arith.constant 0 : index
    %18 = vector.load %arg4[%c0_11, %c0_12] : memref<1x128xf32, #tpu.memory_space<vmem>>, vector<1x128xf32>
    %19 = vector.shape_cast %18 : vector<1x128xf32> to vector<1x1x128xf32>
    %20 = arith.extf %15 : vector<10x16x128xbf16> to vector<10x16x128xf32>
    %21 = vector.broadcast %17 : vector<1x1x128xf32> to vector<10x16x128xf32>
    %22 = arith.mulf %20, %21 : vector<10x16x128xf32>
    %23 = vector.broadcast %19 : vector<1x1x128xf32> to vector<10x16x128xf32>
    %24 = arith.addf %22, %23 : vector<10x16x128xf32>
    %cst = arith.constant 0.000000e+00 : f32
    %25 = vector.broadcast %cst : f32 to vector<10x16x128xf32>
    %26 = arith.maximumf %24, %25 : vector<10x16x128xf32>
    %c1_i32_13 = arith.constant 1 : i32
    %27 = arith.subi %1, %c1_i32_13 : i32
    %28 = tpu.iota {dimensions = array<i32: 0>} : vector<10x1x1xi32>
    %29 = vector.broadcast %27 : i32 to vector<10x1x1xi32>
    %30 = arith.addi %29, %28 : vector<10x1x1xi32>
    %c0_i32_14 = arith.constant 0 : i32
    %31 = vector.broadcast %c0_i32_14 : i32 to vector<10x1x1xi32>
    %32 = arith.cmpi sge, %30, %31 : vector<10x1x1xi32>
    %c16_i32 = arith.constant 16 : i32
    %33 = vector.broadcast %c16_i32 : i32 to vector<10x1x1xi32>
    %34 = arith.cmpi slt, %30, %33 : vector<10x1x1xi32>
    %35 = arith.andi %32, %34 : vector<10x1x1xi1>
    %cst_15 = arith.constant 0.000000e+00 : f32
    %36 = vector.shape_cast %35 : vector<10x1x1xi1> to vector<10x1x1xi1>
    %37 = vector.broadcast %36 : vector<10x1x1xi1> to vector<10x16x128xi1>
    %38 = vector.broadcast %cst_15 : f32 to vector<10x16x128xf32>
    %39 = arith.select %37, %26, %38 : vector<10x16x128xi1>, vector<10x16x128xf32>
    %40 = tpu.iota {dimensions = array<i32: 1>} : vector<1x16x1xi32>
    %cst_16 = arith.constant 0.000000e+00 : f32
    %41 = vector.broadcast %cst_16 : f32 to vector<128x128xf32>
    %42 = vector.extract_strided_slice %39 {offsets = [0, 0, 0], sizes = [8, 16, 128], strides = [1, 1, 1]} : vector<10x16x128xf32> to vector<8x16x128xf32>
    %c1_i32_17 = arith.constant 1 : i32
    %43 = tpu.dynamic_rotate %42 by %c1_i32_17 dim 1 : vector<8x16x128xf32>, i32 -> vector<8x16x128xf32>
    %c1_i32_18 = arith.constant 1 : i32
    %44 = vector.broadcast %c1_i32_18 : i32 to vector<1x16x1xi32>
    %45 = arith.cmpi sge, %40, %44 : vector<1x16x1xi32>
    %cst_19 = arith.constant 0.000000e+00 : f32
    %46 = vector.shape_cast %45 : vector<1x16x1xi1> to vector<1x16x1xi1>
    %47 = vector.broadcast %46 : vector<1x16x1xi1> to vector<8x16x128xi1>
    %48 = vector.broadcast %cst_19 : f32 to vector<8x16x128xf32>
    %49 = arith.select %47, %43, %48 : vector<8x16x128xi1>, vector<8x16x128xf32>
    %50 = arith.truncf %49 : vector<8x16x128xf32> to vector<8x16x128xbf16>
    %51 = arith.truncf %42 : vector<8x16x128xf32> to vector<8x16x128xbf16>
    %c15_i32_20 = arith.constant 15 : i32
    %52 = tpu.dynamic_rotate %42 by %c15_i32_20 dim 1 : vector<8x16x128xf32>, i32 -> vector<8x16x128xf32>
    %c15_i32_21 = arith.constant 15 : i32
    %53 = vector.broadcast %c15_i32_21 : i32 to vector<1x16x1xi32>
    %54 = arith.cmpi slt, %40, %53 : vector<1x16x1xi32>
    %cst_22 = arith.constant 0.000000e+00 : f32
    %55 = vector.shape_cast %54 : vector<1x16x1xi1> to vector<1x16x1xi1>
    %56 = vector.broadcast %55 : vector<1x16x1xi1> to vector<8x16x128xi1>
    %57 = vector.broadcast %cst_22 : f32 to vector<8x16x128xf32>
    %58 = arith.select %56, %52, %57 : vector<8x16x128xi1>, vector<8x16x128xf32>
    %59 = arith.truncf %58 : vector<8x16x128xf32> to vector<8x16x128xbf16>
    %60 = tpu.concatenate %50, %51, %59 in 2 : vector<8x16x128xbf16>, vector<8x16x128xbf16>, vector<8x16x128xbf16> -> vector<8x16x384xbf16>
    %61 = vector.shape_cast %60 : vector<8x16x384xbf16> to vector<128x384xbf16>
    %c0_23 = arith.constant 0 : index
    %c0_24 = arith.constant 0 : index
    %c0_25 = arith.constant 0 : index
    %62 = vector.load %arg5[%c0_23, %c0_24, %c0_25] : memref<3x384x128xbf16, #tpu.memory_space<vmem>>, vector<1x384x128xbf16>
    %63 = vector.shape_cast %62 : vector<1x384x128xbf16> to vector<384x128xbf16>
    %cst_26 = arith.constant dense<0.000000e+00> : vector<128x128xf32>
    %64 = tpu.matmul %61, %63, %cst_26 {dimension_numbers = #tpu.dot_dimension_numbers<[1], [0], [0], [1], [0, 0, 1, 1], [], []>} : vector<128x384xbf16>, vector<384x128xbf16>, vector<128x128xf32> -> vector<128x128xf32>
    %65 = arith.addf %41, %64 : vector<128x128xf32>
    %66 = vector.extract_strided_slice %39 {offsets = [1, 0, 0], sizes = [8, 16, 128], strides = [1, 1, 1]} : vector<10x16x128xf32> to vector<8x16x128xf32>
    %c1_i32_27 = arith.constant 1 : i32
    %67 = tpu.dynamic_rotate %66 by %c1_i32_27 dim 1 : vector<8x16x128xf32>, i32 -> vector<8x16x128xf32>
    %c1_i32_28 = arith.constant 1 : i32
    %68 = vector.broadcast %c1_i32_28 : i32 to vector<1x16x1xi32>
    %69 = arith.cmpi sge, %40, %68 : vector<1x16x1xi32>
    %cst_29 = arith.constant 0.000000e+00 : f32
    %70 = vector.shape_cast %69 : vector<1x16x1xi1> to vector<1x16x1xi1>
    %71 = vector.broadcast %70 : vector<1x16x1xi1> to vector<8x16x128xi1>
    %72 = vector.broadcast %cst_29 : f32 to vector<8x16x128xf32>
    %73 = arith.select %71, %67, %72 : vector<8x16x128xi1>, vector<8x16x128xf32>
    %74 = arith.truncf %73 : vector<8x16x128xf32> to vector<8x16x128xbf16>
    %75 = arith.truncf %66 : vector<8x16x128xf32> to vector<8x16x128xbf16>
    %c15_i32_30 = arith.constant 15 : i32
    %76 = tpu.dynamic_rotate %66 by %c15_i32_30 dim 1 : vector<8x16x128xf32>, i32 -> vector<8x16x128xf32>
    %c15_i32_31 = arith.constant 15 : i32
    %77 = vector.broadcast %c15_i32_31 : i32 to vector<1x16x1xi32>
    %78 = arith.cmpi slt, %40, %77 : vector<1x16x1xi32>
    %cst_32 = arith.constant 0.000000e+00 : f32
    %79 = vector.shape_cast %78 : vector<1x16x1xi1> to vector<1x16x1xi1>
    %80 = vector.broadcast %79 : vector<1x16x1xi1> to vector<8x16x128xi1>
    %81 = vector.broadcast %cst_32 : f32 to vector<8x16x128xf32>
    %82 = arith.select %80, %76, %81 : vector<8x16x128xi1>, vector<8x16x128xf32>
    %83 = arith.truncf %82 : vector<8x16x128xf32> to vector<8x16x128xbf16>
    %84 = tpu.concatenate %74, %75, %83 in 2 : vector<8x16x128xbf16>, vector<8x16x128xbf16>, vector<8x16x128xbf16> -> vector<8x16x384xbf16>
    %85 = vector.shape_cast %84 : vector<8x16x384xbf16> to vector<128x384xbf16>
    %c1 = arith.constant 1 : index
    %c0_33 = arith.constant 0 : index
    %c0_34 = arith.constant 0 : index
    %86 = vector.load %arg5[%c1, %c0_33, %c0_34] : memref<3x384x128xbf16, #tpu.memory_space<vmem>>, vector<1x384x128xbf16>
    %87 = vector.shape_cast %86 : vector<1x384x128xbf16> to vector<384x128xbf16>
    %cst_35 = arith.constant dense<0.000000e+00> : vector<128x128xf32>
    %88 = tpu.matmul %85, %87, %cst_35 {dimension_numbers = #tpu.dot_dimension_numbers<[1], [0], [0], [1], [0, 0, 1, 1], [], []>} : vector<128x384xbf16>, vector<384x128xbf16>, vector<128x128xf32> -> vector<128x128xf32>
    %89 = arith.addf %65, %88 : vector<128x128xf32>
    %90 = vector.extract_strided_slice %39 {offsets = [2, 0, 0], sizes = [8, 16, 128], strides = [1, 1, 1]} : vector<10x16x128xf32> to vector<8x16x128xf32>
    %c1_i32_36 = arith.constant 1 : i32
    %91 = tpu.dynamic_rotate %90 by %c1_i32_36 dim 1 : vector<8x16x128xf32>, i32 -> vector<8x16x128xf32>
    %c1_i32_37 = arith.constant 1 : i32
    %92 = vector.broadcast %c1_i32_37 : i32 to vector<1x16x1xi32>
    %93 = arith.cmpi sge, %40, %92 : vector<1x16x1xi32>
    %cst_38 = arith.constant 0.000000e+00 : f32
    %94 = vector.shape_cast %93 : vector<1x16x1xi1> to vector<1x16x1xi1>
    %95 = vector.broadcast %94 : vector<1x16x1xi1> to vector<8x16x128xi1>
    %96 = vector.broadcast %cst_38 : f32 to vector<8x16x128xf32>
    %97 = arith.select %95, %91, %96 : vector<8x16x128xi1>, vector<8x16x128xf32>
    %98 = arith.truncf %97 : vector<8x16x128xf32> to vector<8x16x128xbf16>
    %99 = arith.truncf %90 : vector<8x16x128xf32> to vector<8x16x128xbf16>
    %c15_i32_39 = arith.constant 15 : i32
    %100 = tpu.dynamic_rotate %90 by %c15_i32_39 dim 1 : vector<8x16x128xf32>, i32 -> vector<8x16x128xf32>
    %c15_i32_40 = arith.constant 15 : i32
    %101 = vector.broadcast %c15_i32_40 : i32 to vector<1x16x1xi32>
    %102 = arith.cmpi slt, %40, %101 : vector<1x16x1xi32>
    %cst_41 = arith.constant 0.000000e+00 : f32
    %103 = vector.shape_cast %102 : vector<1x16x1xi1> to vector<1x16x1xi1>
    %104 = vector.broadcast %103 : vector<1x16x1xi1> to vector<8x16x128xi1>
    %105 = vector.broadcast %cst_41 : f32 to vector<8x16x128xf32>
    %106 = arith.select %104, %100, %105 : vector<8x16x128xi1>, vector<8x16x128xf32>
    %107 = arith.truncf %106 : vector<8x16x128xf32> to vector<8x16x128xbf16>
    %108 = tpu.concatenate %98, %99, %107 in 2 : vector<8x16x128xbf16>, vector<8x16x128xbf16>, vector<8x16x128xbf16> -> vector<8x16x384xbf16>
    %109 = vector.shape_cast %108 : vector<8x16x384xbf16> to vector<128x384xbf16>
    %c2 = arith.constant 2 : index
    %c0_42 = arith.constant 0 : index
    %c0_43 = arith.constant 0 : index
    %110 = vector.load %arg5[%c2, %c0_42, %c0_43] : memref<3x384x128xbf16, #tpu.memory_space<vmem>>, vector<1x384x128xbf16>
    %111 = vector.shape_cast %110 : vector<1x384x128xbf16> to vector<384x128xbf16>
    %cst_44 = arith.constant dense<0.000000e+00> : vector<128x128xf32>
    %112 = tpu.matmul %109, %111, %cst_44 {dimension_numbers = #tpu.dot_dimension_numbers<[1], [0], [0], [1], [0, 0, 1, 1], [], []>} : vector<128x384xbf16>, vector<384x128xbf16>, vector<128x128xf32> -> vector<128x128xf32>
    %113 = arith.addf %89, %112 : vector<128x128xf32>
    %c0_45 = arith.constant 0 : index
    %c0_46 = arith.constant 0 : index
    %114 = vector.load %arg6[%c0_45, %c0_46] : memref<1x128xf32, #tpu.memory_space<vmem>>, vector<1x128xf32>
    %115 = vector.broadcast %114 : vector<1x128xf32> to vector<128x128xf32>
    %116 = arith.addf %113, %115 : vector<128x128xf32>
    %c0_i32_47 = arith.constant 0 : i32
    %117 = arith.cmpi eq, %arg1, %c0_i32_47 : i32
    %118 = arith.extui %117 : i1 to i32
    %c0_i32_48 = arith.constant 0 : i32
    %119 = arith.cmpi ne, %118, %c0_i32_48 : i32
    scf.if %119 {
      %cst_68 = arith.constant 0.000000e+00 : f32
      %144 = vector.broadcast %cst_68 : f32 to vector<1x1x128xf32>
      %c0_69 = arith.constant 0 : index
      %c0_70 = arith.constant 0 : index
      %c0_71 = arith.constant 0 : index
      %145 = vector.load %arg8[%c0_69, %c0_70, %c0_71] : memref<1x1x128xf32, #tpu.memory_space<vmem>>, vector<1x1x128xf32>
      tpu.vector_store %arg8[%c0_69, %c0_70, %c0_71], %144 {strides = array<i32>} : memref<1x1x128xf32, #tpu.memory_space<vmem>>, vector<1x1x128xf32>,
      %cst_72 = arith.constant 0.000000e+00 : f32
      %146 = vector.broadcast %cst_72 : f32 to vector<1x1x128xf32>
      %c0_73 = arith.constant 0 : index
      %c0_74 = arith.constant 0 : index
      %c0_75 = arith.constant 0 : index
      %147 = vector.load %arg9[%c0_73, %c0_74, %c0_75] : memref<1x1x128xf32, #tpu.memory_space<vmem>>, vector<1x1x128xf32>
      tpu.vector_store %arg9[%c0_73, %c0_74, %c0_75], %146 {strides = array<i32>} : memref<1x1x128xf32, #tpu.memory_space<vmem>>, vector<1x1x128xf32>,
    } else {
    }
    %c0_49 = arith.constant 0 : index
    %c0_50 = arith.constant 0 : index
    %c0_51 = arith.constant 0 : index
    %120 = vector.load %arg8[%c0_49, %c0_50, %c0_51] : memref<1x1x128xf32, #tpu.memory_space<vmem>>, vector<1x1x128xf32>
    %cst_52 = arith.constant dense<0.000000e+00> : vector<128xf32>
    %121 = vector.multi_reduction <add>, %116, %cst_52 [0] : vector<128x128xf32> to vector<128xf32>
    %122 = vector.shape_cast %121 : vector<128xf32> to vector<1x1x128xf32>
    %123 = arith.addf %120, %122 : vector<1x1x128xf32>
    %c0_53 = arith.constant 0 : index
    %c0_54 = arith.constant 0 : index
    %c0_55 = arith.constant 0 : index
    %124 = vector.load %arg8[%c0_53, %c0_54, %c0_55] : memref<1x1x128xf32, #tpu.memory_space<vmem>>, vector<1x1x128xf32>
    tpu.vector_store %arg8[%c0_53, %c0_54, %c0_55], %123 {strides = array<i32>} : memref<1x1x128xf32, #tpu.memory_space<vmem>>, vector<1x1x128xf32>,
    %c0_56 = arith.constant 0 : index
    %c0_57 = arith.constant 0 : index
    %c0_58 = arith.constant 0 : index
    %125 = vector.load %arg9[%c0_56, %c0_57, %c0_58] : memref<1x1x128xf32, #tpu.memory_space<vmem>>, vector<1x1x128xf32>
    %126 = arith.mulf %116, %116 : vector<128x128xf32>
    %cst_59 = arith.constant dense<0.000000e+00> : vector<128xf32>
    %127 = vector.multi_reduction <add>, %126, %cst_59 [0] : vector<128x128xf32> to vector<128xf32>
    %128 = vector.shape_cast %127 : vector<128xf32> to vector<1x1x128xf32>
    %129 = arith.addf %125, %128 : vector<1x1x128xf32>
    %c0_60 = arith.constant 0 : index
    %c0_61 = arith.constant 0 : index
    %c0_62 = arith.constant 0 : index
    %130 = vector.load %arg9[%c0_60, %c0_61, %c0_62] : memref<1x1x128xf32, #tpu.memory_space<vmem>>, vector<1x1x128xf32>
    tpu.vector_store %arg9[%c0_60, %c0_61, %c0_62], %129 {strides = array<i32>} : memref<1x1x128xf32, #tpu.memory_space<vmem>>, vector<1x1x128xf32>,
    %131 = tpu.iota {dimensions = array<i32: 1>} : vector<1x128xi32>
    %c4_i32 = arith.constant 4 : i32
    %132 = vector.broadcast %c4_i32 : i32 to vector<1x128xi32>
    %133 = arith.cmpi sge, %131, %132 : vector<1x128xi32>
    %c8_i32_63 = arith.constant 8 : i32
    %134 = vector.broadcast %c8_i32_63 : i32 to vector<1x128xi32>
    %135 = arith.cmpi slt, %131, %134 : vector<1x128xi32>
    %136 = arith.andi %133, %135 : vector<1x128xi1>
    %137 = vector.shape_cast %11 : vector<8x16x128xbf16> to vector<128x128xbf16>
    %138 = arith.truncf %116 : vector<128x128xf32> to vector<128x128xbf16>
    %139 = vector.shape_cast %136 : vector<1x128xi1> to vector<1x128xi1>
    %140 = vector.broadcast %139 : vector<1x128xi1> to vector<128x128xi1>
    %141 = arith.select %140, %138, %137 : vector<128x128xi1>, vector<128x128xbf16>
    %142 = vector.shape_cast %141 : vector<128x128xbf16> to vector<1x8x16x128xbf16>
    %c0_64 = arith.constant 0 : index
    %c0_65 = arith.constant 0 : index
    %c0_66 = arith.constant 0 : index
    %c0_67 = arith.constant 0 : index
    %143 = vector.load %arg7[%c0_64, %c0_65, %c0_66, %c0_67] : memref<1x8x16x128xbf16, #tpu.memory_space<vmem>>, vector<1x8x16x128xbf16>
    tpu.vector_store %arg7[%c0_64, %c0_65, %c0_66, %c0_67], %142 {strides = array<i32>} : memref<1x8x16x128xbf16, #tpu.memory_space<vmem>>, vector<1x8x16x128xbf16>,
    return
  }
  func.func @transform_0(%arg0: i32, %arg1: i32) -> (i32, i32, i32, i32) {
    %c0_i32 = arith.constant 0 : i32
    %c0_i32_0 = arith.constant 0 : i32
    %c0_i32_1 = arith.constant 0 : i32
    %c0_i32_2 = arith.constant 0 : i32
    return %arg0, %c0_i32, %c0_i32_0, %c0_i32_1 : i32, i32, i32, i32
  }
  func.func @transform_1(%arg0: i32, %arg1: i32) -> (i32, i32) {
    %c0_i32 = arith.constant 0 : i32
    %c0_i32_0 = arith.constant 0 : i32
    %c0_i32_1 = arith.constant 0 : i32
    return %c0_i32, %c0_i32_0 : i32, i32
  }
  func.func @transform_2(%arg0: i32, %arg1: i32) -> (i32, i32) {
    %c0_i32 = arith.constant 0 : i32
    %c0_i32_0 = arith.constant 0 : i32
    %c0_i32_1 = arith.constant 0 : i32
    return %c0_i32, %c0_i32_0 : i32, i32
  }
  func.func @transform_3(%arg0: i32, %arg1: i32) -> (i32, i32, i32) {
    %c0_i32 = arith.constant 0 : i32
    %c0_i32_0 = arith.constant 0 : i32
    %c0_i32_1 = arith.constant 0 : i32
    %c0_i32_2 = arith.constant 0 : i32
    return %c0_i32, %c0_i32_0, %c0_i32_1 : i32, i32, i32
  }
  func.func @transform_4(%arg0: i32, %arg1: i32) -> (i32, i32) {
    %c0_i32 = arith.constant 0 : i32
    %c0_i32_0 = arith.constant 0 : i32
    %c0_i32_1 = arith.constant 0 : i32
    return %c0_i32, %c0_i32_0 : i32, i32
  }
  func.func @transform_5(%arg0: i32, %arg1: i32) -> (i32, i32, i32, i32) {
    %c0_i32 = arith.constant 0 : i32
    %c0_i32_0 = arith.constant 0 : i32
    %c0_i32_1 = arith.constant 0 : i32
    return %arg0, %arg1, %c0_i32, %c0_i32_0 : i32, i32, i32, i32
  }
  func.func @transform_6(%arg0: i32, %arg1: i32) -> (i32, i32, i32) {
    %c0_i32 = arith.constant 0 : i32
    %c0_i32_0 = arith.constant 0 : i32
    %c0_i32_1 = arith.constant 0 : i32
    return %arg0, %c0_i32, %c0_i32_0 : i32, i32, i32
  }
  func.func @transform_7(%arg0: i32, %arg1: i32) -> (i32, i32, i32) {
    %c0_i32 = arith.constant 0 : i32
    %c0_i32_0 = arith.constant 0 : i32
    %c0_i32_1 = arith.constant 0 : i32
    return %arg0, %c0_i32, %c0_i32_0 : i32, i32, i32
  }
}

module attributes {stable_mosaic.version = 11 : i64} {
  func.func @_bn_relu_conv3x3_kernel(%arg0: i32, %arg1: i32, %arg2: memref<1x16x16x128xbf16, #tpu.memory_space<vmem>>, %arg3: memref<1x128xf32, #tpu.memory_space<vmem>>, %arg4: memref<1x128xf32, #tpu.memory_space<vmem>>, %arg5: memref<3x384x128xbf16, #tpu.memory_space<vmem>>, %arg6: memref<1x128xf32, #tpu.memory_space<vmem>>, %arg7: memref<1x8x16x128xbf16, #tpu.memory_space<vmem>>, %arg8: memref<1x1x128xf32, #tpu.memory_space<vmem>>, %arg9: memref<1x1x128xf32, #tpu.memory_space<vmem>>) attributes {dimension_semantics = [#tpu.dimension_semantics<parallel>, #tpu.dimension_semantics<arbitrary>], iteration_bounds = array<i64: 2, 2>, scalar_prefetch = 0 : i64, scratch_operands = 0 : i64, tpu.core_type = #tpu.core_type<tc>, window_params = [{transform_indices = @transform_0, window_bounds = array<i64: 1, 16, 16, 128>}, {pipeline_mode = #tpu.pipeline_mode<synchronous>, transform_indices = @transform_1, window_bounds = array<i64: 1, 128>}, {pipeline_mode = #tpu.pipeline_mode<synchronous>, transform_indices = @transform_2, window_bounds = array<i64: 1, 128>}, {pipeline_mode = #tpu.pipeline_mode<synchronous>, transform_indices = @transform_3, window_bounds = array<i64: 3, 384, 128>}, {pipeline_mode = #tpu.pipeline_mode<synchronous>, transform_indices = @transform_4, window_bounds = array<i64: 1, 128>}, {transform_indices = @transform_5, window_bounds = array<i64: 1, 8, 16, 128>}, {transform_indices = @transform_6, window_bounds = array<i64: 1, 1, 128>}, {transform_indices = @transform_7, window_bounds = array<i64: 1, 1, 128>}]} {
    %c8_i32 = arith.constant 8 : i32
    %0 = arith.muli %arg1, %c8_i32 : i32
    %1 = tpu.assume_multiple %0, 8 : i32
    %c1_i32 = arith.constant 1 : i32
    %2 = arith.subi %1, %c1_i32 : i32
    %c0_i32 = arith.constant 0 : i32
    %3 = arith.maxsi %2, %c0_i32 : i32
    %c8_i32_0 = arith.constant 8 : i32
    %4 = arith.addi %1, %c8_i32_0 : i32
    %c15_i32 = arith.constant 15 : i32
    %5 = arith.minsi %4, %c15_i32 : i32
    %c0 = arith.constant 0 : index
    %6 = arith.index_cast %3 : i32 to index
    %c0_1 = arith.constant 0 : index
    %c0_2 = arith.constant 0 : index
    %7 = vector.load %arg2[%c0, %6, %c0_1, %c0_2] : memref<1x16x16x128xbf16, #tpu.memory_space<vmem>>, vector<1x1x16x128xbf16>
    %8 = vector.shape_cast %7 : vector<1x1x16x128xbf16> to vector<1x16x128xbf16>
    %c0_3 = arith.constant 0 : index
    %9 = arith.index_cast %1 : i32 to index
    %c0_4 = arith.constant 0 : index
    %c0_5 = arith.constant 0 : index
    %10 = vector.load %arg2[%c0_3, %9, %c0_4, %c0_5] : memref<1x16x16x128xbf16, #tpu.memory_space<vmem>>, vector<1x8x16x128xbf16>
    %11 = vector.shape_cast %10 : vector<1x8x16x128xbf16> to vector<8x16x128xbf16>
    %c0_6 = arith.constant 0 : index
    %12 = arith.index_cast %5 : i32 to index
    %c0_7 = arith.constant 0 : index
    %c0_8 = arith.constant 0 : index
    %13 = vector.load %arg2[%c0_6, %12, %c0_7, %c0_8] : memref<1x16x16x128xbf16, #tpu.memory_space<vmem>>, vector<1x1x16x128xbf16>
    %14 = vector.shape_cast %13 : vector<1x1x16x128xbf16> to vector<1x16x128xbf16>
    %15 = tpu.concatenate %8, %11, %14 in 0 : vector<1x16x128xbf16>, vector<8x16x128xbf16>, vector<1x16x128xbf16> -> vector<10x16x128xbf16>
    %c0_9 = arith.constant 0 : index
    %c0_10 = arith.constant 0 : index
    %16 = vector.load %arg3[%c0_9, %c0_10] : memref<1x128xf32, #tpu.memory_space<vmem>>, vector<1x128xf32>
    %17 = vector.shape_cast %16 : vector<1x128xf32> to vector<1x1x128xf32>
    %c0_11 = arith.constant 0 : index
    %c0_12 = arith.constant 0 : index
    %18 = vector.load %arg4[%c0_11, %c0_12] : memref<1x128xf32, #tpu.memory_space<vmem>>, vector<1x128xf32>
    %19 = vector.shape_cast %18 : vector<1x128xf32> to vector<1x1x128xf32>
    %20 = arith.extf %15 : vector<10x16x128xbf16> to vector<10x16x128xf32>
    %21 = vector.broadcast %17 : vector<1x1x128xf32> to vector<10x16x128xf32>
    %22 = arith.mulf %20, %21 : vector<10x16x128xf32>
    %23 = vector.broadcast %19 : vector<1x1x128xf32> to vector<10x16x128xf32>
    %24 = arith.addf %22, %23 : vector<10x16x128xf32>
    %cst = arith.constant 0.000000e+00 : f32
    %25 = vector.broadcast %cst : f32 to vector<10x16x128xf32>
    %26 = arith.maximumf %24, %25 : vector<10x16x128xf32>
    %c1_i32_13 = arith.constant 1 : i32
    %27 = arith.subi %1, %c1_i32_13 : i32
    %28 = tpu.iota {dimensions = array<i32: 0>} : vector<10x1x1xi32>
    %29 = vector.broadcast %27 : i32 to vector<10x1x1xi32>
    %30 = arith.addi %29, %28 : vector<10x1x1xi32>
    %c0_i32_14 = arith.constant 0 : i32
    %31 = vector.broadcast %c0_i32_14 : i32 to vector<10x1x1xi32>
    %32 = arith.cmpi sge, %30, %31 : vector<10x1x1xi32>
    %c16_i32 = arith.constant 16 : i32
    %33 = vector.broadcast %c16_i32 : i32 to vector<10x1x1xi32>
    %34 = arith.cmpi slt, %30, %33 : vector<10x1x1xi32>
    %35 = arith.andi %32, %34 : vector<10x1x1xi1>
    %cst_15 = arith.constant 0.000000e+00 : f32
    %36 = vector.shape_cast %35 : vector<10x1x1xi1> to vector<10x1x1xi1>
    %37 = vector.broadcast %36 : vector<10x1x1xi1> to vector<10x16x128xi1>
    %38 = vector.broadcast %cst_15 : f32 to vector<10x16x128xf32>
    %39 = arith.select %37, %26, %38 : vector<10x16x128xi1>, vector<10x16x128xf32>
    %40 = tpu.iota {dimensions = array<i32: 1>} : vector<1x16x1xi32>
    %cst_16 = arith.constant 0.000000e+00 : f32
    %41 = vector.broadcast %cst_16 : f32 to vector<128x128xf32>
    %42 = vector.extract_strided_slice %39 {offsets = [0, 0, 0], sizes = [8, 16, 128], strides = [1, 1, 1]} : vector<10x16x128xf32> to vector<8x16x128xf32>
    %c1_i32_17 = arith.constant 1 : i32
    %43 = tpu.dynamic_rotate %42 by %c1_i32_17 dim 1 : vector<8x16x128xf32>, i32 -> vector<8x16x128xf32>
    %c1_i32_18 = arith.constant 1 : i32
    %44 = vector.broadcast %c1_i32_18 : i32 to vector<1x16x1xi32>
    %45 = arith.cmpi sge, %40, %44 : vector<1x16x1xi32>
    %cst_19 = arith.constant 0.000000e+00 : f32
    %46 = vector.shape_cast %45 : vector<1x16x1xi1> to vector<1x16x1xi1>
    %47 = vector.broadcast %46 : vector<1x16x1xi1> to vector<8x16x128xi1>
    %48 = vector.broadcast %cst_19 : f32 to vector<8x16x128xf32>
    %49 = arith.select %47, %43, %48 : vector<8x16x128xi1>, vector<8x16x128xf32>
    %50 = arith.truncf %49 : vector<8x16x128xf32> to vector<8x16x128xbf16>
    %51 = arith.truncf %42 : vector<8x16x128xf32> to vector<8x16x128xbf16>
    %c15_i32_20 = arith.constant 15 : i32
    %52 = tpu.dynamic_rotate %42 by %c15_i32_20 dim 1 : vector<8x16x128xf32>, i32 -> vector<8x16x128xf32>
    %c15_i32_21 = arith.constant 15 : i32
    %53 = vector.broadcast %c15_i32_21 : i32 to vector<1x16x1xi32>
    %54 = arith.cmpi slt, %40, %53 : vector<1x16x1xi32>
    %cst_22 = arith.constant 0.000000e+00 : f32
    %55 = vector.shape_cast %54 : vector<1x16x1xi1> to vector<1x16x1xi1>
    %56 = vector.broadcast %55 : vector<1x16x1xi1> to vector<8x16x128xi1>
    %57 = vector.broadcast %cst_22 : f32 to vector<8x16x128xf32>
    %58 = arith.select %56, %52, %57 : vector<8x16x128xi1>, vector<8x16x128xf32>
    %59 = arith.truncf %58 : vector<8x16x128xf32> to vector<8x16x128xbf16>
    %60 = tpu.concatenate %50, %51, %59 in 2 : vector<8x16x128xbf16>, vector<8x16x128xbf16>, vector<8x16x128xbf16> -> vector<8x16x384xbf16>
    %61 = vector.shape_cast %60 : vector<8x16x384xbf16> to vector<128x384xbf16>
    %c0_23 = arith.constant 0 : index
    %c0_24 = arith.constant 0 : index
    %c0_25 = arith.constant 0 : index
    %62 = vector.load %arg5[%c0_23, %c0_24, %c0_25] : memref<3x384x128xbf16, #tpu.memory_space<vmem>>, vector<1x384x128xbf16>
    %63 = vector.shape_cast %62 : vector<1x384x128xbf16> to vector<384x128xbf16>
    %cst_26 = arith.constant dense<0.000000e+00> : vector<128x128xf32>
    %64 = tpu.matmul %61, %63, %cst_26 {dimension_numbers = #tpu.dot_dimension_numbers<[1], [0], [0], [1], [0, 0, 1, 1], [], []>} : vector<128x384xbf16>, vector<384x128xbf16>, vector<128x128xf32> -> vector<128x128xf32>
    %65 = arith.addf %41, %64 : vector<128x128xf32>
    %66 = vector.extract_strided_slice %39 {offsets = [1, 0, 0], sizes = [8, 16, 128], strides = [1, 1, 1]} : vector<10x16x128xf32> to vector<8x16x128xf32>
    %c1_i32_27 = arith.constant 1 : i32
    %67 = tpu.dynamic_rotate %66 by %c1_i32_27 dim 1 : vector<8x16x128xf32>, i32 -> vector<8x16x128xf32>
    %c1_i32_28 = arith.constant 1 : i32
    %68 = vector.broadcast %c1_i32_28 : i32 to vector<1x16x1xi32>
    %69 = arith.cmpi sge, %40, %68 : vector<1x16x1xi32>
    %cst_29 = arith.constant 0.000000e+00 : f32
    %70 = vector.shape_cast %69 : vector<1x16x1xi1> to vector<1x16x1xi1>
    %71 = vector.broadcast %70 : vector<1x16x1xi1> to vector<8x16x128xi1>
    %72 = vector.broadcast %cst_29 : f32 to vector<8x16x128xf32>
    %73 = arith.select %71, %67, %72 : vector<8x16x128xi1>, vector<8x16x128xf32>
    %74 = arith.truncf %73 : vector<8x16x128xf32> to vector<8x16x128xbf16>
    %75 = arith.truncf %66 : vector<8x16x128xf32> to vector<8x16x128xbf16>
    %c15_i32_30 = arith.constant 15 : i32
    %76 = tpu.dynamic_rotate %66 by %c15_i32_30 dim 1 : vector<8x16x128xf32>, i32 -> vector<8x16x128xf32>
    %c15_i32_31 = arith.constant 15 : i32
    %77 = vector.broadcast %c15_i32_31 : i32 to vector<1x16x1xi32>
    %78 = arith.cmpi slt, %40, %77 : vector<1x16x1xi32>
    %cst_32 = arith.constant 0.000000e+00 : f32
    %79 = vector.shape_cast %78 : vector<1x16x1xi1> to vector<1x16x1xi1>
    %80 = vector.broadcast %79 : vector<1x16x1xi1> to vector<8x16x128xi1>
    %81 = vector.broadcast %cst_32 : f32 to vector<8x16x128xf32>
    %82 = arith.select %80, %76, %81 : vector<8x16x128xi1>, vector<8x16x128xf32>
    %83 = arith.truncf %82 : vector<8x16x128xf32> to vector<8x16x128xbf16>
    %84 = tpu.concatenate %74, %75, %83 in 2 : vector<8x16x128xbf16>, vector<8x16x128xbf16>, vector<8x16x128xbf16> -> vector<8x16x384xbf16>
    %85 = vector.shape_cast %84 : vector<8x16x384xbf16> to vector<128x384xbf16>
    %c1 = arith.constant 1 : index
    %c0_33 = arith.constant 0 : index
    %c0_34 = arith.constant 0 : index
    %86 = vector.load %arg5[%c1, %c0_33, %c0_34] : memref<3x384x128xbf16, #tpu.memory_space<vmem>>, vector<1x384x128xbf16>
    %87 = vector.shape_cast %86 : vector<1x384x128xbf16> to vector<384x128xbf16>
    %cst_35 = arith.constant dense<0.000000e+00> : vector<128x128xf32>
    %88 = tpu.matmul %85, %87, %cst_35 {dimension_numbers = #tpu.dot_dimension_numbers<[1], [0], [0], [1], [0, 0, 1, 1], [], []>} : vector<128x384xbf16>, vector<384x128xbf16>, vector<128x128xf32> -> vector<128x128xf32>
    %89 = arith.addf %65, %88 : vector<128x128xf32>
    %90 = vector.extract_strided_slice %39 {offsets = [2, 0, 0], sizes = [8, 16, 128], strides = [1, 1, 1]} : vector<10x16x128xf32> to vector<8x16x128xf32>
    %c1_i32_36 = arith.constant 1 : i32
    %91 = tpu.dynamic_rotate %90 by %c1_i32_36 dim 1 : vector<8x16x128xf32>, i32 -> vector<8x16x128xf32>
    %c1_i32_37 = arith.constant 1 : i32
    %92 = vector.broadcast %c1_i32_37 : i32 to vector<1x16x1xi32>
    %93 = arith.cmpi sge, %40, %92 : vector<1x16x1xi32>
    %cst_38 = arith.constant 0.000000e+00 : f32
    %94 = vector.shape_cast %93 : vector<1x16x1xi1> to vector<1x16x1xi1>
    %95 = vector.broadcast %94 : vector<1x16x1xi1> to vector<8x16x128xi1>
    %96 = vector.broadcast %cst_38 : f32 to vector<8x16x128xf32>
    %97 = arith.select %95, %91, %96 : vector<8x16x128xi1>, vector<8x16x128xf32>
    %98 = arith.truncf %97 : vector<8x16x128xf32> to vector<8x16x128xbf16>
    %99 = arith.truncf %90 : vector<8x16x128xf32> to vector<8x16x128xbf16>
    %c15_i32_39 = arith.constant 15 : i32
    %100 = tpu.dynamic_rotate %90 by %c15_i32_39 dim 1 : vector<8x16x128xf32>, i32 -> vector<8x16x128xf32>
    %c15_i32_40 = arith.constant 15 : i32
    %101 = vector.broadcast %c15_i32_40 : i32 to vector<1x16x1xi32>
    %102 = arith.cmpi slt, %40, %101 : vector<1x16x1xi32>
    %cst_41 = arith.constant 0.000000e+00 : f32
    %103 = vector.shape_cast %102 : vector<1x16x1xi1> to vector<1x16x1xi1>
    %104 = vector.broadcast %103 : vector<1x16x1xi1> to vector<8x16x128xi1>
    %105 = vector.broadcast %cst_41 : f32 to vector<8x16x128xf32>
    %106 = arith.select %104, %100, %105 : vector<8x16x128xi1>, vector<8x16x128xf32>
    %107 = arith.truncf %106 : vector<8x16x128xf32> to vector<8x16x128xbf16>
    %108 = tpu.concatenate %98, %99, %107 in 2 : vector<8x16x128xbf16>, vector<8x16x128xbf16>, vector<8x16x128xbf16> -> vector<8x16x384xbf16>
    %109 = vector.shape_cast %108 : vector<8x16x384xbf16> to vector<128x384xbf16>
    %c2 = arith.constant 2 : index
    %c0_42 = arith.constant 0 : index
    %c0_43 = arith.constant 0 : index
    %110 = vector.load %arg5[%c2, %c0_42, %c0_43] : memref<3x384x128xbf16, #tpu.memory_space<vmem>>, vector<1x384x128xbf16>
    %111 = vector.shape_cast %110 : vector<1x384x128xbf16> to vector<384x128xbf16>
    %cst_44 = arith.constant dense<0.000000e+00> : vector<128x128xf32>
    %112 = tpu.matmul %109, %111, %cst_44 {dimension_numbers = #tpu.dot_dimension_numbers<[1], [0], [0], [1], [0, 0, 1, 1], [], []>} : vector<128x384xbf16>, vector<384x128xbf16>, vector<128x128xf32> -> vector<128x128xf32>
    %113 = arith.addf %89, %112 : vector<128x128xf32>
    %c0_45 = arith.constant 0 : index
    %c0_46 = arith.constant 0 : index
    %114 = vector.load %arg6[%c0_45, %c0_46] : memref<1x128xf32, #tpu.memory_space<vmem>>, vector<1x128xf32>
    %115 = vector.broadcast %114 : vector<1x128xf32> to vector<128x128xf32>
    %116 = arith.addf %113, %115 : vector<128x128xf32>
    %c0_i32_47 = arith.constant 0 : i32
    %117 = arith.cmpi eq, %arg1, %c0_i32_47 : i32
    %118 = arith.extui %117 : i1 to i32
    %c0_i32_48 = arith.constant 0 : i32
    %119 = arith.cmpi ne, %118, %c0_i32_48 : i32
    scf.if %119 {
      %cst_68 = arith.constant 0.000000e+00 : f32
      %144 = vector.broadcast %cst_68 : f32 to vector<1x1x128xf32>
      %c0_69 = arith.constant 0 : index
      %c0_70 = arith.constant 0 : index
      %c0_71 = arith.constant 0 : index
      %145 = vector.load %arg8[%c0_69, %c0_70, %c0_71] : memref<1x1x128xf32, #tpu.memory_space<vmem>>, vector<1x1x128xf32>
      tpu.vector_store %arg8[%c0_69, %c0_70, %c0_71], %144 {strides = array<i32>} : memref<1x1x128xf32, #tpu.memory_space<vmem>>, vector<1x1x128xf32>,
      %cst_72 = arith.constant 0.000000e+00 : f32
      %146 = vector.broadcast %cst_72 : f32 to vector<1x1x128xf32>
      %c0_73 = arith.constant 0 : index
      %c0_74 = arith.constant 0 : index
      %c0_75 = arith.constant 0 : index
      %147 = vector.load %arg9[%c0_73, %c0_74, %c0_75] : memref<1x1x128xf32, #tpu.memory_space<vmem>>, vector<1x1x128xf32>
      tpu.vector_store %arg9[%c0_73, %c0_74, %c0_75], %146 {strides = array<i32>} : memref<1x1x128xf32, #tpu.memory_space<vmem>>, vector<1x1x128xf32>,
    } else {
    }
    %c0_49 = arith.constant 0 : index
    %c0_50 = arith.constant 0 : index
    %c0_51 = arith.constant 0 : index
    %120 = vector.load %arg8[%c0_49, %c0_50, %c0_51] : memref<1x1x128xf32, #tpu.memory_space<vmem>>, vector<1x1x128xf32>
    %cst_52 = arith.constant dense<0.000000e+00> : vector<128xf32>
    %121 = vector.multi_reduction <add>, %116, %cst_52 [0] : vector<128x128xf32> to vector<128xf32>
    %122 = vector.shape_cast %121 : vector<128xf32> to vector<1x1x128xf32>
    %123 = arith.addf %120, %122 : vector<1x1x128xf32>
    %c0_53 = arith.constant 0 : index
    %c0_54 = arith.constant 0 : index
    %c0_55 = arith.constant 0 : index
    %124 = vector.load %arg8[%c0_53, %c0_54, %c0_55] : memref<1x1x128xf32, #tpu.memory_space<vmem>>, vector<1x1x128xf32>
    tpu.vector_store %arg8[%c0_53, %c0_54, %c0_55], %123 {strides = array<i32>} : memref<1x1x128xf32, #tpu.memory_space<vmem>>, vector<1x1x128xf32>,
    %c0_56 = arith.constant 0 : index
    %c0_57 = arith.constant 0 : index
    %c0_58 = arith.constant 0 : index
    %125 = vector.load %arg9[%c0_56, %c0_57, %c0_58] : memref<1x1x128xf32, #tpu.memory_space<vmem>>, vector<1x1x128xf32>
    %126 = arith.mulf %116, %116 : vector<128x128xf32>
    %cst_59 = arith.constant dense<0.000000e+00> : vector<128xf32>
    %127 = vector.multi_reduction <add>, %126, %cst_59 [0] : vector<128x128xf32> to vector<128xf32>
    %128 = vector.shape_cast %127 : vector<128xf32> to vector<1x1x128xf32>
    %129 = arith.addf %125, %128 : vector<1x1x128xf32>
    %c0_60 = arith.constant 0 : index
    %c0_61 = arith.constant 0 : index
    %c0_62 = arith.constant 0 : index
    %130 = vector.load %arg9[%c0_60, %c0_61, %c0_62] : memref<1x1x128xf32, #tpu.memory_space<vmem>>, vector<1x1x128xf32>
    tpu.vector_store %arg9[%c0_60, %c0_61, %c0_62], %129 {strides = array<i32>} : memref<1x1x128xf32, #tpu.memory_space<vmem>>, vector<1x1x128xf32>,
    %131 = tpu.iota {dimensions = array<i32: 1>} : vector<1x128xi32>
    %c8_i32_63 = arith.constant 8 : i32
    %132 = vector.broadcast %c8_i32_63 : i32 to vector<1x128xi32>
    %133 = arith.cmpi sge, %131, %132 : vector<1x128xi32>
    %c12_i32 = arith.constant 12 : i32
    %134 = vector.broadcast %c12_i32 : i32 to vector<1x128xi32>
    %135 = arith.cmpi slt, %131, %134 : vector<1x128xi32>
    %136 = arith.andi %133, %135 : vector<1x128xi1>
    %137 = vector.shape_cast %11 : vector<8x16x128xbf16> to vector<128x128xbf16>
    %138 = arith.truncf %116 : vector<128x128xf32> to vector<128x128xbf16>
    %139 = vector.shape_cast %136 : vector<1x128xi1> to vector<1x128xi1>
    %140 = vector.broadcast %139 : vector<1x128xi1> to vector<128x128xi1>
    %141 = arith.select %140, %138, %137 : vector<128x128xi1>, vector<128x128xbf16>
    %142 = vector.shape_cast %141 : vector<128x128xbf16> to vector<1x8x16x128xbf16>
    %c0_64 = arith.constant 0 : index
    %c0_65 = arith.constant 0 : index
    %c0_66 = arith.constant 0 : index
    %c0_67 = arith.constant 0 : index
    %143 = vector.load %arg7[%c0_64, %c0_65, %c0_66, %c0_67] : memref<1x8x16x128xbf16, #tpu.memory_space<vmem>>, vector<1x8x16x128xbf16>
    tpu.vector_store %arg7[%c0_64, %c0_65, %c0_66, %c0_67], %142 {strides = array<i32>} : memref<1x8x16x128xbf16, #tpu.memory_space<vmem>>, vector<1x8x16x128xbf16>,
    return
  }
  func.func @transform_0(%arg0: i32, %arg1: i32) -> (i32, i32, i32, i32) {
    %c0_i32 = arith.constant 0 : i32
    %c0_i32_0 = arith.constant 0 : i32
    %c0_i32_1 = arith.constant 0 : i32
    %c0_i32_2 = arith.constant 0 : i32
    return %arg0, %c0_i32, %c0_i32_0, %c0_i32_1 : i32, i32, i32, i32
  }
  func.func @transform_1(%arg0: i32, %arg1: i32) -> (i32, i32) {
    %c0_i32 = arith.constant 0 : i32
    %c0_i32_0 = arith.constant 0 : i32
    %c0_i32_1 = arith.constant 0 : i32
    return %c0_i32, %c0_i32_0 : i32, i32
  }
  func.func @transform_2(%arg0: i32, %arg1: i32) -> (i32, i32) {
    %c0_i32 = arith.constant 0 : i32
    %c0_i32_0 = arith.constant 0 : i32
    %c0_i32_1 = arith.constant 0 : i32
    return %c0_i32, %c0_i32_0 : i32, i32
  }
  func.func @transform_3(%arg0: i32, %arg1: i32) -> (i32, i32, i32) {
    %c0_i32 = arith.constant 0 : i32
    %c0_i32_0 = arith.constant 0 : i32
    %c0_i32_1 = arith.constant 0 : i32
    %c0_i32_2 = arith.constant 0 : i32
    return %c0_i32, %c0_i32_0, %c0_i32_1 : i32, i32, i32
  }
  func.func @transform_4(%arg0: i32, %arg1: i32) -> (i32, i32) {
    %c0_i32 = arith.constant 0 : i32
    %c0_i32_0 = arith.constant 0 : i32
    %c0_i32_1 = arith.constant 0 : i32
    return %c0_i32, %c0_i32_0 : i32, i32
  }
  func.func @transform_5(%arg0: i32, %arg1: i32) -> (i32, i32, i32, i32) {
    %c0_i32 = arith.constant 0 : i32
    %c0_i32_0 = arith.constant 0 : i32
    %c0_i32_1 = arith.constant 0 : i32
    return %arg0, %arg1, %c0_i32, %c0_i32_0 : i32, i32, i32, i32
  }
  func.func @transform_6(%arg0: i32, %arg1: i32) -> (i32, i32, i32) {
    %c0_i32 = arith.constant 0 : i32
    %c0_i32_0 = arith.constant 0 : i32
    %c0_i32_1 = arith.constant 0 : i32
    return %arg0, %c0_i32, %c0_i32_0 : i32, i32, i32
  }
  func.func @transform_7(%arg0: i32, %arg1: i32) -> (i32, i32, i32) {
    %c0_i32 = arith.constant 0 : i32
    %c0_i32_0 = arith.constant 0 : i32
    %c0_i32_1 = arith.constant 0 : i32
    return %arg0, %c0_i32, %c0_i32_0 : i32, i32, i32
  }
}

</mosaic_0001>

<bundles_post_ra>
// kernel: dense_block_forward.2
= control target key start
LH: loop header
LB: loop body
LE: loop exit
PB: predicated region body
PF: predicated region fallthrough
CT: control target
= control target key end

     0   :  { %s3342_s24 = smov 0   ;;  %s3344_s25 = smov 0   ;;  %s4715_s0 = inlined_call_operand.vmem [shape: bf16[2,16,16,128], index: 0, kind: input, shape index: {}, may-alias: {0,5}]   ;;  %s4716_s1 = inlined_call_operand.vmem [shape: f32[1,128], index: 1, kind: input, shape index: {}]   ;;  %s4717_s2 = inlined_call_operand.vmem [shape: f32[1,128], index: 2, kind: input, shape index: {}]   ;;  %s4718_s3 = inlined_call_operand.vmem [shape: bf16[3,384,128], index: 3, kind: input, shape index: {}]   ;;  %s4719_s4 = inlined_call_operand.vmem [shape: f32[1,128], index: 4, kind: input, shape index: {}]   ;;  %s4720_s5 = inlined_call_operand.vmem [shape: bf16[2,16,16,128], index: 5, kind: output, shape index: {0}, may-alias: {0,5}]   ;;  %s4721_s6 = inlined_call_operand.vmem [shape: f32[2,1,128], index: 6, kind: output, shape index: {1}]   ;;  %s4722_s7 = inlined_call_operand.vmem [shape: f32[2,1,128], index: 7, kind: output, shape index: {2}]  }
   0x1   :  { %s3346_s26 = smov 0   ;;  %s3348_s27 = smov 0  }
   0x2   :  { %s3350_s28 = smov 0  }
   0x3 LB: > { %s27_s29 = sadd.s32 1, %s3289_s26  ;;  %s30_s30 = sadd.s32 1, %s3293_s27  ;;  %s3297_s28 = sphi %s3350_s28, %s18_s28   ;;  %s3293_s27 = sphi %s3348_s27, %s4816_s27   ;;  %s3289_s26 = sphi %s3346_s26, %s4815_s26   ;;  %s3285_s25 = sphi %s3344_s25, %s4814_s25   ;;  %s3281_s24 = sphi %s3342_s24, %s4813_s24  }
   0x4   : > { %p28_p0 = scmp.ge.s32.totalorder %s27_s29, 2  ;;  %p2270_p1 = scmp.ge.s32.totalorder %s3297_s28, 1 }
   0x5   : > { %p256_p2 = scmp.lt.s32.totalorder %s3297_s28, 5 }
   0x6   : > { %s4818_s29 = smov (%p28_p0, %s27_s29), 0  ;;  %s4820_s30 = smov (!%p28_p0, %s30_s30), %s3293_s27 }
   0x7   : > { %p257_p3 = pnand %p2270_p1, %p256_p2  ;;  %p32_p4 = scmp.ge.s32.totalorder %s4820_s30, 2 }
   0x9   : > { %s4822_s30 = smov (%p32_p4, %s4820_s30), 0  ;;  %260 = sbr.rel (%p257_p3) target bundleno = 464 (0x1d0), region = 40 }
  0x10   : > { %v3187_v0 = vld [vmem:[%s4718_s3 + $0x100] sm:$0xff]   ;;  %p299_p5 = scmp.lt.s32.totalorder %s3285_s25, 1  ;;  %s3381_s12 = sshll.u32 %s3281_s24, 3  ;;  %v3190_v3 = vld [vmem:[%s4718_s3 + $0x108] sm:$0xff]   ;;  %v3193_v6 = vld [vmem:[%s4718_s3 + $0x110] sm:$0xff]   ;;  %v4723_v14 = vlaneseq  ;;  %vm3299_vm15 = vmmov 1  }
  0x11   : > { %v3188_v1 = vld [vmem:[%s4718_s3 + $0x140] sm:$0xff]   ;;  %2712 = vmatprep.subr.bf16.mxu0 %v3187_v0  ;;  %p307_p6 = scmp.lt.s32.totalorder %s3381_s12, 15  ;;  %v3191_v4 = vld [vmem:[%s4718_s3 + $0x148] sm:$0xff]   ;;  %v3194_v7 = vld [vmem:[%s4718_s3 + $0x150] sm:$0xff]   ;;  %s328_s16 = sadd.s32 8, %s3381_s12 }
  0x12   : > { %v3189_v2 = vld [vmem:[%s4718_s3 + $0xc0] sm:$0xff]   ;;  %s4824_s25 = smov (!%p299_p5, %s3285_s25), 1  ;;  %2952 = vmatprep.subr.bf16.mxu1 %v3188_v1  ;;  %v3192_v5 = vld [vmem:[%s4718_s3 + $0xc8] sm:$0xff]   ;;  %v3195_v8 = vld [vmem:[%s4718_s3 + $0xd0] sm:$0xff]   ;;  %v3458_v19 = vshrl.u32 %v4723_v14, 7  ;;  %p3863_p8 = scmp.lt.s32.totalorder %s328_s16, 15 }
  0x13   : > { %2713 = vmatpush3.bf16.msra.mxu0 %v3189_v2  ;;  %2953 = vmatpush3.bf16.msra.mxu1 %v3188_v1  ;;  %s3399_s21 = scalar_lea.vmem %s4721_s6, %s4824_s25  ;;  %s2275_s8 = sshll.u32 %s4824_s25, 5  ;;  %v3196_v9 = vld [vmem:[%s4718_s3 + $0x118] sm:$0xff]   ;;  %v3199_v12 = vld [vmem:[%s4718_s3 + $0x120] sm:$0xff]   ;;  %v3202_v17 = vld [vmem:[%s4718_s3 + $0x128] sm:$0xff]  }
  0x14   : > { %2714 = vmatprep.subr.bf16.mxu0 %v3190_v3  ;;  %2954 = vmatprep.subr.bf16.mxu1 %v3191_v4  ;;  %s308_s11 = scalar_select %p307_p6, %s3381_s12, 15  ;;  %v3197_v10 = vld [vmem:[%s4718_s3 + $0x158] sm:$0xff]   ;;  %v3200_v13 = vld [vmem:[%s4718_s3 + $0x160] sm:$0xff]   ;;  %v3203_v18 = vld [vmem:[%s4718_s3 + $0x168] sm:$0xff]   ;;  %v3480_v24 = vadd.s32 8, %v3458_v19  ;;  %vm570_vm2 = vcmp.ge.s32.totalorder %v3458_v19, 1 }
  0x15   : > { %s3416_s17 = scalar_lea.vmem %s4722_s7, %s4824_s25  ;;  %v3198_v11 = vld [vmem:[%s4718_s3 + $0xd8] sm:$0xff]   ;;  %v3201_v15 = vld [vmem:[%s4718_s3 + $0xe0] sm:$0xff]   ;;  %v3204_v21 = vld [vmem:[%s4718_s3 + $0xe8] sm:$0xff]   ;;  %vm624_vm3 = vcmp.lt.s32.totalorder %v3458_v19, 7  ;;  %vm553_vm8 = vcmp.lt.s32.totalorder %v3458_v19, 1  ;;  %s4828_s16 = smov (!%p3863_p8, %s328_s16), 15 }
  0x16   : > { %s2274_s20 = sshll.u32 %s308_s11, 1  ;;  %v3205_v22 = vld [vmem:[%s4718_s3 + $0x130] sm:$0xff]   ;;  %v3496_v29 = vld [vmem:[%s4716_s1] ss:$0 sm:$0xff]  ;;  %v3208_v30 = vld [vmem:[%s4718_s3 + $0x138] sm:$0xff]   ;;  %vm642_vm4 = vcmp.lt.s32.totalorder %v3480_v24, 15 }
  0x17   : > { %2715 = vmatpush3.bf16.msra.mxu0 %v3192_v5  ;;  %2955 = vmatpush3.bf16.msra.mxu1 %v3191_v4  ;;  %s311_s9 = sadd.s32 %s2275_s8, %s2274_s20  ;;  %s3439_s8 = sadd.s32 4294967295, %s3381_s12  ;;  %v3206_v23 = vld [vmem:[%s4718_s3 + $0x170] sm:$0xff]   ;;  %v3209_v31 = vld [vmem:[%s4718_s3 + $0x178] sm:$0xff]   ;;  %v3514_v35 = vld [vmem:[%s4717_s2] ss:$0 sm:$0xff] }
  0x18   : > { %2716 = vmatprep.subr.bf16.mxu0 %v3193_v6  ;;  %2956 = vmatprep.subr.bf16.mxu1 %v3194_v7  ;;  %s2276_s14 = sshll.u32 %s311_s9, 2  ;;  %v3449_v16 = vstv %s3439_s8  ;;  %s2702_s20 = sshll.u32 %s3281_s24, 6  ;;  %v3207_v25 = vld [vmem:[%s4718_s3 + $0xf0] sm:$0xff]   ;;  %v3210_v38 = vld [vmem:[%s4718_s3 + $0xf8] sm:$0xff]   ;;  %v3211_v48 = vld [vmem:[%s4718_s3 + $0x40] sm:$0xff]  }
  0x19   : > { %s3433_s11 = scalar_lea.vmem %s4720_s5, %s2276_s14  ;;  %s2699_s14 = sshll.u32 %s4824_s25, 7  ;;  %v455_v20 = vadd.s32 1, %v3449_v16  ;;  %v456_v26 = vadd.s32 2, %v3449_v16  ;;  %v3527_v42 = vadd.s32 3, %v3449_v16  ;;  %v3531_v44 = vadd.s32 4, %v3449_v16  ;;  %v3212_v49 = vld [vmem:[%s4718_s3 + $0x1c0] sm:$0xff]  }
  0x1a   : > { %s3463_s25 = scalar_lea.vmem %s4715_s0, %s2699_s14  ;;  %v3557_v55 = vadd.s32 5, %v3449_v16  ;;  %p326_p7 = scmp.gt.s32.totalorder %s3439_s8, 0  ;;  %v3214_v3 = vld [vmem:[%s4718_s3 + $0x180] sm:$0xff]   ;;  %v463_v50 = vadd.s32 9, %v3449_v16 }
  0x1b   : > { %2717 = vmatpush3.bf16.msra.mxu0 %v3195_v8  ;;  %2957 = vmatpush3.bf16.msra.mxu1 %v3194_v7  ;;  %s3477_s14 = scalar_lea.vmem %s3463_s25, %s2702_s20  ;;  %vm465_vm0 = vcmp.ge.s32.totalorder %v455_v20, 0  ;;  %vm475_vm1 = vcmp.lt.s32.totalorder %v455_v20, 16  ;;  %vm466_vm5 = vcmp.ge.s32.totalorder %v456_v26, 0  ;;  %vm476_vm6 = vcmp.lt.s32.totalorder %v456_v26, 16  ;;  %p2672_p9 = scmp.ne.s32.totalorder %s3281_s24, 0 }
  0x1c   : > { %2718 = vmatprep.subr.bf16.mxu0 %v3196_v9  ;;  %2958 = vmatprep.subr.bf16.mxu1 %v3197_v10  ;;  %v3488_v27 = vld [vmem:[%s3477_s14] sm:$0xf]  ;;  %v3491_v28 = vld [vmem:[%s3477_s14 + $0x4] sm:$0xf]  ;;  %v3509_v34 = vld [vmem:[%s3477_s14 + $0x8] sm:$0xf] }
  0x1d   : > { %v364_v32 = vunpack.c.l.bf16 %v3488_v27  ;;  %v365_v33 = vunpack.c.l.bf16 %v3491_v28  ;;  %v3517_v36 = vld [vmem:[%s3477_s14 + $0xc] sm:$0xf]  ;;  %v366_v37 = vunpack.c.l.bf16 %v3509_v34  ;;  %vm3544_vm7 = vmand %vm465_vm0, %vm475_vm1  ;;  %vm467_vm10 = vcmp.ge.s32.totalorder %v3527_v42, 0  ;;  %v3602_v8 = vld [vmem:[%s3477_s14 + $0x10] sm:$0xf]  ;;  %s4826_s8 = smov (!%p326_p7, %s3439_s8), 0 }
  0x1e   : > { %v367_v41 = vunpack.c.l.bf16 %v3517_v36  ;;  %vm4736_vm9 = vmpackc.low %vm3544_vm7, %vm3544_vm7  ;;  %vm477_vm11 = vcmp.lt.s32.totalorder %v3527_v42, 16  ;;  %vm468_vm13 = vcmp.ge.s32.totalorder %v3531_v44, 0  ;;  %vm478_vm14 = vcmp.lt.s32.totalorder %v3531_v44, 16  ;;  %4751 = vst [vmem:[#allocation2_spill] sm:$0xff] %v3602_v8  ;;  %v3605_v9 = vld [vmem:[%s3477_s14 + $0x14] sm:$0xf] }
  0x1f   : > { %2719 = vmatpush3.bf16.msra.mxu0 %v3198_v11  ;;  %2959 = vmatpush3.bf16.msra.mxu1 %v3197_v10  ;;  %v390_v39 = vmul.f32 %v3496_v29, %v364_v32  ;;  %v391_v40 = vmul.f32 %v3496_v29, %v365_v33  ;;  %v392_v43 = vmul.f32 %v3496_v29, %v366_v37  ;;  %vm3561_vm12 = vmand %vm466_vm5, %vm476_vm6  ;;  %v368_v26 = vunpack.c.l.bf16 %v3602_v8  ;;  %v3218_v33 = vld [vmem:[%s4718_s3 + $0x1c8] sm:$0xff]   ;;  %s2700_s10 = sshll.u32 %s4826_s8, 3  ;;  %s2703_s8 = sshll.u32 %s4828_s16, 3  ;;  %v3254_v44 = vld [vmem:[%s4718_s3 + $0x218] sm:$0xff]  }
  0x20   : > { %2720 = vmatprep.subr.bf16.mxu0 %v3199_v12  ;;  %2960 = vmatprep.subr.bf16.mxu1 %v3200_v13  ;;  %v393_v47 = vmul.f32 %v3496_v29, %v367_v41  ;;  %vm3576_vm0 = vmpackc.low %vm3299_vm15, %vm570_vm2  ;;  %vm469_vm5 = vcmp.ge.s32.totalorder %v3557_v55, 0  ;;  %vm479_vm6 = vcmp.lt.s32.totalorder %v3557_v55, 16  ;;  %s333_s20 = scalar_lea.vmem %s3463_s25, %s2700_s10  ;;  %s4060_s16 = scalar_lea.vmem %s3463_s25, %s2703_s8 }
  0x21   : > { %v416_v45 = vadd.f32 %v3514_v35, %v390_v39  ;;  %v417_v46 = vadd.f32 %v3514_v35, %v391_v40  ;;  %v418_v51 = vadd.f32 %v3514_v35, %v392_v43  ;;  %vm3591_vm1 = vmpackc.low %vm642_vm4, %vm3299_vm15  ;;  %v394_v43 = vmul.f32 %v3496_v29, %v368_v26  ;;  %v3224_v26 = vld [vmem:[%s4718_s3 + $0x1d0] sm:$0xff]  }
  0x22   : > { %v419_v54 = vadd.f32 %v3514_v35, %v393_v47  ;;  %vm3631_vm2 = vmpackc.low %vm3561_vm12, %vm3561_vm12  ;;  %v3666_v47 = vadd.s32 6, %v3449_v16 }
  0x23   : > { %2721 = vmatpush3.bf16.msra.mxu0 %v3201_v15  ;;  %2961 = vmatpush3.bf16.msra.mxu1 %v3200_v13  ;;  %v436_v52 = vmax.f32 %v416_v45, 0.0  ;;  %v437_v53 = vmax.f32 %v417_v46, 0.0  ;;  %v438_v56 = vmax.f32 %v418_v51, 0.0  ;;  %v3616_v15 = vld [vmem:[%s3477_s14 + $0x18] sm:$0xf]  ;;  %v3220_v46 = vld [vmem:[%s4718_s3 + $0x188] sm:$0xff]   ;;  %vm3686_vm4 = vmand %vm467_vm10, %vm477_vm11 }
  0x24   : > { %2722 = vmatprep.subr.bf16.mxu0 %v3202_v17  ;;  %2962 = vmatprep.subr.bf16.mxu1 %v3203_v18  ;;  %v439_v61 = vmax.f32 %v419_v54, 0.0  ;;  %4752 = vst [vmem:[#allocation3_spill] sm:$0xff] %v3616_v15  ;;  %v3619_v17 = vld [vmem:[%s3477_s14 + $0x1c] sm:$0xf]  ;;  %v370_v39 = vunpack.c.l.bf16 %v3616_v15  ;;  %v420_v54 = vadd.f32 %v3514_v35, %v394_v43  ;;  %vm3710_vm10 = vmand %vm468_vm13, %vm478_vm14  ;;  %vm480_vm13 = vcmp.lt.s32.totalorder %v3666_v47, 16 }
  0x25   : > { %v516_v58 = vsel %vm3544_vm7, %v436_v52, 0.0  ;;  %v517_v59 = vsel %vm3544_vm7, %v437_v53, 0.0  ;;  %v3571_v60 = vpack.c.bf16 %v437_v53, %v436_v52  ;;  %v518_v5 = vsel %vm3561_vm12, %v438_v56, 0.0  ;;  %4753 = vst [vmem:[#allocation4_spill] sm:$0xff] %v3619_v17  ;;  %vm3729_vm11 = vmpackc.low %vm3686_vm4, %vm3686_vm4 }
  0x26   : > { %v538_v62 = vrot.slane %v516_v58, 7  ;;  %v546_v63 = vrot.slane %v517_v59, 7  ;;  %v609_v0 = vrot.slane %v516_v58, 1  ;;  %v617_v1 = vrot.slane %v517_v59, 1  ;;  %v3217_v58 = vld [vmem:[%s4718_s3 + $0x50] sm:$0xff]   ;;  %vm3793_vm14 = vmand %vm469_vm5, %vm479_vm6 }
  0x27   : > { %2723 = vmatpush3.bf16.msra.mxu0 %v3204_v21  ;;  %2963 = vmatpush3.bf16.msra.mxu1 %v3203_v18  ;;  %v519_v6 = vsel %vm3561_vm12, %v439_v61, 0.0  ;;  %v3599_v7 = vpack.c.bf16 %v439_v61, %v438_v56  ;;  %v610_v21 = vrot.slane %v518_v5, 1  ;;  %v371_v40 = vunpack.c.l.bf16 %v3619_v17  ;;  %v3694_v59 = vld [vmem:[%s3477_s14 + $0x20] sm:$0xf]  ;;  %vm3853_vm15 = vmpackc.low %vm3710_vm10, %vm3710_vm10 }
  0x28   : > { %2724 = vmatprep.subr.bf16.mxu0 %v3205_v22  ;;  %2964 = vmatprep.subr.bf16.mxu1 %v3206_v23  ;;  %v626_v10 = vsel %vm624_vm3, %v609_v0, %v617_v1  ;;  %v634_v11 = vsel %vm624_vm3, %v617_v1, %v609_v0  ;;  %v555_v12 = vsel %vm553_vm8, %v538_v62, %v546_v63  ;;  %v618_v22 = vrot.slane %v519_v6, 1  ;;  %v3715_v0 = vld [vmem:[%s3477_s14 + $0x24] sm:$0xf] }
  0x29   : > { %2361 = vmatprep.mubr.msk.bf16.mxu0 %vm4736_vm9, %v3571_v60  ;;  %v563_v13 = vsel %vm553_vm8, %v546_v63, %v538_v62  ;;  %v3621_v18 = vpack.c.bf16 %v634_v11, %v626_v10  ;;  %v547_v32 = vrot.slane %v519_v6, 7  ;;  %v396_v52 = vmul.f32 %v3496_v29, %v370_v39  ;;  %4758 = vst [vmem:[#allocation5_spill] sm:$0xff] %v3694_v59  ;;  %v3735_v11 = vld [vmem:[%s3477_s14 + $0x2c] sm:$0xf] }
  0x2a   : > { %v3623_v20 = vpack.c.bf16 %v555_v12, %v563_v13  ;;  %v627_v37 = vsel %vm624_vm3, %v610_v21, %v618_v22  ;;  %v397_v53 = vmul.f32 %v3496_v29, %v371_v40  ;;  %4761 = vst [vmem:[#allocation6_spill] sm:$0xff] %v3715_v0  ;;  %v372_v1 = vunpack.c.l.bf16 %v3694_v59  ;;  %4765 = vst [vmem:[#allocation8_spill] sm:$0xff] %v3735_v11 }
  0x2b   : > { %2725 = vmatpush3.bf16.msra.mxu0 %v3207_v25  ;;  %2965 = vmatpush3.bf16.msra.mxu1 %v3206_v23  ;;  %v3213_v23 = vld [vmem:[%s4718_s3] sm:$0xff]   ;;  %v3215_v25 = vld [vmem:[%s4718_s3 + $0x48] sm:$0xff]   ;;  %v3701_v42 = vadd.f32 %v3514_v35, %v396_v52  ;;  %v373_v10 = vunpack.c.l.bf16 %v3715_v0  ;;  %vm470_vm12 = vcmp.ge.s32.totalorder %v3666_v47, 0  ;;  %v3900_v47 = vld [vmem:[%s3477_s14 + $0x3c] sm:$0xf]  ;;  %vm474_vm9 = vcmp.lt.s32.totalorder %v3449_v16, 16 }
  0x2c   : > { %2726 = vmatprep.subr.bf16.mxu0 %v3208_v30  ;;  %2966 = vmatprep.subr.bf16.mxu1 %v3209_v31  ;;  %v369_v30 = vunpack.c.l.bf16 %v3605_v9  ;;  %v3704_v62 = vadd.f32 %v3514_v35, %v397_v53  ;;  %4776 = vst [vmem:[#allocation12_spill] sm:$0xff] %v3900_v47 }
  0x2d   : > { %2968 = vmatprep.mubr.msk.bf16.mxu1 %vm3591_vm1, %v3621_v18  ;;  %v442_v13 = vmax.f32 %v3701_v42, 0.0 }
  0x2e   : > { %v395_v45 = vmul.f32 %v3496_v29, %v369_v30 }
  0x2f   : > { %2727 = vmatpush3.bf16.msra.mxu0 %v3210_v38  ;;  %2967 = vmatpush3.bf16.msra.mxu1 %v3209_v31  ;;  %v539_v31 = vrot.slane %v518_v5, 7  ;;  %v635_v38 = vsel %vm624_vm3, %v618_v22, %v610_v21  ;;  %v440_v5 = vmax.f32 %v420_v54, 0.0  ;;  %v443_v21 = vmax.f32 %v3704_v62, 0.0  ;;  %v3219_v22 = vld [vmem:[%s4718_s3 + $0x10] sm:$0xff]  }
  0x30   : > { %2792 = vmatprep.subr.bf16.mxu1 %v3211_v48  ;;  %2872 = vmatprep.subr.bf16.mxu0 %v3212_v49  ;;  %v3655_v41 = vpack.c.bf16 %v635_v38, %v627_v37  ;;  %v3216_v48 = vld [vmem:[%s4718_s3 + $0x8] sm:$0xff]   ;;  %v421_v56 = vadd.f32 %v3514_v35, %v395_v45  ;;  %v3762_v39 = vsel %vm3710_vm10, %v442_v13, 0.0 }
  0x31   : > { %v556_v49 = vsel %vm553_vm8, %v539_v31, %v547_v32  ;;  %v564_v51 = vsel %vm553_vm8, %v547_v32, %v539_v31  ;;  %v520_v30 = vsel %vm3686_vm4, %v440_v5, 0.0  ;;  %v3766_v40 = vsel %vm3710_vm10, %v443_v21, 0.0 }
  0x32   : > { %2364 = vmatmul.mubr.msk.bf16.vlgmr.msra.gmra.mrb[0].mxu0 %vm3576_vm0, %v3623_v20  ;;  %2969 = vmatmul.mubr.msk.bf16.vlgmr.msra.gmra.mrb[0].mxu1 %vm3591_vm1, %v3655_v41  ;;  %v3698_v61 = vpack.c.bf16 %v556_v49, %v564_v51  ;;  %v441_v6 = vmax.f32 %v421_v56, 0.0  ;;  %v611_v37 = vrot.slane %v520_v30, 1  ;;  %v612_v43 = vrot.slane %v3762_v39, 1  ;;  %v3226_v51 = vld [vmem:[%s4718_s3 + $0x190] sm:$0xff]  }
  0x33   : > { %2873 = vmatpush3.bf16.msra.mxu0 %v3214_v3  ;;  %2367 = vmatprep.mubr.msk.bf16.mxu0 %vm3631_vm2, %v3599_v7  ;;  %v3719_v3 = vld [vmem:[%s3477_s14 + $0x28] sm:$0xf]  ;;  %v620_v45 = vrot.slane %v3766_v40, 1  ;;  %v540_v56 = vrot.slane %v520_v30, 7 }
  0x34   : > { %2874 = vmatprep.subr.bf16.mxu0 %v3218_v33  ;;  %2793 = vmatpush3.bf16.msra.mxu1 %v3213_v23  ;;  %4762 = vst [vmem:[#allocation7_spill] sm:$0xff] %v3719_v3  ;;  %v374_v12 = vunpack.c.l.bf16 %v3719_v3  ;;  %v398_v23 = vmul.f32 %v3496_v29, %v372_v1  ;;  %v521_v31 = vsel %vm3686_vm4, %v441_v6, 0.0  ;;  %v3754_v32 = vpack.c.bf16 %v441_v6, %v440_v5  ;;  %v3222_v5 = vld [vmem:[%s4718_s3 + $0x18] sm:$0xff]   ;;  %vm3885_vm4 = vmand %vm470_vm12, %vm480_vm13 }
  0x35   : > { %2794 = vmatprep.subr.bf16.mxu1 %v3215_v25  ;;  %v375_v25 = vunpack.c.l.bf16 %v3735_v11  ;;  %v399_v33 = vmul.f32 %v3496_v29, %v373_v10  ;;  %v619_v38 = vrot.slane %v521_v31, 1  ;;  %v548_v57 = vrot.slane %v521_v31, 7 }
  0x36   : > { %v629_v42 = vsel %vm624_vm3, %v612_v43, %v620_v45  ;;  %v637_v62 = vsel %vm624_vm3, %v620_v45, %v612_v43  ;;  %v400_v30 = vmul.f32 %v3496_v29, %v374_v12  ;;  %v3257_v45 = vld [vmem:[%s4718_s3 + $0x230] sm:$0xff]  }
  0x37   : > { %2875 = vmatpush3.bf16.msra.mxu0 %v3220_v46  ;;  %v3221_v46 = vld [vmem:[%s4718_s3 + $0x58] sm:$0xff]   ;;  %v3780_v49 = vadd.f32 %v3514_v35, %v399_v33  ;;  %v628_v52 = vsel %vm624_vm3, %v611_v37, %v619_v38  ;;  %v636_v53 = vsel %vm624_vm3, %v619_v38, %v611_v37  ;;  %v3805_v55 = vpack.c.bf16 %v637_v62, %v629_v42  ;;  %v3223_v33 = vld [vmem:[%s4718_s3 + $0x60] sm:$0xff]   ;;  %v3832_v37 = vld [vmem:[%s3477_s14 + $0x30] sm:$0xf] }
  0x38   : > { %2795 = vmatpush3.bf16.msra.mxu1 %v3216_v48  ;;  %v3777_v48 = vadd.f32 %v3514_v35, %v398_v23  ;;  %2876 = vmatprep.subr.bf16.mxu0 %v3224_v26  ;;  %v557_v10 = vsel %vm553_vm8, %v540_v56, %v548_v57  ;;  %v565_v23 = vsel %vm553_vm8, %v548_v57, %v540_v56  ;;  %v3835_v38 = vld [vmem:[%s3477_s14 + $0x34] sm:$0xf]  ;;  %v3227_v57 = vld [vmem:[%s4718_s3 + $0x68] sm:$0xff]   ;;  %v461_v62 = vadd.s32 7, %v3449_v16 }
  0x39   : > { %2796 = vmatprep.subr.bf16.mxu1 %v3217_v58  ;;  %v3797_v58 = vpack.c.bf16 %v636_v53, %v628_v52  ;;  %v4724_v6 = vmax.f32 %v3780_v49, 0.0  ;;  %v3824_v26 = vpack.c.bf16 %v557_v10, %v565_v23  ;;  %v401_v31 = vmul.f32 %v3496_v29, %v375_v25  ;;  %4768 = vst [vmem:[#allocation9_spill] sm:$0xff] %v3832_v37  ;;  %v3225_v25 = vld [vmem:[%s4718_s3 + $0x20] sm:$0xff]   ;;  %v3897_v23 = vld [vmem:[%s3477_s14 + $0x38] sm:$0xf] }
  0x3a   : > { %2370 = vmatmul.mubr.msk.bf16.gmra.mrb[4].mxu0 %vm3576_vm0, %v3698_v61  ;;  %v4727_v1 = vmax.f32 %v3777_v48, 0.0  ;;  %4769 = vst [vmem:[#allocation10_spill] sm:$0xff] %v3835_v38  ;;  %v3869_v63 = vadd.f32 %v3514_v35, %v400_v30  ;;  %v549_v10 = vrot.slane %v3766_v40, 7  ;;  %4775 = vst [vmem:[#allocation11_spill] sm:$0xff] %v3897_v23  ;;  %vm471_vm5 = vcmp.ge.s32.totalorder %v461_v62, 0 }
  0x3b   : > { %2373 = vmatprep.mubr.msk.bf16.mxu0 %vm3729_vm11, %v3754_v32  ;;  %2877 = vmatpush3.bf16.msra.mxu0 %v3226_v51  ;;  %v3844_v43 = vsel %vm3793_vm14, %v4724_v6, 0.0  ;;  %v376_v51 = vunpack.c.l.bf16 %v3832_v37  ;;  %v3872_v53 = vadd.f32 %v3514_v35, %v401_v31  ;;  %vm481_vm6 = vcmp.lt.s32.totalorder %v461_v62, 16  ;;  %v2705_v62 = vld [vmem:[%s333_s20] sm:$0xff]  }
  0x3c   : > { %2797 = vmatpush3.bf16.msra.mxu1 %v3219_v22  ;;  %2972 = vmatprep.mubr.msk.bf16.mxu1 %vm3591_vm1, %v3797_v58  ;;  %v3822_v22 = vsel %vm3793_vm14, %v4727_v1, 0.0  ;;  %v621_v52 = vrot.slane %v3844_v43, 1  ;;  %vm3950_vm10 = vmand %vm471_vm5, %vm481_vm6  ;;  %v3229_v1 = vld [vmem:[%s4718_s3 + $0x70] sm:$0xff]   ;;  %vm464_vm6 = vcmp.ge.s32.totalorder %v3449_v16, 0 }
  0x3d   : > { %2798 = vmatprep.subr.bf16.mxu1 %v3221_v46  ;;  %2973 = vmatmul.mubr.msk.bf16.gmra.mrb[4].mxu1 %vm3591_vm1, %v3805_v55  ;;  %v613_v12 = vrot.slane %v3822_v22, 1  ;;  %v3857_v46 = vpack.c.bf16 %v443_v21, %v442_v13  ;;  %v377_v13 = vunpack.c.l.bf16 %v3835_v38  ;;  %v3230_v21 = vld [vmem:[%s4718_s3 + $0x1d8] sm:$0xff]   ;;  %v402_v42 = vmul.f32 %v3496_v29, %v376_v51  ;;  %vm3995_vm5 = vmpackc.low %vm3793_vm14, %vm3793_vm14 }
  0x3e   : > { %v4726_v51 = vmax.f32 %v3869_v63, 0.0  ;;  %v4725_v14 = vmax.f32 %v3872_v53, 0.0  ;;  %2878 = vmatprep.subr.bf16.mxu0 %v3230_v21  ;;  %v462_v38 = vadd.s32 8, %v3449_v16  ;;  %v542_v15 = vrot.slane %v3822_v22, 7 }
  0x3f   : > { %v630_v30 = vsel %vm624_vm3, %v613_v12, %v621_v52  ;;  %v638_v31 = vsel %vm624_vm3, %v621_v52, %v613_v12  ;;  %v403_v40 = vmul.f32 %v3496_v29, %v377_v13  ;;  %v3915_v6 = vadd.f32 %v3514_v35, %v402_v42  ;;  %v3232_v12 = vld [vmem:[%s4718_s3 + $0x198] sm:$0xff]   ;;  %v3228_v13 = vld [vmem:[%s4718_s3 + $0x28] sm:$0xff]  }
  0x40   : > { %2799 = vmatpush3.bf16.msra.mxu1 %v3222_v5  ;;  %v541_v5 = vrot.slane %v3762_v39, 7  ;;  %v3911_v39 = vpack.c.bf16 %v638_v31, %v630_v30  ;;  %v3933_v52 = vsel %vm3885_vm4, %v4725_v14, 0.0  ;;  %2879 = vmatpush3.bf16.msra.mxu0 %v3232_v12  ;;  %vm472_vm12 = vcmp.ge.s32.totalorder %v462_v38, 0 }
  0x41   : > { %2800 = vmatprep.subr.bf16.mxu1 %v3223_v33  ;;  %v3927_v33 = vsel %vm3885_vm4, %v4726_v51, 0.0  ;;  %v622_v30 = vrot.slane %v3933_v52, 1  ;;  %v3946_v31 = vadd.f32 %v3514_v35, %v403_v40  ;;  %v379_v40 = vunpack.c.l.bf16 %v3900_v47 }
  0x42   : > { %2376 = vmatmul.mubr.msk.bf16.gmra.mrb[8].mxu0 %vm3576_vm0, %v3824_v26  ;;  %v558_v21 = vsel %vm553_vm8, %v541_v5, %v549_v10  ;;  %2976 = vmatprep.mubr.msk.bf16.mxu1 %vm3591_vm1, %v3911_v39  ;;  %v614_v42 = vrot.slane %v3927_v33, 1  ;;  %v566_v37 = vsel %vm553_vm8, %v549_v10, %v541_v5  ;;  %v3231_v10 = vld [vmem:[%s4718_s3 + $0x30] sm:$0xff]   ;;  %vm482_vm13 = vcmp.lt.s32.totalorder %v462_v38, 16 }
  0x43   : > { %2379 = vmatprep.mubr.msk.bf16.mxu0 %vm3853_vm15, %v3857_v46  ;;  %v4734_v11 = vmax.f32 %v3946_v31, 0.0  ;;  %v3979_v47 = vpack.c.bf16 %v558_v21, %v566_v37  ;;  %v3236_v37 = vld [vmem:[%s4718_s3 + $0x1e0] sm:$0xff]   ;;  %v4782_v38 = vmax.f32 %v3777_v48, 0.0  ;;  %v4783_v21 = vmax.f32 %v3780_v49, 0.0  ;;  %vm4025_vm14 = vmand %vm472_vm12, %vm482_vm13  ;;  %v3234_v48 = vld [vmem:[%s4718_s3 + $0x38] sm:$0xff]  }
  0x44   : > { %2801 = vmatpush3.bf16.msra.mxu1 %v3225_v25  ;;  %v378_v25 = vunpack.c.l.bf16 %v3897_v23  ;;  %v631_v14 = vsel %vm624_vm3, %v614_v42, %v622_v30  ;;  %v639_v3 = vsel %vm624_vm3, %v622_v30, %v614_v42  ;;  %v3233_v30 = vld [vmem:[%s4718_s3 + $0x78] sm:$0xff]   ;;  %2880 = vmatprep.subr.bf16.mxu0 %v3236_v37  ;;  %v3237_v49 = vld [vmem:[%s4718_s3 + $0x1a0] sm:$0xff]   ;;  %vm4091_vm12 = vmand %vm464_vm6, %vm474_vm9  ;;  %v4792_v8 = vmax.f32 %v3915_v6, 0.0 }
  0x45   : > { %2802 = vmatprep.subr.bf16.mxu1 %v3227_v57  ;;  %v4779_v57 = vmax.f32 %v3915_v6, 0.0  ;;  %v3976_v12 = vpack.c.bf16 %v639_v3, %v631_v14  ;;  %v405_v14 = vmul.f32 %v3496_v29, %v379_v40  ;;  %v2706_v40 = vunpack.c.l.bf16 %v2705_v62  ;;  %2881 = vmatpush3.bf16.msra.mxu0 %v3237_v49  ;;  %vm4112_vm9 = vmpackc.low %vm3885_vm4, %vm3885_vm4 }
  0x46   : > { %v404_v42 = vmul.f32 %v3496_v29, %v378_v25  ;;  %v4016_v25 = vpack.c.bf16 %v4783_v21, %v4782_v38  ;;  %v4787_v49 = vmax.f32 %v3872_v53, 0.0  ;;  %v543_v53 = vrot.slane %v3927_v33, 7  ;;  %vm2455_vm4 = vmpackc.low %vm4091_vm12, %vm4091_vm12 }
  0x47   : > { %v3971_v5 = vsel %vm3950_vm10, %v4779_v57, 0.0  ;;  %v3989_v57 = vsel %vm3950_vm10, %v4734_v11, 0.0  ;;  %2977 = vmatmul.mubr.msk.bf16.gmra.mrb[8].mxu1 %vm3591_vm1, %v3976_v12  ;;  %v4023_v11 = vadd.f32 %v3514_v35, %v405_v14  ;;  %vm4181_vm13 = vmpackc.low %vm3950_vm10, %vm3950_vm10  ;;  %vm473_vm6 = vcmp.ge.s32.totalorder %v463_v50, 0 }
  0x48   : > { %v615_v23 = vrot.slane %v3971_v5, 1  ;;  %2803 = vmatpush3.bf16.msra.mxu1 %v3228_v13  ;;  %v623_v13 = vrot.slane %v3989_v57, 1  ;;  %v4010_v54 = vadd.f32 %v3514_v35, %v404_v42  ;;  %v2707_v42 = vunpack.c.h.bf16 %v2705_v62  ;;  %vm4796_vm10 = vmpackc.low %vm3544_vm7, %vm3544_vm7 }
  0x49   : > { %2804 = vmatprep.subr.bf16.mxu1 %v3229_v1  ;;  %v388_v62 = vmul.f32 %v2706_v40, %v3496_v29  ;;  %v4739_v21 = vmax.f32 %v4023_v11, 0.0  ;;  %v550_v40 = vrot.slane %v3844_v43, 7  ;;  %vm2401_vm7 = vmpackc.low %vm4025_vm14, %vm4025_vm14 }
  0x4a   : > { %2382 = vmatmul.mubr.msk.bf16.gmra.mrb[12].mxu0 %vm3576_vm0, %v3979_v47  ;;  %v632_v14 = vsel %vm624_vm3, %v615_v23, %v623_v13  ;;  %v640_v1 = vsel %vm624_vm3, %v623_v13, %v615_v23  ;;  %v4740_v38 = vmax.f32 %v4010_v54, 0.0  ;;  %v389_v0 = vmul.f32 %v2707_v42, %v3496_v29  ;;  %v4054_v23 = vld [vmem:[%s4718_s3 + $0x80] sm:$0xff]   ;;  %v3239_v13 = vld [vmem:[%s4718_s3 + $0x1e8] sm:$0xff]  }
  0x4b   : > { %2385 = vmatprep.mubr.msk.bf16.mxu0 %vm3995_vm5, %v4016_v25  ;;  %v4046_v37 = vpack.c.bf16 %v640_v1, %v632_v14  ;;  %v414_v22 = vadd.f32 %v3514_v35, %v388_v62  ;;  %v4786_v42 = vmax.f32 %v3869_v63, 0.0  ;;  %v4083_v1 = vsel %vm4025_vm14, %v4739_v21, 0.0  ;;  %2882 = vmatprep.subr.bf16.mxu0 %v3239_v13  ;;  %v3240_v62 = vld [vmem:[%s4718_s3 + $0x1a8] sm:$0xff]  }
  0x4c   : > { %2805 = vmatpush3.bf16.msra.mxu1 %v3231_v10  ;;  %v4066_v10 = vsel %vm4025_vm14, %v4740_v38, 0.0  ;;  %v415_v43 = vadd.f32 %v3514_v35, %v389_v0  ;;  %v559_v0 = vsel %vm553_vm8, %v542_v15, %v550_v40  ;;  %v567_v21 = vsel %vm553_vm8, %v550_v40, %v542_v15  ;;  %v3242_v38 = vld [vmem:[%s4718_s3 + $0x1f0] sm:$0xff]   ;;  %2883 = vmatpush3.bf16.msra.mxu0 %v3240_v62  ;;  %v3245_v62 = vld [vmem:[%s4718_s3 + $0x1f8] sm:$0xff]  }
  0x4d   : > { %2806 = vmatprep.subr.bf16.mxu1 %v3233_v30  ;;  %v4074_v14 = vpack.c.bf16 %v4787_v49, %v4786_v42  ;;  %2980 = vmatprep.mubr.msk.bf16.mxu1 %vm3591_vm1, %v4046_v37  ;;  %v727_v30 = vrot.slane %v4066_v10, 1  ;;  %v728_v42 = vrot.slane %v4083_v1, 1  ;;  %v434_v49 = vmax.f32 %v414_v22, 0.0 }
  0x4e   : > { %v435_v33 = vmax.f32 %v415_v43, 0.0  ;;  %v4107_v13 = vpack.c.bf16 %v559_v0, %v567_v21  ;;  %v551_v22 = vrot.slane %v3933_v52, 7  ;;  %2884 = vmatprep.subr.bf16.mxu0 %v3242_v38  ;;  %v3243_v38 = vld [vmem:[%s4718_s3 + $0x1b0] sm:$0xff]  }
  0x4f   : > { %v729_v15 = vsel %vm624_vm3, %v727_v30, %v728_v42  ;;  %v730_v40 = vsel %vm624_vm3, %v728_v42, %v727_v30 }
  0x50   : > { %2807 = vmatpush3.bf16.msra.mxu1 %v3234_v48  ;;  %v4123_v48 = vsel %vm4091_vm12, %v434_v49, 0.0  ;;  %v4126_v56 = vpack.c.bf16 %v730_v40, %v729_v15  ;;  %v4130_v21 = vsel %vm4091_vm12, %v435_v33, 0.0  ;;  %v2456_v43 = vpack.c.bf16 %v435_v33, %v434_v49  ;;  %2885 = vmatpush3.bf16.msra.mxu0 %v3243_v38  ;;  %v3246_v33 = vld [vmem:[%s4718_s3 + $0x1b8] sm:$0xff]  }
  0x51   : > { %2984 = vmatprep.subr.bf16.mxu1 %v4054_v23  ;;  %v537_v52 = vrot.slane %v4123_v48, 7  ;;  %v545_v30 = vrot.slane %v4130_v21, 7  ;;  %v560_v63 = vsel %vm553_vm8, %v543_v53, %v551_v22  ;;  %v568_v42 = vsel %vm553_vm8, %v551_v22, %v543_v53  ;;  %2886 = vmatprep.subr.bf16.mxu0 %v3245_v62 }
  0x52   : > { %2388 = vmatmul.mubr.msk.bf16.gmra.mrb[16].mxu0 %vm3576_vm0, %v4107_v13  ;;  %2981 = vmatmul.mubr.msk.bf16.gmra.mrb[12].mxu1 %vm3591_vm1, %v4126_v56  ;;  %v4163_v15 = vpack.c.bf16 %v560_v63, %v568_v42  ;;  %v544_v40 = vrot.slane %v3971_v5, 7  ;;  %v4793_v53 = vmax.f32 %v3946_v31, 0.0  ;;  %v552_v38 = vrot.slane %v3989_v57, 7  ;;  %v3241_v5 = vld [vmem:[%s4718_s3 + $0x90] sm:$0xff]  }
  0x53   : > { %2391 = vmatprep.mubr.msk.bf16.mxu0 %vm4112_vm9, %v4074_v14  ;;  %v554_v49 = vsel %vm553_vm8, %v537_v52, %v545_v30  ;;  %v562_v0 = vsel %vm553_vm8, %v545_v30, %v537_v52  ;;  %2457 = vmatprep.mubr.msk.bf16.mxu1 %vm2455_vm4, %v2456_v43  ;;  %v4176_v52 = vld [vmem:[%s4718_s3 + $0x200] sm:$0xff]   ;;  %v4797_v57 = vmax.f32 %v4010_v54, 0.0  ;;  %v4798_v63 = vmax.f32 %v4023_v11, 0.0  ;;  %v3244_v11 = vld [vmem:[%s4718_s3 + $0x98] sm:$0xff]  }
  0x54   : > { %v4170_v22 = vpack.c.bf16 %v4793_v53, %v4792_v8  ;;  %v2459_v30 = vpack.c.bf16 %v554_v49, %v562_v0  ;;  %2887 = vmatpush3.bf16.msra.mxu0 %v3246_v33  ;;  %v3238_v8 = vld [vmem:[%s4718_s3 + $0x88] sm:$0xff]   ;;  %v561_v6 = vsel %vm553_vm8, %v544_v40, %v552_v38  ;;  %v569_v51 = vsel %vm553_vm8, %v552_v38, %v544_v40  ;;  %v3247_v40 = vld [vmem:[%s4718_s3 + $0xa0] sm:$0xff]  }
  0x55   : > { %3016 = vmatprep.subr.bf16.mxu0 %v4176_v52  ;;  %v4208_v31 = vpack.c.bf16 %v561_v6, %v569_v51  ;;  %v4217_v62 = vpack.c.bf16 %v4798_v63, %v4797_v57  ;;  %v720_v42 = vrot.slane %v4083_v1, 7  ;;  %vm483_vm12 = vcmp.lt.s32.totalorder %v463_v50, 16  ;;  %v3251_v50 = vld [vmem:[%s4718_s3 + $0xb0] sm:$0xff]  }
  0x56   : > { %vm4257_vm4 = vmand %vm473_vm6, %vm483_vm12  ;;  %v616_v3 = vrot.slane %v4130_v21, 1 }
  0x5a   : > { %2394 = vmatmul.mubr.msk.bf16.gmra.mrb[20].mxu0 %vm3576_vm0, %v4163_v15  ;;  %2460 = vmatmul.mubr.msk.bf16.vlgmr.msra.gmra.mrb[16].mxu1 %vm3576_vm0, %v2459_v30 }
  0x5b   : > { %2397 = vmatprep.mubr.msk.bf16.mxu0 %vm4181_vm13, %v4170_v22  ;;  %2985 = vmatpush3.bf16.msra.mxu1 %v4054_v23  ;;  %v719_v23 = vrot.slane %v4066_v10, 7 }
  0x5c   : > { %2463 = vmatprep.mubr.msk.bf16.mxu1 %vm4796_vm10, %v3571_v60  ;;  %2986 = vmatprep.subr.bf16.mxu1 %v3238_v8  ;;  %v2709_v60 = vld [vmem:[%s4060_s16] sm:$0xff]  }
  0x5d   : > { %v2710_v54 = vunpack.c.l.bf16 %v2709_v60  ;;  %v2711_v10 = vunpack.c.h.bf16 %v2709_v60  ;;  %v721_v16 = vsel %vm553_vm8, %v719_v23, %v720_v42  ;;  %v722_v1 = vsel %vm553_vm8, %v720_v42, %v719_v23 }
  0x5e   : > { %v4250_v33 = vpack.c.bf16 %v721_v16, %v722_v1  ;;  %v3253_v16 = vld [vmem:[%s4718_s3 + $0xb8] sm:$0xff]  }
  0x5f   : > { %2987 = vmatpush3.bf16.msra.mxu1 %v3238_v8  ;;  %v406_v49 = vmul.f32 %v2710_v54, %v3496_v29  ;;  %v407_v0 = vmul.f32 %v2711_v10, %v3496_v29  ;;  %v3249_v8 = vld [vmem:[%s4718_s3 + $0xa8] sm:$0xff]  }
  0x60   : > { %2988 = vmatprep.subr.bf16.mxu1 %v3241_v5  ;;  %v3250_v10 = vld [vmem:[%s4718_s3 + $0x208] sm:$0xff]  }
  0x61   : > { %v433_v53 = vadd.f32 %v3514_v35, %v407_v0 }
  0x62   : > { %2400 = vmatmul.mubr.msk.bf16.gmra.mrb[24].mxu0 %vm3576_vm0, %v4208_v31  ;;  %2466 = vmatmul.mubr.msk.bf16.gmra.mrb[20].mxu1 %vm3576_vm0, %v3623_v20  ;;  %v432_v20 = vadd.f32 %v3514_v35, %v406_v49 }
  0x63   : > { %2403 = vmatprep.mubr.msk.bf16.mxu0 %vm2401_vm7, %v4217_v62  ;;  %2469 = vmatprep.mubr.msk.bf16.mxu1 %vm3631_vm2, %v3599_v7  ;;  %v453_v30 = vmax.f32 %v433_v53, 0.0 }
  0x64   : > { %2989 = vmatpush3.bf16.msra.mxu1 %v3241_v5  ;;  %v452_v38 = vmax.f32 %v432_v20, 0.0 }
  0x65   : > { %2990 = vmatprep.subr.bf16.mxu1 %v3244_v11  ;;  %v533_v35 = vsel %vm4257_vm4, %v453_v30, 0.0 }
  0x66   : > { %v532_v6 = vsel %vm4257_vm4, %v452_v38, 0.0  ;;  %v4271_v51 = vpack.c.bf16 %v453_v30, %v452_v38  ;;  %v1460_v57 = vrot.slane %v533_v35, 7  ;;  %v1468_v23 = vrot.slane %v533_v35, 1 }
  0x67   : > { %v1459_v5 = vrot.slane %v532_v6, 7  ;;  %v1467_v63 = vrot.slane %v532_v6, 1 }
  0x68   : > { %2991 = vmatpush3.bf16.msra.mxu1 %v3244_v11 }
  0x69   : > { %2992 = vmatprep.subr.bf16.mxu1 %v3247_v40  ;;  %v4284_v42 = vsel %vm553_vm8, %v1459_v5, %v1460_v57  ;;  %v4292_v24 = vsel %vm624_vm3, %v1467_v63, %v1468_v23  ;;  %v4301_v11 = vsel %vm624_vm3, %v1468_v23, %v1467_v63 }
  0x6a   : > { %2406 = vmatmul.mubr.msk.bf16.gmra.mrb[28].mxu0 %vm3576_vm0, %v4250_v33  ;;  %2472 = vmatmul.mubr.msk.bf16.gmra.mrb[24].mxu1 %vm3576_vm0, %v3698_v61  ;;  %v2669_v54 = vpack.c.bf16 %v4301_v11, %v4292_v24 }
  0x6b   : > { %2601 = vmatprep.mubr.msk.bf16.mxu0 %vm3631_vm2, %v3599_v7  ;;  %2475 = vmatprep.mubr.msk.bf16.mxu1 %vm3729_vm11, %v3754_v32  ;;  %v4288_v7 = vsel %vm553_vm8, %v1460_v57, %v1459_v5 }
  0x6c   : > { %2993 = vmatpush3.bf16.msra.mxu1 %v3247_v40  ;;  %v2645_v60 = vpack.c.bf16 %v4284_v42, %v4288_v7 }
  0x6d   : > { %2994 = vmatprep.subr.bf16.mxu1 %v3249_v8 }
  0x70   : > { %2995 = vmatpush3.bf16.msra.mxu1 %v3249_v8 }
  0x71   : > { %2996 = vmatprep.subr.bf16.mxu1 %v3251_v50 }
  0x72   : > { %2604 = vmatmul.mubr.msk.bf16.vlgmr.msra.gmra.mrb[32].mxu0 %vm3576_vm0, %v3698_v61  ;;  %2478 = vmatmul.mubr.msk.bf16.gmra.mrb[28].mxu1 %vm3576_vm0, %v3824_v26  ;;  %v3252_v61 = vld [vmem:[%s4718_s3 + $0x210] sm:$0xff]  }
  0x73   : > { %3017 = vmatpush3.bf16.msra.mxu0 %v4176_v52  ;;  %2607 = vmatprep.mubr.msk.bf16.mxu0 %vm3729_vm11, %v3754_v32  ;;  %v3255_v32 = vld [vmem:[%s4718_s3 + $0x220] sm:$0xff]  }
  0x74   : > { %3018 = vmatprep.subr.bf16.mxu0 %v3250_v10  ;;  %2481 = vmatprep.mubr.msk.bf16.mxu1 %vm3853_vm15, %v3857_v46 }
  0x75   : > { %2997 = vmatpush3.bf16.msra.mxu1 %v3251_v50 }
  0x76   : > { %2998 = vmatprep.subr.bf16.mxu1 %v3253_v16 }
  0x77   : > { %3019 = vmatpush3.bf16.msra.mxu0 %v3250_v10 }
  0x78   : > { %3020 = vmatprep.subr.bf16.mxu0 %v3252_v61 }
  0x79   : > { %2999 = vmatpush3.bf16.msra.mxu1 %v3253_v16 }
  0x7a   : > { %2610 = vmatmul.mubr.msk.bf16.gmra.mrb[36].mxu0 %vm3576_vm0, %v3824_v26  ;;  %3048 = vmatprep.subr.bf16.mxu1 %v4176_v52  ;;  %v3256_v26 = vld [vmem:[%s4718_s3 + $0x228] sm:$0xff]  }
  0x7b   : > { %2613 = vmatprep.mubr.msk.bf16.mxu0 %vm3853_vm15, %v3857_v46  ;;  %3021 = vmatpush3.bf16.msra.mxu0 %v3252_v61  ;;  %v3258_v46 = vld [vmem:[%s4718_s3 + $0x238] sm:$0xff]  }
  0x7c   : > { %2484 = vmatmul.mubr.msk.bf16.gmra.mrb[32].mxu1 %vm3576_vm0, %v3979_v47  ;;  %3022 = vmatprep.subr.bf16.mxu0 %v3254_v44 }
  0x7d   : > { %2487 = vmatprep.mubr.msk.bf16.mxu1 %vm3995_vm5, %v4016_v25 }
  0x7f   : > { %3023 = vmatpush3.bf16.msra.mxu0 %v3254_v44 }
  0x80   : > { %3024 = vmatprep.subr.bf16.mxu0 %v3255_v32 }
  0x82   : > { %2616 = vmatmul.mubr.msk.bf16.gmra.mrb[40].mxu0 %vm3576_vm0, %v3979_v47  ;;  %v608_v47 = vrot.slane %v4123_v48, 1 }
  0x83   : > { %2619 = vmatprep.mubr.msk.bf16.mxu0 %vm3995_vm5, %v4016_v25  ;;  %3025 = vmatpush3.bf16.msra.mxu0 %v3255_v32 }
  0x84   : > { %2490 = vmatmul.mubr.msk.bf16.gmra.mrb[36].mxu1 %vm3576_vm0, %v4107_v13  ;;  %3026 = vmatprep.subr.bf16.mxu0 %v3256_v26  ;;  %v625_v25 = vsel %vm624_vm3, %v608_v47, %v616_v3 }
  0x85   : > { %2493 = vmatprep.mubr.msk.bf16.mxu1 %vm4112_vm9, %v4074_v14 }
  0x87   : > { %3027 = vmatpush3.bf16.msra.mxu0 %v3256_v26 }
  0x88   : > { %3028 = vmatprep.subr.bf16.mxu0 %v3257_v45 }
  0x8a   : > { %2622 = vmatmul.mubr.msk.bf16.gmra.mrb[44].mxu0 %vm3576_vm0, %v4107_v13  ;;  %v633_v13 = vsel %vm624_vm3, %v616_v3, %v608_v47  ;;  %vm2641_vm3 = vmpackc.low %vm4257_vm4, %vm4257_vm4 }
  0x8b   : > { %2625 = vmatprep.mubr.msk.bf16.mxu0 %vm4112_vm9, %v4074_v14  ;;  %3029 = vmatpush3.bf16.msra.mxu0 %v3257_v45  ;;  %v2504_v48 = vpack.c.bf16 %v633_v13, %v625_v25 }
  0x8c   : > { %2496 = vmatmul.mubr.msk.bf16.gmra.mrb[40].mxu1 %vm3576_vm0, %v4163_v15  ;;  %3030 = vmatprep.subr.bf16.mxu0 %v3258_v46 }
  0x8d   : > { %2499 = vmatprep.mubr.msk.bf16.mxu1 %vm4181_vm13, %v4170_v22 }
  0x8f   : > { %3031 = vmatpush3.bf16.msra.mxu0 %v3258_v46 }
  0x92   : > { %2628 = vmatmul.mubr.msk.bf16.gmra.mrb[48].mxu0 %vm3576_vm0, %v4163_v15 }
  0x93   : > { %2631 = vmatprep.mubr.msk.bf16.mxu0 %vm4181_vm13, %v4170_v22 }
  0x94   : > { %2502 = vmatmul.mubr.msk.bf16.gmra.mrb[44].mxu1 %vm3576_vm0, %v4208_v31 }
  0x95   : > { %3000 = vmatprep.mubr.msk.bf16.mxu1 %vm3591_vm1, %v2504_v48 }
  0x9a   : > { %2634 = vmatmul.mubr.msk.bf16.gmra.mrb[52].mxu0 %vm3576_vm0, %v4208_v31 }
  0x9b   : > { %2637 = vmatprep.mubr.msk.bf16.mxu0 %vm2401_vm7, %v4217_v62 }
  0x9c   : > { %3001 = vmatmul.mubr.msk.bf16.vlgmr.msra.gmra.mrb[0].mxu1 %vm3591_vm1, %v3621_v18 }
  0x9d   : > { %3056 = vmatpush3.bf16.msra.mxu1 %v4176_v52  ;;  %3004 = vmatprep.mubr.msk.bf16.mxu1 %vm3591_vm1, %v3655_v41 }
  0x9e   : > { %3049 = vmatprep.subr.bf16.mxu1 %v3250_v10 }
  0xa1   : > { %3057 = vmatpush3.bf16.msra.mxu1 %v3250_v10 }
  0xa2   : > { %3050 = vmatprep.subr.bf16.mxu1 %v3252_v61  ;;  %2640 = vmatmul.mubr.msk.bf16.gmra.mrb[56].mxu0 %vm3576_vm0, %v4250_v33 }
  0xa3   : > { %2643 = vmatprep.mubr.msk.bf16.mxu0 %vm2641_vm3, %v4271_v51 }
  0xa4   : > { %3005 = vmatmul.mubr.msk.bf16.gmra.mrb[4].mxu1 %vm3591_vm1, %v3797_v58 }
  0xa5   : > { %3058 = vmatpush3.bf16.msra.mxu1 %v3252_v61  ;;  %3008 = vmatprep.mubr.msk.bf16.mxu1 %vm3591_vm1, %v3805_v55 }
  0xa6   : > { %3051 = vmatprep.subr.bf16.mxu1 %v3254_v44 }
  0xa9   : > { %3059 = vmatpush3.bf16.msra.mxu1 %v3254_v44 }
  0xaa   : > { %3052 = vmatprep.subr.bf16.mxu1 %v3255_v32  ;;  %2646 = vmatmul.mubr.msk.bf16.gmra.mrb[60].mxu0 %vm3576_vm0, %v2645_v60 }
  0xab   : > { %3032 = vmatprep.mubr.msk.bf16.mxu0 %vm3591_vm1, %v3655_v41 }
  0xac   : > { %3009 = vmatmul.mubr.msk.bf16.gmra.mrb[8].mxu1 %vm3591_vm1, %v3911_v39 }
  0xad   : > { %3060 = vmatpush3.bf16.msra.mxu1 %v3255_v32  ;;  %3012 = vmatprep.mubr.msk.bf16.mxu1 %vm3591_vm1, %v3976_v12 }
  0xae   : > { %3053 = vmatprep.subr.bf16.mxu1 %v3256_v26 }
  0xb1   : > { %3061 = vmatpush3.bf16.msra.mxu1 %v3256_v26 }
  0xb2   : > { %3054 = vmatprep.subr.bf16.mxu1 %v3257_v45  ;;  %3033 = vmatmul.mubr.msk.bf16.vlgmr.msra.gmra.mrb[64].mxu0 %vm3591_vm1, %v3797_v58 }
  0xb3   : > { %3036 = vmatprep.mubr.msk.bf16.mxu0 %vm3591_vm1, %v3805_v55 }
  0xb4   : > { %3013 = vmatmul.mubr.msk.bf16.gmra.mrb[12].mxu1 %vm3591_vm1, %v4046_v37 }
  0xb5   : > { %3062 = vmatpush3.bf16.msra.mxu1 %v3257_v45  ;;  %3040 = vmatprep.mubr.msk.bf16.mxu1 %vm3591_vm1, %v3976_v12 }
  0xb6   : > { %3055 = vmatprep.subr.bf16.mxu1 %v3258_v46 }
  0xb9   : > { %3063 = vmatpush3.bf16.msra.mxu1 %v3258_v46 }
  0xba   : > { %3037 = vmatmul.mubr.msk.bf16.gmra.mrb[68].mxu0 %vm3591_vm1, %v3911_v39 }
  0xbc   : > { %3041 = vmatmul.mubr.msk.bf16.vlgmr.msra.gmra.mrb[8].mxu1 %vm3591_vm1, %v4046_v37 }
  0xbd   : > { %3044 = vmatprep.mubr.msk.bf16.mxu1 %vm3591_vm1, %v4126_v56 }
  0xc4   : > { %3045 = vmatmul.mubr.msk.bf16.gmra.mrb[12].mxu1 %vm3591_vm1, %v2669_v54 }
 0x105   : > { %v2728_v2 = vpop.f32.mrb[0].mxu0 }
 0x106   : > { %v2729_v17 = vpop.f32.mrb[1].mxu0 }
 0x107   : > { %v2730_v18 = vadd.f32 %v2729_v17, %v2728_v2  ;;  %v2731_v41 = vpop.f32.mrb[2].mxu0 }
 0x108   : > { %v2732_v59 = vpop.f32.mrb[3].mxu0 }
 0x109   : > { %v2733_v58 = vadd.f32 %v2732_v59, %v2731_v41 }
 0x10d   : > { %v2734_v55 = vpop.f32.mrb[4].mxu0 }
 0x10e   : > { %v2735_v39 = vpop.f32.mrb[5].mxu0 }
 0x10f   : > { %v2736_v12 = vadd.f32 %v2735_v39, %v2734_v55  ;;  %v2737_v37 = vpop.f32.mrb[6].mxu0 }
 0x110   : > { %v2738_v14 = vpop.f32.mrb[7].mxu0 }
 0x111   : > { %v2739_v21 = vadd.f32 %v2738_v14, %v2737_v37 }
 0x115   : > { %v2740_v15 = vpop.f32.mrb[8].mxu0 }
 0x116   : > { %v2741_v56 = vpop.f32.mrb[9].mxu0 }
 0x117   : > { %v2742_v22 = vadd.f32 %v2741_v56, %v2740_v15  ;;  %v2743_v52 = vpop.f32.mrb[10].mxu0 }
 0x118   : > { %v2744_v43 = vpop.f32.mrb[11].mxu0 }
 0x119   : > { %v2745_v31 = vadd.f32 %v2744_v43, %v2743_v52 }
 0x11d   : > { %v2746_v4 = vpop.f32.mrb[12].mxu0 }
 0x11e   : > { %v2747_v62 = vpop.f32.mrb[13].mxu0 }
 0x11f   : > { %v4465_v1 = vadd.f32 %v2747_v62, %v2746_v4  ;;  %v2749_v49 = vpop.f32.mrb[14].mxu0 }
 0x120   : > { %v2750_v0 = vpop.f32.mrb[15].mxu0 }
 0x121   : > { %v4467_v33 = vadd.f32 %v2750_v0, %v2749_v49 }
 0x125   : > { %v2752_v40 = vpop.f32.mrb[16].mxu0 }
 0x126   : > { %v2753_v20 = vpop.f32.mrb[17].mxu0 }
 0x127   : > { %v4469_v53 = vadd.f32 %v2753_v20, %v2752_v40  ;;  %v2755_v29 = vpop.f32.mrb[18].mxu0 }
 0x128   : > { %v2756_v38 = vpop.f32.mrb[19].mxu0 }
 0x129   : > { %v4471_v30 = vadd.f32 %v2756_v38, %v2755_v29 }
 0x12d   : > { %v2758_v8 = vpop.f32.mrb[20].mxu0  ;;  %v2808_v35 = vpop.f32.mrb[16].mxu1 }
 0x12e   : > { %v2759_v6 = vpop.f32.mrb[21].mxu0  ;;  %v2809_v57 = vpop.f32.mrb[17].mxu1 }
 0x12f   : > { %v4473_v51 = vadd.f32 %v2759_v6, %v2758_v8  ;;  %v2761_v5 = vpop.f32.mrb[22].mxu0  ;;  %v2810_v23 = vadd.f32 %v2809_v57, %v2808_v35  ;;  %v2811_v42 = vpop.f32.mrb[18].mxu1 }
 0x130   : > { %v2762_v63 = vpop.f32.mrb[23].mxu0  ;;  %v2812_v24 = vpop.f32.mrb[19].mxu1 }
 0x131   : > { %v4475_v7 = vadd.f32 %v2762_v63, %v2761_v5  ;;  %v2813_v50 = vadd.f32 %v2812_v24, %v2811_v42  ;;  %v4477_v60 = vadd.f32 %v2810_v23, %v2730_v18 }
 0x133   : > { %v4479_v54 = vadd.f32 %v2813_v50, %v2733_v58 }
 0x135   : > { %v2764_v11 = vpop.f32.mrb[24].mxu0  ;;  %v2814_v16 = vpop.f32.mrb[20].mxu1 }
 0x136   : > { %v2765_v10 = vpop.f32.mrb[25].mxu0  ;;  %v2815_v32 = vpop.f32.mrb[21].mxu1 }
 0x137   : > { %v4481_v61 = vadd.f32 %v2765_v10, %v2764_v11  ;;  %v2767_v44 = vpop.f32.mrb[26].mxu0  ;;  %v2816_v45 = vadd.f32 %v2815_v32, %v2814_v16  ;;  %v2817_v46 = vpop.f32.mrb[22].mxu1 }
 0x138   : > { %v2768_v26 = vpop.f32.mrb[27].mxu0  ;;  %v2818_v3 = vpop.f32.mrb[23].mxu1 }
 0x139   : > { %v4483_v47 = vadd.f32 %v2768_v26, %v2767_v44  ;;  %v2819_v25 = vadd.f32 %v2818_v3, %v2817_v46  ;;  %v4485_v13 = vadd.f32 %v2816_v45, %v2736_v12 }
 0x13b   : > { %v4487_v2 = vadd.f32 %v2819_v25, %v2739_v21 }
 0x13d   : > { %v2770_v48 = vpop.f32.mrb[28].mxu0  ;;  %v2820_v18 = vpop.f32.mrb[24].mxu1 }
 0x13e   : > { %v2771_v17 = vpop.f32.mrb[29].mxu0  ;;  %v2821_v58 = vpop.f32.mrb[25].mxu1 }
 0x13f   : > { %v4489_v41 = vadd.f32 %v2771_v17, %v2770_v48  ;;  %v2773_v59 = vpop.f32.mrb[30].mxu0  ;;  %v2822_v39 = vadd.f32 %v2821_v58, %v2820_v18  ;;  %v2823_v37 = vpop.f32.mrb[26].mxu1 }
 0x140   : > { %v2774_v55 = vpop.f32.mrb[31].mxu0  ;;  %v2824_v15 = vpop.f32.mrb[27].mxu1 }
 0x141   : > { %v4491_v14 = vadd.f32 %v2774_v55, %v2773_v59  ;;  %v2825_v56 = vadd.f32 %v2824_v15, %v2823_v37  ;;  %v4493_v52 = vadd.f32 %v2822_v39, %v2742_v22 }
 0x143   : > { %v4495_v43 = vadd.f32 %v2825_v56, %v2745_v31 }
 0x145   : > { %v2888_v12 = vpop.f32.mrb[32].mxu0  ;;  %v2826_v4 = vpop.f32.mrb[28].mxu1 }
 0x146   : > { %v2889_v21 = vpop.f32.mrb[33].mxu0  ;;  %v2827_v0 = vpop.f32.mrb[29].mxu1 }
 0x147   : > { %v4497_v62 = vadd.f32 %v2889_v21, %v2888_v12  ;;  %v2891_v49 = vpop.f32.mrb[34].mxu0  ;;  %v2828_v20 = vadd.f32 %v2827_v0, %v2826_v4  ;;  %v2829_v29 = vpop.f32.mrb[30].mxu1 }
 0x148   : > { %v2892_v40 = vpop.f32.mrb[35].mxu0  ;;  %v2830_v8 = vpop.f32.mrb[31].mxu1 }
 0x149   : > { %v4499_v38 = vadd.f32 %v2892_v40, %v2891_v49  ;;  %v2831_v6 = vadd.f32 %v2830_v8, %v2829_v29  ;;  %v4502_v35 = vadd.f32 %v2828_v20, %v4465_v1 }
 0x14b   : > { %v4505_v31 = vadd.f32 %v2831_v6, %v4467_v33 }
 0x14d   : > { %v2894_v22 = vpop.f32.mrb[36].mxu0 }
 0x14e   : > { %v2895_v5 = vpop.f32.mrb[37].mxu0 }
 0x14f   : > { %v2832_v57 = vpop.f32.mrb[32].mxu1  ;;  %v4507_v63 = vadd.f32 %v2895_v5, %v2894_v22  ;;  %v2897_v23 = vpop.f32.mrb[38].mxu0 }
 0x150   : > { %v2833_v42 = vpop.f32.mrb[33].mxu1  ;;  %v2898_v24 = vpop.f32.mrb[39].mxu0 }
 0x151   : > { %v2834_v50 = vadd.f32 %v2833_v42, %v2832_v57  ;;  %v2835_v11 = vpop.f32.mrb[34].mxu1  ;;  %v4509_v10 = vadd.f32 %v2898_v24, %v2897_v23 }
 0x152   : > { %v2836_v16 = vpop.f32.mrb[35].mxu1 }
 0x153   : > { %v3099_v44 = vadd.f32 %v2834_v50, %v4469_v53  ;;  %v2837_v1 = vadd.f32 %v2836_v16, %v2835_v11 }
 0x155   : > { %v3105_v32 = vadd.f32 %v2837_v1, %v4471_v30  ;;  %v2900_v26 = vpop.f32.mrb[40].mxu0 }
 0x156   : > { %v2901_v33 = vpop.f32.mrb[41].mxu0 }
 0x157   : > { %v2838_v45 = vpop.f32.mrb[36].mxu1  ;;  %v4513_v46 = vadd.f32 %v2901_v33, %v2900_v26  ;;  %v2903_v3 = vpop.f32.mrb[42].mxu0 }
 0x158   : > { %v2839_v25 = vpop.f32.mrb[37].mxu1  ;;  %v2904_v48 = vpop.f32.mrb[43].mxu0 }
 0x159   : > { %v2840_v17 = vadd.f32 %v2839_v25, %v2838_v45  ;;  %v2841_v18 = vpop.f32.mrb[38].mxu1  ;;  %v4515_v59 = vadd.f32 %v2904_v48, %v2903_v3 }
 0x15a   : > { %v2842_v58 = vpop.f32.mrb[39].mxu1 }
 0x15b   : > { %v3096_v55 = vadd.f32 %v2840_v17, %v4473_v51  ;;  %v2843_v39 = vadd.f32 %v2842_v58, %v2841_v18 }
 0x15d   : > { %v3102_v53 = vadd.f32 %v2843_v39, %v4475_v7  ;;  %v2906_v37 = vpop.f32.mrb[44].mxu0 }
 0x15e   : > { %v2907_v30 = vpop.f32.mrb[45].mxu0 }
 0x15f   : > { %v2844_v15 = vpop.f32.mrb[40].mxu1  ;;  %v2908_v56 = vadd.f32 %v2907_v30, %v2906_v37  ;;  %v2909_v12 = vpop.f32.mrb[46].mxu0 }
 0x160   : > { %v2845_v21 = vpop.f32.mrb[41].mxu1  ;;  %v2910_v4 = vpop.f32.mrb[47].mxu0 }
 0x161   : > { %v2846_v49 = vadd.f32 %v2845_v21, %v2844_v15  ;;  %v2847_v0 = vpop.f32.mrb[42].mxu1  ;;  %v2911_v40 = vadd.f32 %v2910_v4, %v2909_v12 }
 0x162   : > { %v2848_v20 = vpop.f32.mrb[43].mxu1 }
 0x163   : > { %v3111_v29 = vadd.f32 %v2846_v49, %v4481_v61  ;;  %v2849_v8 = vadd.f32 %v2848_v20, %v2847_v0 }
 0x165   : > { %v3117_v6 = vadd.f32 %v2849_v8, %v4483_v47  ;;  %v2912_v51 = vpop.f32.mrb[48].mxu0 }
 0x166   : > { %v2913_v22 = vpop.f32.mrb[49].mxu0 }
 0x167   : > { %v2850_v5 = vpop.f32.mrb[44].mxu1  ;;  %v2914_v7 = vadd.f32 %v2913_v22, %v2912_v51  ;;  %v2915_v57 = vpop.f32.mrb[50].mxu0 }
 0x168   : > { %v2851_v23 = vpop.f32.mrb[45].mxu1  ;;  %v2916_v42 = vpop.f32.mrb[51].mxu0 }
 0x169   : > { %v2852_v24 = vadd.f32 %v2851_v23, %v2850_v5  ;;  %v2853_v50 = vpop.f32.mrb[46].mxu1  ;;  %v2917_v11 = vadd.f32 %v2916_v42, %v2915_v57  ;;  %v4521_v16 = vadd.f32 %v3099_v44, %v2914_v7 }
 0x16a   : > { %v2854_v1 = vpop.f32.mrb[47].mxu1 }
 0x16b   : > { %v3108_v26 = vadd.f32 %v2852_v24, %v4489_v41  ;;  %v2855_v33 = vadd.f32 %v2854_v1, %v2853_v50  ;;  %v4524_v61 = vadd.f32 %v3105_v32, %v2917_v11 }
 0x16d   : > { %v3114_v47 = vadd.f32 %v2855_v33, %v4491_v14  ;;  %v2918_v45 = vpop.f32.mrb[52].mxu0 }
 0x16e   : > { %v2919_v3 = vpop.f32.mrb[53].mxu0 }
 0x16f   : > { %v3002_v25 = vpop.f32.mrb[0].mxu1  ;;  %v2920_v48 = vadd.f32 %v2919_v3, %v2918_v45  ;;  %v2921_v17 = vpop.f32.mrb[54].mxu0 }
 0x170   : > { %v3065_v18 = vadd.f32 %v4485_v13, %v3002_v25  ;;  %v1396_v58 = vpop.f32.mrb[1].mxu1  ;;  %v2922_v39 = vpop.f32.mrb[55].mxu0 }
 0x171   : > { %v3069_v44 = vadd.f32 %v4477_v60, %v1396_v58  ;;  %v3003_v37 = vpop.f32.mrb[2].mxu1  ;;  %v2923_v30 = vadd.f32 %v2922_v39, %v2921_v17  ;;  %v3097_v15 = vadd.f32 %v3096_v55, %v2920_v48 }
 0x172   : > { %v3073_v41 = vadd.f32 %v4487_v2, %v3003_v37  ;;  %v1399_v32 = vpop.f32.mrb[3].mxu1  ;;  %v3066_v12 = vadd.f32 %v3065_v18, %v4507_v63 }
 0x173   : > { %v3077_v14 = vadd.f32 %v4479_v54, %v1399_v32  ;;  %v3070_v21 = vadd.f32 %v3069_v44, %v4497_v62  ;;  %v3103_v4 = vadd.f32 %v3102_v53, %v2923_v30 }
 0x174   : > { %v3074_v49 = vadd.f32 %v3073_v41, %v4509_v10 }
 0x175   : > { %v2924_v13 = vpop.f32.mrb[56].mxu0  ;;  %v3078_v0 = vadd.f32 %v3077_v14, %v4499_v38 }
 0x176   : > { %v2925_v20 = vpop.f32.mrb[57].mxu0 }
 0x177   : > { %v3006_v60 = vpop.f32.mrb[4].mxu1  ;;  %v2926_v8 = vadd.f32 %v2925_v20, %v2924_v13  ;;  %v2927_v51 = vpop.f32.mrb[58].mxu0 }
 0x178   : > { %v3081_v55 = vadd.f32 %v4502_v35, %v3006_v60  ;;  %v1412_v2 = vpop.f32.mrb[5].mxu1  ;;  %v2928_v22 = vpop.f32.mrb[59].mxu0 }
 0x179   : > { %v3085_v63 = vadd.f32 %v4493_v52, %v1412_v2  ;;  %v3007_v5 = vpop.f32.mrb[6].mxu1  ;;  %v2929_v54 = vadd.f32 %v2928_v22, %v2927_v51  ;;  %v3112_v7 = vadd.f32 %v3111_v29, %v2926_v8 }
 0x17a   : > { %v3089_v62 = vadd.f32 %v4505_v31, %v3007_v5  ;;  %v1415_v53 = vpop.f32.mrb[7].mxu1  ;;  %v3082_v10 = vadd.f32 %v3081_v55, %v2908_v56  ;;  %v2671_v31 = vld [vmem:[%s4719_s4] ss:$0 sm:$0xff] }
 0x17b   : > { %v3093_v57 = vadd.f32 %v4495_v43, %v1415_v53  ;;  %v3086_v38 = vadd.f32 %v3085_v63, %v4513_v46  ;;  %v3118_v23 = vadd.f32 %v3117_v6, %v2929_v54 }
 0x17c   : > { %v3090_v42 = vadd.f32 %v3089_v62, %v2911_v40 }
 0x17d   : > { %v2930_v24 = vpop.f32.mrb[60].mxu0  ;;  %v3094_v35 = vadd.f32 %v3093_v57, %v4515_v59 }
 0x17e   : > { %v2931_v50 = vpop.f32.mrb[61].mxu0 }
 0x17f   : > { %v2932_v11 = vadd.f32 %v2931_v50, %v2930_v24  ;;  %v2933_v1 = vpop.f32.mrb[62].mxu0  ;;  %v3300_v50 = vmov (!%p2672_p9), 0.0  }
 0x180   : > { %v2934_v52 = vpop.f32.mrb[63].mxu0  ;;  %1904 = vst [vmem:[%s3399_s21] sm:$0x1] (!%p2672_p9), %v3300_v50  ;;  %1905 = vst [vmem:[%s3416_s17] sm:$0x1] (!%p2672_p9), %v3300_v50 }
 0x181   : > { %v2935_v33 = vadd.f32 %v2934_v52, %v2933_v1  ;;  %v3109_v45 = vadd.f32 %v3108_v26, %v2932_v11 }
 0x183   : > { %v3115_v29 = vadd.f32 %v3114_v47, %v2935_v33 }
 0x185   : > { %v3034_v3 = vpop.f32.mrb[64].mxu0 }
 0x186   : > { %v3067_v43 = vadd.f32 %v3066_v12, %v3034_v3  ;;  %v1798_v56 = vpop.f32.mrb[65].mxu0 }
 0x187   : > { %v3071_v46 = vadd.f32 %v3070_v21, %v1798_v56  ;;  %v3035_v6 = vpop.f32.mrb[66].mxu0 }
 0x188   : > { %v4544_v40 = vadd.f32 %v3067_v43, %v2671_v31  ;;  %v3075_v25 = vadd.f32 %v3074_v49, %v3035_v6  ;;  %v1801_v59 = vpop.f32.mrb[67].mxu0 }
 0x189   : > { %v4546_v48 = vadd.f32 %v3071_v46, %v2671_v31  ;;  %v3079_v17 = vadd.f32 %v3078_v0, %v1801_v59 }
 0x18a   : > { %v4548_v18 = vadd.f32 %v3075_v25, %v2671_v31 }
 0x18b   : > { %v4550_v26 = vadd.f32 %v3079_v17, %v2671_v31 }
 0x18d   : > { %v3038_v47 = vpop.f32.mrb[68].mxu0 }
 0x18e   : > { %v3083_v58 = vadd.f32 %v3082_v10, %v3038_v47  ;;  %v1814_v39 = vpop.f32.mrb[69].mxu0 }
 0x18f   : > { %v3042_v44 = vpop.f32.mrb[8].mxu1  ;;  %v3087_v37 = vadd.f32 %v3086_v38, %v1814_v39  ;;  %v3039_v30 = vpop.f32.mrb[70].mxu0 }
 0x190   : > { %v3098_v41 = vadd.f32 %v3097_v15, %v3042_v44  ;;  %v1830_v32 = vpop.f32.mrb[9].mxu1  ;;  %v4552_v12 = vadd.f32 %v3083_v58, %v2671_v31  ;;  %v3091_v14 = vadd.f32 %v3090_v42, %v3039_v30  ;;  %v1817_v21 = vpop.f32.mrb[71].mxu0 }
 0x191   : > { %v3101_v49 = vadd.f32 %v4521_v16, %v1830_v32  ;;  %v3043_v13 = vpop.f32.mrb[10].mxu1  ;;  %v4555_v0 = vadd.f32 %v3087_v37, %v2671_v31  ;;  %v3095_v20 = vadd.f32 %v3094_v35, %v1817_v21 }
 0x192   : > { %v4557_v60 = vadd.f32 %v3098_v41, %v2671_v31  ;;  %v3104_v8 = vadd.f32 %v3103_v4, %v3043_v13  ;;  %v1833_v51 = vpop.f32.mrb[11].mxu1  ;;  %v4559_v55 = vadd.f32 %v3091_v14, %v2671_v31 }
 0x193   : > { %v4561_v2 = vadd.f32 %v3101_v49, %v2671_v31  ;;  %v3107_v15 = vadd.f32 %v4524_v61, %v1833_v51  ;;  %v4564_v22 = vadd.f32 %v3095_v20, %v2671_v31 }
 0x194   : > { %v4566_v63 = vadd.f32 %v3104_v8, %v2671_v31 }
 0x195   : > { %v4568_v5 = vadd.f32 %v3107_v15, %v2671_v31 }
 0x197   : > { %v3046_v16 = vpop.f32.mrb[12].mxu1  ;;  %1903 = sbr.rel (%p2672_p9) target bundleno = 414 (0x19e), region = 44 }
 0x198   : > { %v3110_v54 = vadd.f32 %v3109_v45, %v3046_v16  ;;  %v1846_v62 = vpop.f32.mrb[13].mxu1 }
 0x199   : > { %v3113_v53 = vadd.f32 %v3112_v7, %v1846_v62  ;;  %v3047_v10 = vpop.f32.mrb[14].mxu1 }
 0x19a   : > { %v4570_v57 = vadd.f32 %v3110_v54, %v2671_v31  ;;  %v3116_v4 = vadd.f32 %v3115_v29, %v3047_v10  ;;  %v1849_v38 = vpop.f32.mrb[15].mxu1 }
 0x19b   : > { %v4572_v42 = vadd.f32 %v3113_v53, %v2671_v31  ;;  %v3119_v24 = vadd.f32 %v3118_v23, %v1849_v38 }
 0x19c   : > { %v4574_v35 = vadd.f32 %v3116_v4, %v2671_v31 }
 0x19d   : > { %v4576_v61 = vadd.f32 %v3119_v24, %v2671_v31 }
 0x19e PF: > { %v1907_v7 = vadd.f32 %v4550_v26, %v4546_v48  ;;  %v1931_v11 = vmul.f32 %v4546_v48, %v4546_v48  ;;  %v1932_v23 = vmul.f32 %v4550_v26, %v4550_v26  ;;  %v1933_v52 = vmul.f32 %v4544_v40, %v4544_v40  ;;  %v4803_v8 = vld [vmem:[#allocation4_spill] sm:$0xff]  ;;  %v4808_v54 = vld [vmem:[#allocation7_spill] sm:$0xff]  ;;  %v4809_v10 = vld [vmem:[#allocation10_spill] sm:$0xff] }
 0x19f   : > { %v1934_v33 = vmul.f32 %v4548_v18, %v4548_v18  ;;  %v1935_v45 = vmul.f32 %v4555_v0, %v4555_v0  ;;  %v1936_v29 = vmul.f32 %v4564_v22, %v4564_v22  ;;  %v1937_v31 = vmul.f32 %v4552_v12, %v4552_v12  ;;  %v4810_v4 = vld [vmem:[#allocation9_spill] sm:$0xff]  ;;  %v4811_v50 = vld [vmem:[#allocation12_spill] sm:$0xff] }
 0x1a0   : > { %v1908_v1 = vadd.f32 %v1907_v7, %v4544_v40  ;;  %v1938_v43 = vmul.f32 %v4559_v55, %v4559_v55  ;;  %v1947_v56 = vadd.f32 %v1932_v23, %v1931_v11  ;;  %v1939_v46 = vmul.f32 %v4561_v2, %v4561_v2  ;;  %v4812_v7 = vld [vmem:[#allocation11_spill] sm:$0xff] }
 0x1a1   : > { %v4605_v6 = vmul.f32 %v4568_v5, %v4568_v5  ;;  %v4609_v25 = vmul.f32 %v4557_v60, %v4557_v60  ;;  %v4801_v59 = vlaneseq  ;;  %v4615_v58 = vmul.f32 %v4566_v63, %v4566_v63 }
 0x1a2   : > { %v1909_v3 = vadd.f32 %v1908_v1, %v4548_v18  ;;  %v1948_v39 = vadd.f32 %v1947_v56, %v1933_v52  ;;  %v1975_v44 = vpack.c.bf16 %v4550_v26, %v4546_v48  ;;  %v1989_v37 = vsub.s32 0, %v3458_v19  ;;  %v4802_v26 = vld [vmem:[#allocation2_spill] sm:$0xff] }
 0x1a3   : > { %v1971_v17 = vand.u32 127, %v4801_v59  ;;  %v2673_v32 = vcombine.low %v3488_v27, %v3491_v28  ;;  %v1976_v14 = vpack.c.bf16 %v4548_v18, %v4544_v40  ;;  %v2674_v21 = vcombine.low %v3509_v34, %v3517_v36  ;;  %v4804_v40 = vld [vmem:[#allocation3_spill] sm:$0xff]  ;;  %v4805_v36 = vld [vmem:[#allocation6_spill] sm:$0xff] }
 0x1a4   : > { %v1910_v47 = vadd.f32 %v1909_v3, %v4555_v0  ;;  %v1949_v41 = vadd.f32 %v1948_v39, %v1934_v33  ;;  %v1977_v48 = vpack.c.bf16 %v4564_v22, %v4555_v0  ;;  %v2675_v19 = vcombine.low %v4802_v26, %v3605_v9  ;;  %v4806_v0 = vld [vmem:[#allocation5_spill] sm:$0xff] }
 0x1a5   : > { %vm1972_vm8 = vcmp.ge.s32.totalorder %v1971_v17, 4  ;;  %vm1973_vm0 = vcmp.lt.s32.totalorder %v1971_v17, 8  ;;  %v1978_v49 = vpack.c.bf16 %v4559_v55, %v4552_v12  ;;  %v3301_v27 = vmov 0  }
 0x1a6   : > { %v1911_v30 = vadd.f32 %v1910_v47, %v4564_v22  ;;  %vm1974_vm1 = vmand %vm1972_vm8, %vm1973_vm0  ;;  %v1950_v20 = vadd.f32 %v1949_v41, %v1935_v45  ;;  %v2676_v18 = vcombine.low %v4804_v40, %v4803_v8  ;;  %v1979_v34 = vpack.c.bf16 %v4568_v5, %v4561_v2 }
 0x1a7   : > { %vm1985_vm2 = vmpackc.low %vm1974_vm1, %vm1974_vm1  ;;  %v2677_v15 = vcombine.low %v4806_v0, %v4805_v36  ;;  %v1980_v9 = vpack.c.bf16 %v4566_v63, %v4557_v60  ;;  %v1981_v53 = vpack.c.bf16 %v4576_v61, %v4572_v42  ;;  %v2679_v38 = vcombine.low %v4810_v4, %v4809_v10 }
 0x1a8   : > { %v1912_v13 = vadd.f32 %v1911_v30, %v4552_v12  ;;  %v1986_v28 = vsel %vm1985_vm2, 65537, %v3301_v27  ;;  %v1951_v16 = vadd.f32 %v1950_v20, %v1936_v29  ;;  %v4807_v12 = vld [vmem:[#allocation8_spill] sm:$0xff]  ;;  %v1982_v24 = vpack.c.bf16 %v4574_v35, %v4570_v57 }
 0x1a9   : > { %v1990_v51 = vrot.slane %v1986_v28, %v1989_v37  ;;  %v2678_v62 = vcombine.low %v4808_v54, %v4807_v12  ;;  %v1944_v8 = vmul.f32 %v4576_v61, %v4576_v61 }
 0x1aa   : > { %v1913_v22 = vadd.f32 %v1912_v13, %v4559_v55  ;;  %v2680_v55 = vcombine.low %v4812_v7, %v4811_v50  ;;  %v1952_v23 = vadd.f32 %v1951_v16, %v1937_v31 }
 0x1ab   : > { %vm1991_vm11 = vcmp.ne.s16.totalorder %v1990_v51, 0  ;;  %v1945_v51 = vmul.f32 %v4570_v57, %v4570_v57 }
 0x1ac   : > { %v1914_v11 = vadd.f32 %v1913_v22, %v4561_v2  ;;  %v2040_v1 = vsel %vm1991_vm11, %v1975_v44, %v2673_v32  ;;  %v2041_v52 = vsel %vm1991_vm11, %v1976_v14, %v2674_v21  ;;  %v1953_v59 = vadd.f32 %v1952_v23, %v1938_v43 }
 0x1ad   : > { %v2681_v33 = vcombine.low %v2040_v1, %v2040_v1  ;;  %v2682_v45 = vcombine.high %v2040_v1, %v2040_v1  ;;  %v2683_v29 = vcombine.low %v2041_v52, %v2041_v52  ;;  %v2684_v3 = vcombine.high %v2041_v52, %v2041_v52 }
 0x1ae   : > { %v1915_v56 = vadd.f32 %v1914_v11, %v4568_v5  ;;  %v2042_v17 = vsel %vm1991_vm11, %v1977_v48, %v2675_v19  ;;  %v2043_v47 = vsel %vm1991_vm11, %v1978_v49, %v2676_v18  ;;  %v1954_v5 = vadd.f32 %v1953_v59, %v1939_v46 }
 0x1af   : > { %2104 = vst [vmem:[%s3433_s11] sm:$0xf] %v2681_v33  ;;  %2105 = vst [vmem:[%s3433_s11 + $0x4] sm:$0xf] %v2682_v45  ;;  %v2685_v2 = vcombine.low %v2042_v17, %v2042_v17  ;;  %v2686_v31 = vcombine.high %v2042_v17, %v2042_v17  ;;  %v2687_v39 = vcombine.low %v2043_v47, %v2043_v47 }
 0x1b0   : > { %2106 = vst [vmem:[%s3433_s11 + $0x8] sm:$0xf] %v2683_v29  ;;  %2107 = vst [vmem:[%s3433_s11 + $0xc] sm:$0xf] %v2684_v3  ;;  %v2688_v44 = vcombine.high %v2043_v47, %v2043_v47  ;;  %v1916_v37 = vadd.f32 %v1915_v56, %v4557_v60  ;;  %v2044_v43 = vsel %vm1991_vm11, %v1979_v34, %v2677_v15 }
 0x1b1   : > { %v2045_v30 = vsel %vm1991_vm11, %v1980_v9, %v2678_v62  ;;  %2108 = vst [vmem:[%s3433_s11 + $0x10] sm:$0xf] %v2685_v2  ;;  %2109 = vst [vmem:[%s3433_s11 + $0x14] sm:$0xf] %v2686_v31  ;;  %v2689_v41 = vcombine.low %v2044_v43, %v2044_v43  ;;  %v2690_v32 = vcombine.high %v2044_v43, %v2044_v43  ;;  %v1906_v62 = vld [vmem:[%s3399_s21] sm:$0x1] }
 0x1b2   : > { %2110 = vst [vmem:[%s3433_s11 + $0x18] sm:$0xf] %v2687_v39  ;;  %2111 = vst [vmem:[%s3433_s11 + $0x1c] sm:$0xf] %v2688_v44  ;;  %v2691_v14 = vcombine.low %v2045_v30, %v2045_v30  ;;  %v2692_v21 = vcombine.high %v2045_v30, %v2045_v30  ;;  %v1917_v60 = vadd.f32 %v1916_v37, %v4566_v63 }
 0x1b3   : > { %v1955_v46 = vadd.f32 %v1954_v5, %v4605_v6  ;;  %v2046_v48 = vsel %vm1991_vm11, %v1981_v53, %v2679_v38  ;;  %v2047_v26 = vsel %vm1991_vm11, %v1982_v24, %v2680_v55  ;;  %2112 = vst [vmem:[%s3433_s11 + $0x20] sm:$0xf] %v2689_v41  ;;  %2113 = vst [vmem:[%s3433_s11 + $0x24] sm:$0xf] %v2690_v32 }
 0x1b4   : > { %2114 = vst [vmem:[%s3433_s11 + $0x28] sm:$0xf] %v2691_v14  ;;  %2115 = vst [vmem:[%s3433_s11 + $0x2c] sm:$0xf] %v2692_v21  ;;  %v2693_v19 = vcombine.low %v2046_v48, %v2046_v48  ;;  %v2694_v49 = vcombine.high %v2046_v48, %v2046_v48  ;;  %v2695_v13 = vcombine.low %v2047_v26, %v2047_v26 }
 0x1b5   : > { %v2696_v20 = vcombine.high %v2047_v26, %v2047_v26  ;;  %v1918_v27 = vadd.f32 %v1917_v60, %v4572_v42  ;;  %v1943_v63 = vmul.f32 %v4572_v42, %v4572_v42  ;;  %v1956_v6 = vadd.f32 %v1955_v46, %v4609_v25 }
 0x1b6   : > { %2116 = vst [vmem:[%s3433_s11 + $0x30] sm:$0xf] %v2693_v19  ;;  %2117 = vst [vmem:[%s3433_s11 + $0x34] sm:$0xf] %v2694_v49  ;;  %v1946_v34 = vmul.f32 %v4574_v35, %v4574_v35 }
 0x1b7   : > { %2118 = vst [vmem:[%s3433_s11 + $0x38] sm:$0xf] %v2695_v13  ;;  %2119 = vst [vmem:[%s3433_s11 + $0x3c] sm:$0xf] %v2696_v20  ;;  %v1919_v28 = vadd.f32 %v1918_v27, %v4576_v61  ;;  %v1957_v40 = vadd.f32 %v1956_v6, %v4615_v58 }
 0x1b9   : > { %v1920_v18 = vadd.f32 %v1919_v28, %v4570_v57  ;;  %v1958_v42 = vadd.f32 %v1957_v40, %v1943_v63 }
 0x1bb   : > { %v1921_v25 = vadd.f32 %v1920_v18, %v4574_v35  ;;  %v1959_v36 = vadd.f32 %v1958_v42, %v1944_v8  ;;  %v1930_v35 = vld [vmem:[%s3416_s17] sm:$0x1] }
 0x1bd   : > { %v1922_v0 = vrot.slane %v1921_v25, 4  ;;  %v1960_v15 = vadd.f32 %v1959_v36, %v1945_v51 }
 0x1bf   : > { %v1923_v61 = vadd.f32 %v1922_v0, %v1921_v25  ;;  %v1961_v9 = vadd.f32 %v1960_v15, %v1946_v34 }
 0x1c1   : > { %v1924_v58 = vrot.slane %v1923_v61, 2  ;;  %v1962_v22 = vrot.slane %v1961_v9, 4 }
 0x1c3   : > { %v1925_v16 = vadd.f32 %v1924_v58, %v1923_v61  ;;  %v1963_v12 = vadd.f32 %v1962_v22, %v1961_v9 }
 0x1c5   : > { %v1926_v54 = vrot.slane %v1925_v16, 1  ;;  %v1964_v57 = vrot.slane %v1963_v12, 2 }
 0x1c7   : > { %v1927_v53 = vadd.f32 %v1926_v54, %v1925_v16  ;;  %v1965_v10 = vadd.f32 %v1964_v57, %v1963_v12 }
 0x1c9   : > { %v1928_v4 = vadd.f32 %v1927_v53, %v1906_v62  ;;  %v1966_v38 = vrot.slane %v1965_v10, 1 }
 0x1cb   : > { %1929 = vst [vmem:[%s3399_s21] sm:$0x1] %v1928_v4  ;;  %v1967_v24 = vadd.f32 %v1966_v38, %v1965_v10 }
 0x1cd   : > { %v1968_v50 = vadd.f32 %v1967_v24, %v1930_v35 }
 0x1cf   : > { %1969 = vst [vmem:[%s3416_s17] sm:$0x1] %v1968_v50 }
 0x1d0 PF: > { %s18_s28 = sadd.s32 1, %s3297_s28   ;;  %s4813_s24 = smov %s3289_s26 }
 0x1d1   : > { %p15_p10 = scmp.ge.s32.totalorder %s18_s28, 6   ;;  %s4814_s25 = smov %s3293_s27 }
 0x1d2   : > { %s4815_s26 = smov %s4818_s29  ;;  %s4816_s27 = smov %s4822_s30 }
 0x1d3   :  { %17 = sbr.rel (!%p15_p10) target bundleno = 3 (0x3), region = 103 }

// kernel: dense_block_forward.3
= control target key start
LH: loop header
LB: loop body
LE: loop exit
PB: predicated region body
PF: predicated region fallthrough
CT: control target
= control target key end

     0   :  { %13 = vsyncpa [#allocation3], 0  ;;  %s5025_s0 = inlined_call_operand.vmem [shape: bf16[2,16,16,128], index: 0, kind: input, shape index: {}, may-alias: {0,5}]   ;;  %s5026_s1 = inlined_call_operand.vmem [shape: f32[1,128], index: 1, kind: input, shape index: {}]   ;;  %s5027_s2 = inlined_call_operand.vmem [shape: f32[1,128], index: 2, kind: input, shape index: {}]   ;;  %s5028_s3 = inlined_call_operand.vmem [shape: bf16[3,384,128], index: 3, kind: input, shape index: {}]   ;;  %s5029_s4 = inlined_call_operand.vmem [shape: f32[1,128], index: 4, kind: input, shape index: {}]   ;;  %s5030_s5 = inlined_call_operand.vmem [shape: bf16[2,16,16,128], index: 5, kind: output, shape index: {0}, may-alias: {0,5}]   ;;  %s5031_s6 = inlined_call_operand.hbm [shape: f32[2,1,128], index: 6, kind: output, shape index: {1}]   ;;  %s5032_s7 = inlined_call_operand.hbm [shape: f32[2,1,128], index: 7, kind: output, shape index: {2}]  }
   0x1   :  { %15 = vsyncpa [#allocation3 + $0x1], 0 }
   0x2   :  { %16 = vsyncpa [#allocation5], 0 }
   0x3   :  { %18 = vsyncpa [#allocation5 + $0x1], 0  ;;  %s3514_s24 = smov 0   ;;  %s3516_s25 = smov 0  }
   0x4   :  { %s3518_s26 = smov 0   ;;  %s3520_s27 = smov 0  }
   0x5   :  { %s3522_s28 = smov 0   ;;  %s3524_s29 = smov 0  }
   0x6   :  { %s3526_s30 = smov 0   ;;  %s3528_s8 = smov 0  }
   0x7 LB: > { %5053 = sst [smem:[#allocation8_spill]] %s3447_s26  ;;  %s2308_s9 = sadd.s32 4294967295, %s3467_s8   ;;  %s3467_s8 = sphi %s3528_s8, %s24_s8   ;;  %s3463_s30 = sphi %s3526_s30, %s5132_s30   ;;  %s3459_s29 = sphi %s3524_s29, %s5131_s29   ;;  %s3455_s28 = sphi %s3522_s28, %s5130_s28   ;;  %s3451_s27 = sphi %s3520_s27, %s5129_s27   ;;  %s3447_s26 = sphi %s3518_s26, %s5128_s26   ;;  %s3443_s25 = sphi %s3516_s25, %s5134_s25   ;;  %s3439_s24 = sphi %s3514_s24, %s5133_s24  }
   0x8   : > { %5054 = sst [smem:[#allocation9_spill]] %s3459_s29  ;;  %s2309_s10 = sadd.s32 4294967294, %s3467_s8  }
   0x9   : > { %5055 = sst [smem:[#allocation10_spill]] %s3463_s30  ;;  %s33_s11 = sadd.s32 1, %s3459_s29 }
   0xa   : > { %p34_p0 = scmp.ge.s32.totalorder %s33_s11, 2  ;;  %s36_s12 = sadd.s32 1, %s3463_s30 }
   0xb   : > { %p191_p1 = scmp.ne.s32.totalorder %s3447_s26, %s3443_s25  ;;  %p192_p2 = scmp.eq.s32.totalorder %s2308_s9, 3 }
   0xc   : > { %s5136_s11 = smov (%p34_p0, %s33_s11), 0  ;;  %s5138_s12 = smov (!%p34_p0, %s36_s12), %s3463_s30 }
   0xd   : > { %5056 = sst [smem:[#allocation11_spill]] %s5136_s11  ;;  %p3563_p3 = por %p192_p2, %p191_p1 }
   0xe   : > { %p197_p4 = scmp.ne.s32.totalorder %s3443_s25, %s3439_s24  ;;  %p38_p5 = scmp.ge.s32.totalorder %s5138_s12, 2 }
   0xf   : > { %p198_p6 = scmp.eq.s32.totalorder %s2309_s10, 3  ;;  %p2312_p7 = scmp.ge.s32.totalorder %s3467_s8, 1 }
  0x10   : > { %p262_p8 = scmp.lt.s32.totalorder %s3467_s8, 5  ;;  %s5140_s12 = smov (%p38_p5, %s5138_s12), 0 }
  0x11   : > { %5058 = sst [smem:[#allocation12_spill]] %s5140_s12  ;;  %p3573_p9 = por %p198_p6, %p197_p4 }
  0x12   : > { %p263_p10 = pnand %p2312_p7, %p262_p8  ;;  %s178_s15 = ssub.s32 %s3463_s30, %s5140_s12 }
  0x13   : > { %s181_s16 = sadd.s32 1, %s3447_s26  ;;  %p179_p11 = scmp.eq.s32.totalorder %s178_s15, 0 }
  0x14   : > { %266 = sbr.rel (%p263_p10) target bundleno = 507 (0x1fb), region = 40 }
  0x15   : > { %s3581_s17 = scalar_select %p179_p11, %s3447_s26, %s181_s16  }
  0x17   : > { %5060 = sst [smem:[#allocation13_spill]] %s3581_s17 }
  0x1b   : > { %s3584_s18 = sand.u32 1, %s3443_s25   ;;  %v3267_v0 = vld [vmem:[%s5028_s3 + $0x100] sm:$0xff]   ;;  %p307_p12 = scmp.lt.s32.totalorder %s3455_s28, 1  ;;  %v3270_v3 = vld [vmem:[%s5028_s3 + $0x108] sm:$0xff]   ;;  %v3273_v6 = vld [vmem:[%s5028_s3 + $0x110] sm:$0xff]   ;;  %v5037_v13 = vlaneseq  ;;  %vm3469_vm13 = vmmov 1  }
  0x1c   : > { %2756 = vmatprep.subr.bf16.mxu0 %v3267_v0  ;;  %v3268_v1 = vld [vmem:[%s5028_s3 + $0x140] sm:$0xff]   ;;  %s3597_s10 = sshll.u32 %s3451_s27, 3  ;;  %v3271_v4 = vld [vmem:[%s5028_s3 + $0x148] sm:$0xff]   ;;  %v3274_v7 = vld [vmem:[%s5028_s3 + $0x150] sm:$0xff]   ;;  %s4806_s17 = scalar_lea.vmem [#allocation4], %s3584_s18 }
  0x1d   : > { %v3269_v2 = vld [vmem:[%s5028_s3 + $0xc0] sm:$0xff]   ;;  %2996 = vmatprep.subr.bf16.mxu1 %v3268_v1  ;;  %s3603_s19 = scalar_select %p307_p12, %s3455_s28, 1  ;;  %v3272_v5 = vld [vmem:[%s5028_s3 + $0xc8] sm:$0xff]   ;;  %v3275_v8 = vld [vmem:[%s5028_s3 + $0xd0] sm:$0xff]   ;;  %v3658_v18 = vshrl.u32 %v5037_v13, 7 }
  0x1e   : > { %2757 = vmatpush3.bf16.msra.mxu0 %v3269_v2  ;;  %2997 = vmatpush3.bf16.msra.mxu1 %v3268_v1  ;;  %p315_p13 = scmp.lt.s32.totalorder %s3597_s10, 15  ;;  %v3276_v9 = vld [vmem:[%s5028_s3 + $0x118] sm:$0xff]   ;;  %s3630_s12 = sadd.s32 4294967295, %s3597_s10  ;;  %v3279_v12 = vld [vmem:[%s5028_s3 + $0x120] sm:$0xff]   ;;  %v3282_v17 = vld [vmem:[%s5028_s3 + $0x128] sm:$0xff]  }
  0x1f   : > { %2758 = vmatprep.subr.bf16.mxu0 %v3270_v3  ;;  %2998 = vmatprep.subr.bf16.mxu1 %v3271_v4  ;;  %s2317_s16 = sshll.u32 %s3603_s19, 5  ;;  %v3277_v10 = vld [vmem:[%s5028_s3 + $0x158] sm:$0xff]   ;;  %v3280_v14 = vld [vmem:[%s5028_s3 + $0x160] sm:$0xff]   ;;  %s2743_s26 = sshll.u32 %s3603_s19, 7  ;;  %v3648_v15 = vstv %s3630_s12  ;;  %v3283_v19 = vld [vmem:[%s5028_s3 + $0x168] sm:$0xff]   ;;  %v3679_v23 = vadd.s32 8, %v3658_v18 }
  0x20   : > { %s316_s30 = scalar_select %p315_p13, %s3597_s10, 15  ;;  %v3278_v11 = vld [vmem:[%s5028_s3 + $0xd8] sm:$0xff]   ;;  %v3281_v16 = vld [vmem:[%s5028_s3 + $0xe0] sm:$0xff]   ;;  %v457_v20 = vadd.s32 1, %v3648_v15  ;;  %v3284_v21 = vld [vmem:[%s5028_s3 + $0xe8] sm:$0xff]   ;;  %vm572_vm2 = vcmp.ge.s32.totalorder %v3658_v18, 1 }
  0x21   : > { %v3285_v22 = vld [vmem:[%s5028_s3 + $0x130] sm:$0xff]   ;;  %v458_v28 = vadd.s32 2, %v3648_v15  ;;  %v3288_v29 = vld [vmem:[%s5028_s3 + $0x138] sm:$0xff]   ;;  %v3704_v31 = vld [vmem:[%s5026_s1] ss:$0 sm:$0xff]  ;;  %vm626_vm3 = vcmp.lt.s32.totalorder %v3658_v18, 7 }
  0x22   : > { %2759 = vmatpush3.bf16.msra.mxu0 %v3272_v5  ;;  %2999 = vmatpush3.bf16.msra.mxu1 %v3271_v4  ;;  %s2316_s9 = sshll.u32 %s316_s30, 1  ;;  %v3286_v24 = vld [vmem:[%s5028_s3 + $0x170] sm:$0xff]   ;;  %vm467_vm0 = vcmp.ge.s32.totalorder %v457_v20, 0  ;;  %vm477_vm1 = vcmp.lt.s32.totalorder %v457_v20, 16  ;;  %v3289_v30 = vld [vmem:[%s5028_s3 + $0x178] sm:$0xff]   ;;  %vm644_vm4 = vcmp.lt.s32.totalorder %v3679_v23, 15  ;;  %vm3779_vm14 = vmpackc.low %vm3469_vm13, %vm572_vm2 }
  0x23   : > { %2760 = vmatprep.subr.bf16.mxu0 %v3273_v6  ;;  %3000 = vmatprep.subr.bf16.mxu1 %v3274_v7  ;;  %s319_s11 = sadd.s32 %s2317_s16, %s2316_s9  ;;  %s3666_s16 = scalar_lea.vmem %s5025_s0, %s2743_s26  ;;  %v3287_v25 = vld [vmem:[%s5028_s3 + $0xf0] sm:$0xff]   ;;  %v3713_v34 = vld [vmem:[%s5027_s2] ss:$0 sm:$0xff]  ;;  %v3290_v41 = vld [vmem:[%s5028_s3 + $0xf8] sm:$0xff]   ;;  %vm555_vm5 = vcmp.lt.s32.totalorder %v3658_v18, 1  ;;  %vm468_vm6 = vcmp.ge.s32.totalorder %v458_v28, 0 }
  0x24   : > { %s2318_s20 = sshll.u32 %s319_s11, 2  ;;  %s2746_s11 = sshll.u32 %s3451_s27, 6  ;;  %v3730_v42 = vadd.s32 3, %v3648_v15  ;;  %vm3736_vm7 = vmand %vm467_vm0, %vm477_vm1  ;;  %vm478_vm8 = vcmp.lt.s32.totalorder %v458_v28, 16  ;;  %v3291_v47 = vld [vmem:[%s5028_s3 + $0x40] sm:$0xff]   ;;  %v3750_v50 = vadd.s32 4, %v3648_v15 }
  0x25   : > { %s3641_s29 = scalar_lea.vmem %s5030_s5, %s2318_s20  ;;  %s3676_s20 = scalar_lea.vmem %s3666_s16, %s2746_s11  ;;  %v3292_v49 = vld [vmem:[%s5028_s3 + $0x1c0] sm:$0xff]   ;;  %vm2401_vm9 = vmpackc.low %vm3736_vm7, %vm3736_vm7  ;;  %v3765_v56 = vadd.s32 5, %v3648_v15  ;;  %v3768_v57 = vadd.s32 6, %v3648_v15  ;;  %v3324_v45 = vld [vmem:[%s5028_s3 + $0x98] sm:$0xff]  }
  0x26   : > { %2761 = vmatpush3.bf16.msra.mxu0 %v3275_v8  ;;  %3001 = vmatpush3.bf16.msra.mxu1 %v3274_v7  ;;  %v3689_v26 = vld [vmem:[%s3676_s20] sm:$0xf]  ;;  %v3692_v27 = vld [vmem:[%s3676_s20 + $0x4] sm:$0xf]  ;;  %v3716_v35 = vld [vmem:[%s3676_s20 + $0x8] sm:$0xf] }
  0x27   : > { %2762 = vmatprep.subr.bf16.mxu0 %v3276_v9  ;;  %3002 = vmatprep.subr.bf16.mxu1 %v3277_v10  ;;  %v366_v32 = vunpack.c.l.bf16 %v3689_v26  ;;  %v367_v33 = vunpack.c.l.bf16 %v3692_v27  ;;  %v3719_v36 = vld [vmem:[%s3676_s20 + $0xc] sm:$0xf]  ;;  %v368_v39 = vunpack.c.l.bf16 %v3716_v35  ;;  %p328_p0 = scmp.gt.s32.totalorder %s3630_s12, 0  ;;  %vm3758_vm10 = vmand %vm468_vm6, %vm478_vm8  ;;  %vm469_vm11 = vcmp.ge.s32.totalorder %v3730_v42, 0  ;;  %s330_s15 = sadd.s32 8, %s3597_s10  ;;  %v3294_v6 = vld [vmem:[%s5028_s3 + $0x180] sm:$0xff]  }
  0x28   : > { %v369_v40 = vunpack.c.l.bf16 %v3719_v36  ;;  %vm479_vm12 = vcmp.lt.s32.totalorder %v3730_v42, 16  ;;  %vm3791_vm15 = vmpackc.low %vm644_vm4, %vm3469_vm13  ;;  %v3801_v7 = vld [vmem:[%s3676_s20 + $0x10] sm:$0xf]  ;;  %v3804_v8 = vadd.s32 7, %v3648_v15  ;;  %vm470_vm1 = vcmp.ge.s32.totalorder %v3750_v50, 0  ;;  %p3939_p1 = scmp.lt.s32.totalorder %s330_s15, 15 }
  0x29   : > { %v392_v37 = vmul.f32 %v3704_v31, %v366_v32  ;;  %v393_v38 = vmul.f32 %v3704_v31, %v367_v33  ;;  %v394_v46 = vmul.f32 %v3704_v31, %v368_v39  ;;  %vm3832_vm0 = vmpackc.low %vm3758_vm10, %vm3758_vm10  ;;  %v3298_v32 = vld [vmem:[%s5028_s3 + $0x1c8] sm:$0xff]   ;;  %s5142_s12 = smov (!%p328_p0, %s3630_s12), 0  ;;  %vm480_vm2 = vcmp.lt.s32.totalorder %v3750_v50, 16  ;;  %v3333_v23 = vld [vmem:[%s5028_s3 + $0xb8] sm:$0xff]   ;;  %s4803_s11 = scalar_lea.vmem [#allocation2], %s3584_s18 }
  0x2a   : > { %2763 = vmatpush3.bf16.msra.mxu0 %v3278_v11  ;;  %3003 = vmatpush3.bf16.msra.mxu1 %v3277_v10  ;;  %v395_v48 = vmul.f32 %v3704_v31, %v369_v40  ;;  %vm3896_vm4 = vmand %vm469_vm11, %vm479_vm12  ;;  %vm471_vm6 = vcmp.ge.s32.totalorder %v3765_v56, 0  ;;  %vm481_vm8 = vcmp.lt.s32.totalorder %v3765_v56, 16  ;;  %s5144_s15 = smov (!%p3939_p1, %s330_s15), 15  ;;  %vm472_vm13 = vcmp.ge.s32.totalorder %v3768_v57, 0  ;;  %s2744_s26 = sshll.u32 %s5142_s12, 3 }
  0x2b   : > { %2764 = vmatprep.subr.bf16.mxu0 %v3279_v12  ;;  %3004 = vmatprep.subr.bf16.mxu1 %v3280_v14  ;;  %v418_v43 = vadd.f32 %v3713_v34, %v392_v37  ;;  %v419_v44 = vadd.f32 %v3713_v34, %v393_v38  ;;  %v420_v53 = vadd.f32 %v3713_v34, %v394_v46  ;;  %vm3953_vm11 = vmpackc.low %vm3896_vm4, %vm3896_vm4  ;;  %s2747_s22 = sshll.u32 %s5144_s15, 3  ;;  %p2714_p2 = scmp.ne.s32.totalorder %s3451_s27, 0 }
  0x2c   : > { %v421_v54 = vadd.f32 %v3713_v34, %v395_v48  ;;  %vm3995_vm12 = vmand %vm471_vm6, %vm481_vm8  ;;  %vm473_vm6 = vcmp.ge.s32.totalorder %v3804_v8, 0  ;;  %s4105_s23 = scalar_lea.vmem %s3666_s16, %s2747_s22  ;;  %vm483_vm8 = vcmp.lt.s32.totalorder %v3804_v8, 16  ;;  %s335_s22 = scalar_lea.vmem %s3666_s16, %s2744_s26  ;;  %v3309_v8 = vld [vmem:[%s5028_s3 + $0x70] sm:$0xff]  }
  0x2d   : > { %v438_v51 = vmax.f32 %v418_v43, 0.0  ;;  %v439_v52 = vmax.f32 %v419_v44, 0.0  ;;  %v440_v61 = vmax.f32 %v420_v53, 0.0  ;;  %v3295_v43 = vld [vmem:[%s5028_s3 + $0x48] sm:$0xff]  }
  0x2e   : > { %2765 = vmatpush3.bf16.msra.mxu0 %v3281_v16  ;;  %3005 = vmatpush3.bf16.msra.mxu1 %v3280_v14  ;;  %v441_v4 = vmax.f32 %v421_v54, 0.0  ;;  %v3815_v14 = vld [vmem:[%s3676_s20 + $0x14] sm:$0xf]  ;;  %v3818_v16 = vld [vmem:[%s3676_s20 + $0x18] sm:$0xf] }
  0x2f   : > { %2766 = vmatprep.subr.bf16.mxu0 %v3282_v17  ;;  %3006 = vmatprep.subr.bf16.mxu1 %v3283_v19  ;;  %v518_v58 = vsel %vm3736_vm7, %v438_v51, 0.0  ;;  %v519_v59 = vsel %vm3736_vm7, %v439_v52, 0.0  ;;  %v3774_v60 = vpack.c.bf16 %v439_v52, %v438_v51  ;;  %v520_v5 = vsel %vm3758_vm10, %v440_v61, 0.0  ;;  %5069 = vst [vmem:[#allocation14_spill] sm:$0xff] %v3818_v16  ;;  %v3821_v17 = vld [vmem:[%s3676_s20 + $0x1c] sm:$0xf] }
  0x30   : > { %v540_v62 = vrot.slane %v518_v58, 7  ;;  %v548_v63 = vrot.slane %v519_v59, 7  ;;  %v611_v0 = vrot.slane %v518_v58, 1  ;;  %v619_v1 = vrot.slane %v519_v59, 1  ;;  %v3300_v51 = vld [vmem:[%s5028_s3 + $0x188] sm:$0xff]  }
  0x31   : > { %2403 = vmatprep.mubr.msk.bf16.mxu0 %vm2401_vm9, %v3774_v60  ;;  %v3839_v28 = vpack.c.bf16 %v441_v4, %v440_v61  ;;  %v541_v33 = vrot.slane %v520_v5, 7  ;;  %v372_v38 = vunpack.c.l.bf16 %v3818_v16  ;;  %v373_v39 = vunpack.c.l.bf16 %v3821_v17  ;;  %v3296_v52 = vld [vmem:[%s5028_s3 + $0x8] sm:$0xff]   ;;  %v3322_v16 = vld [vmem:[%s5028_s3 + $0x1f0] sm:$0xff]  }
  0x32   : > { %2767 = vmatpush3.bf16.msra.mxu0 %v3284_v21  ;;  %3007 = vmatpush3.bf16.msra.mxu1 %v3283_v19  ;;  %v628_v9 = vsel %vm626_vm3, %v611_v0, %v619_v1  ;;  %v636_v10 = vsel %vm626_vm3, %v619_v1, %v611_v0  ;;  %v557_v11 = vsel %vm555_vm5, %v540_v62, %v548_v63  ;;  %v521_v21 = vsel %vm3758_vm10, %v441_v4, 0.0  ;;  %v3297_v4 = vld [vmem:[%s5028_s3 + $0x50] sm:$0xff]   ;;  %vm3930_vm10 = vmand %vm470_vm1, %vm480_vm2 }
  0x33   : > { %2768 = vmatprep.subr.bf16.mxu0 %v3285_v22  ;;  %3008 = vmatprep.subr.bf16.mxu1 %v3286_v24  ;;  %v565_v12 = vsel %vm555_vm5, %v548_v63, %v540_v62  ;;  %v3823_v19 = vpack.c.bf16 %v636_v10, %v628_v9  ;;  %v612_v22 = vrot.slane %v520_v5, 1  ;;  %v549_v37 = vrot.slane %v521_v21, 7  ;;  %v3903_v62 = vld [vmem:[%s3676_s20 + $0x20] sm:$0xf]  ;;  %v3906_v63 = vld [vmem:[%s3676_s20 + $0x24] sm:$0xf]  ;;  %vm4070_vm2 = vmpackc.low %vm3930_vm10, %vm3930_vm10 }
  0x34   : > { %v3825_v20 = vpack.c.bf16 %v557_v11, %v565_v12  ;;  %v398_v54 = vmul.f32 %v3704_v31, %v372_v38  ;;  %v399_v55 = vmul.f32 %v3704_v31, %v373_v39  ;;  %5074 = vst [vmem:[#allocation15_spill] sm:$0xff] %v3903_v62  ;;  %5075 = vst [vmem:[#allocation16_spill] sm:$0xff] %v3906_v63  ;;  %v374_v5 = vunpack.c.l.bf16 %v3903_v62  ;;  %v3924_v9 = vld [vmem:[%s3676_s20 + $0x2c] sm:$0xf] }
  0x35   : > { %3012 = vmatprep.mubr.msk.bf16.mxu1 %vm3791_vm15, %v3823_v19  ;;  %v558_v48 = vsel %vm555_vm5, %v541_v33, %v549_v37  ;;  %5077 = vst [vmem:[#allocation18_spill] sm:$0xff] %v3924_v9  ;;  %v375_v12 = vunpack.c.l.bf16 %v3906_v63  ;;  %vm482_vm1 = vcmp.lt.s32.totalorder %v3768_v57, 16 }
  0x36   : > { %2769 = vmatpush3.bf16.msra.mxu0 %v3287_v25  ;;  %3009 = vmatpush3.bf16.msra.mxu1 %v3286_v24  ;;  %v620_v24 = vrot.slane %v521_v21, 1  ;;  %v3293_v25 = vld [vmem:[%s5028_s3] sm:$0xff]   ;;  %v3911_v1 = vadd.f32 %v3713_v34, %v398_v54  ;;  %v3914_v42 = vadd.f32 %v3713_v34, %v399_v55  ;;  %v3306_v55 = vld [vmem:[%s5028_s3 + $0x190] sm:$0xff]  }
  0x37   : > { %2770 = vmatprep.subr.bf16.mxu0 %v3288_v29  ;;  %3010 = vmatprep.subr.bf16.mxu1 %v3289_v30  ;;  %v370_v29 = vunpack.c.l.bf16 %v3801_v7 }
  0x38   : > { %v629_v40 = vsel %vm626_vm3, %v612_v22, %v620_v24  ;;  %v444_v50 = vmax.f32 %v3911_v1, 0.0 }
  0x39   : > { %v396_v44 = vmul.f32 %v3704_v31, %v370_v29  ;;  %v3299_v29 = vld [vmem:[%s5028_s3 + $0x10] sm:$0xff]  }
  0x3a   : > { %2771 = vmatpush3.bf16.msra.mxu0 %v3290_v41  ;;  %3011 = vmatpush3.bf16.msra.mxu1 %v3289_v30  ;;  %v371_v30 = vunpack.c.l.bf16 %v3815_v14  ;;  %v637_v41 = vsel %vm626_vm3, %v620_v24, %v612_v22  ;;  %v377_v22 = vunpack.c.l.bf16 %v3924_v9 }
  0x3b   : > { %2836 = vmatprep.subr.bf16.mxu1 %v3291_v47  ;;  %2916 = vmatprep.subr.bf16.mxu0 %v3292_v49  ;;  %v3866_v46 = vpack.c.bf16 %v637_v41, %v629_v40  ;;  %v566_v49 = vsel %vm555_vm5, %v549_v37, %v541_v33  ;;  %v422_v53 = vadd.f32 %v3713_v34, %v396_v44  ;;  %v3304_v33 = vld [vmem:[%s5028_s3 + $0x1d0] sm:$0xff]  }
  0x3c   : > { %v397_v47 = vmul.f32 %v3704_v31, %v371_v30  ;;  %v3900_v61 = vpack.c.bf16 %v558_v48, %v566_v49  ;;  %v401_v40 = vmul.f32 %v3704_v31, %v375_v12  ;;  %v3302_v12 = vld [vmem:[%s5028_s3 + $0x18] sm:$0xff]   ;;  %v4519_v30 = vld [vmem:[%s5028_s3 + $0x220] sm:$0xff]  }
  0x3d   : > { %2406 = vmatmul.mubr.msk.bf16.vlgmr.msra.gmra.mrb[0].mxu0 %vm3779_vm14, %v3825_v20  ;;  %3013 = vmatmul.mubr.msk.bf16.vlgmr.msra.gmra.mrb[0].mxu1 %vm3791_vm15, %v3866_v46  ;;  %v442_v0 = vmax.f32 %v422_v53, 0.0 }
  0x3e   : > { %2917 = vmatpush3.bf16.msra.mxu0 %v3294_v6  ;;  %2409 = vmatprep.mubr.msk.bf16.mxu0 %vm3832_vm0, %v3839_v28  ;;  %v423_v58 = vadd.f32 %v3713_v34, %v397_v47  ;;  %v3921_v6 = vld [vmem:[%s3676_s20 + $0x28] sm:$0xf]  ;;  %v3301_v47 = vld [vmem:[%s5028_s3 + $0x58] sm:$0xff]  }
  0x3f   : > { %2918 = vmatprep.subr.bf16.mxu0 %v3298_v32  ;;  %2837 = vmatpush3.bf16.msra.mxu1 %v3293_v25  ;;  %5076 = vst [vmem:[#allocation17_spill] sm:$0xff] %v3921_v6  ;;  %v376_v21 = vunpack.c.l.bf16 %v3921_v6  ;;  %v522_v24 = vsel %vm3896_vm4, %v442_v0, 0.0  ;;  %v445_v25 = vmax.f32 %v3914_v42, 0.0  ;;  %v400_v32 = vmul.f32 %v3704_v31, %v374_v5 }
  0x40   : > { %2838 = vmatprep.subr.bf16.mxu1 %v3295_v43  ;;  %v443_v10 = vmax.f32 %v423_v58, 0.0  ;;  %v613_v38 = vrot.slane %v522_v24, 1  ;;  %v3971_v43 = vsel %vm3930_vm10, %v444_v50, 0.0  ;;  %v542_v54 = vrot.slane %v522_v24, 7 }
  0x41   : > { %v3975_v44 = vsel %vm3930_vm10, %v445_v25, 0.0  ;;  %v3981_v48 = vadd.f32 %v3713_v34, %v400_v32  ;;  %v614_v49 = vrot.slane %v3971_v43, 1  ;;  %v4087_v11 = vpack.c.bf16 %v445_v25, %v444_v50  ;;  %v3310_v50 = vld [vmem:[%s5028_s3 + $0x1d8] sm:$0xff]   ;;  %vm4161_vm10 = vmand %vm473_vm6, %vm483_vm8 }
  0x42   : > { %2919 = vmatpush3.bf16.msra.mxu0 %v3300_v51  ;;  %v523_v37 = vsel %vm3896_vm4, %v443_v10, 0.0  ;;  %v3966_v39 = vpack.c.bf16 %v443_v10, %v442_v0  ;;  %v622_v51 = vrot.slane %v3975_v44, 1  ;;  %vm4083_vm4 = vmand %vm472_vm13, %vm482_vm1  ;;  %vm466_vm8 = vcmp.ge.s32.totalorder %v3648_v15, 0 }
  0x43   : > { %2839 = vmatpush3.bf16.msra.mxu1 %v3296_v52  ;;  %v621_v41 = vrot.slane %v523_v37, 1  ;;  %2920 = vmatprep.subr.bf16.mxu0 %v3304_v33  ;;  %v3989_v52 = vadd.f32 %v3713_v34, %v401_v40  ;;  %v5041_v0 = vmax.f32 %v3981_v48, 0.0  ;;  %v550_v1 = vrot.slane %v523_v37, 7  ;;  %v4036_v37 = vld [vmem:[%s3676_s20 + $0x30] sm:$0xf]  ;;  %vm4180_vm13 = vmpackc.low %vm3995_vm12, %vm3995_vm12 }
  0x44   : > { %2840 = vmatprep.subr.bf16.mxu1 %v3297_v4  ;;  %v631_v42 = vsel %vm626_vm3, %v614_v49, %v622_v51  ;;  %v639_v4 = vsel %vm626_vm3, %v622_v51, %v614_v49  ;;  %5085 = vst [vmem:[#allocation19_spill] sm:$0xff] %v4036_v37  ;;  %v3303_v49 = vld [vmem:[%s5028_s3 + $0x60] sm:$0xff]   ;;  %v4055_v51 = vld [vmem:[%s3676_s20 + $0x34] sm:$0xf] }
  0x45   : > { %2412 = vmatmul.mubr.msk.bf16.gmra.mrb[4].mxu0 %vm3779_vm14, %v3900_v61  ;;  %v630_v58 = vsel %vm626_vm3, %v613_v38, %v621_v41  ;;  %v638_v59 = vsel %vm626_vm3, %v621_v41, %v613_v38  ;;  %v5039_v5 = vmax.f32 %v3989_v52, 0.0  ;;  %v4020_v10 = vpack.c.bf16 %v639_v4, %v631_v42  ;;  %5086 = vst [vmem:[#allocation20_spill] sm:$0xff] %v4055_v51 }
  0x46   : > { %2415 = vmatprep.mubr.msk.bf16.mxu0 %vm3953_vm11, %v3966_v39  ;;  %v4007_v56 = vpack.c.bf16 %v638_v59, %v630_v58  ;;  %2921 = vmatpush3.bf16.msra.mxu0 %v3306_v55  ;;  %v4029_v24 = vsel %vm3995_vm12, %v5041_v0, 0.0  ;;  %v559_v32 = vsel %vm555_vm5, %v542_v54, %v550_v1  ;;  %v567_v33 = vsel %vm555_vm5, %v550_v1, %v542_v54  ;;  %v4075_v58 = vld [vmem:[%s3676_s20 + $0x38] sm:$0xf]  ;;  %v2753_v55 = vld [vmem:[%s4105_s23] sm:$0xff]  }
  0x47   : > { %2841 = vmatpush3.bf16.msra.mxu1 %v3299_v29  ;;  %v4045_v29 = vsel %vm3995_vm12, %v5039_v5, 0.0  ;;  %v615_v38 = vrot.slane %v4029_v24, 1  ;;  %v4048_v40 = vpack.c.bf16 %v559_v32, %v567_v33  ;;  %v402_v41 = vmul.f32 %v3704_v31, %v376_v21  ;;  %v3305_v21 = vld [vmem:[%s5028_s3 + $0x20] sm:$0xff]   ;;  %5089 = vst [vmem:[#allocation21_spill] sm:$0xff] %v4075_v58  ;;  %v3307_v33 = vld [vmem:[%s5028_s3 + $0x68] sm:$0xff]   ;;  %2922 = vmatprep.subr.bf16.mxu0 %v3310_v50  ;;  %v3312_v50 = vld [vmem:[%s5028_s3 + $0x198] sm:$0xff]  }
  0x48   : > { %3016 = vmatprep.mubr.msk.bf16.mxu1 %vm3791_vm15, %v4007_v56  ;;  %2842 = vmatprep.subr.bf16.mxu1 %v3301_v47  ;;  %v623_v47 = vrot.slane %v4045_v29, 1  ;;  %v403_v54 = vmul.f32 %v3704_v31, %v377_v22  ;;  %v378_v59 = vunpack.c.l.bf16 %v4036_v37  ;;  %v379_v1 = vunpack.c.l.bf16 %v4055_v51  ;;  %v4555_v37 = vld [vmem:[%s5028_s3 + $0x238] sm:$0xff]  }
  0x49   : > { %3017 = vmatmul.mubr.msk.bf16.gmra.mrb[4].mxu1 %vm3791_vm15, %v4020_v10  ;;  %v4081_v57 = vadd.f32 %v3713_v34, %v402_v41 }
  0x4a   : > { %v632_v42 = vsel %vm626_vm3, %v615_v38, %v623_v47  ;;  %v640_v4 = vsel %vm626_vm3, %v623_v47, %v615_v38  ;;  %v4098_v32 = vadd.f32 %v3713_v34, %v403_v54  ;;  %v404_v38 = vmul.f32 %v3704_v31, %v378_v59  ;;  %2923 = vmatpush3.bf16.msra.mxu0 %v3312_v50 }
  0x4b   : > { %2843 = vmatpush3.bf16.msra.mxu1 %v3302_v12  ;;  %v4107_v25 = vpack.c.bf16 %v640_v4, %v632_v42  ;;  %v5038_v12 = vmax.f32 %v4081_v57, 0.0  ;;  %v405_v41 = vmul.f32 %v3704_v31, %v379_v1  ;;  %v543_v54 = vrot.slane %v3971_v43, 7  ;;  %v4141_v43 = vld [vmem:[%s3676_s20 + $0x3c] sm:$0xf] }
  0x4c   : > { %2844 = vmatprep.subr.bf16.mxu1 %v3303_v49  ;;  %v5040_v47 = vmax.f32 %v4098_v32, 0.0  ;;  %v3308_v49 = vld [vmem:[%s5028_s3 + $0x28] sm:$0xff]   ;;  %v551_v42 = vrot.slane %v3975_v44, 7  ;;  %v4135_v1 = vadd.f32 %v3713_v34, %v404_v38  ;;  %5092 = vst [vmem:[#allocation22_spill] sm:$0xff] %v4141_v43  ;;  %v380_v44 = vunpack.c.l.bf16 %v4075_v58 }
  0x4d   : > { %2418 = vmatmul.mubr.msk.bf16.gmra.mrb[8].mxu0 %vm3779_vm14, %v4048_v40  ;;  %3020 = vmatprep.mubr.msk.bf16.mxu1 %vm3791_vm15, %v4107_v25  ;;  %v4132_v59 = vsel %vm4083_vm4, %v5038_v12, 0.0  ;;  %v4138_v4 = vadd.f32 %v3713_v34, %v405_v41  ;;  %v5098_v50 = vmax.f32 %v3989_v52, 0.0  ;;  %v4385_v41 = vld [vmem:[%s5028_s3 + $0x200] sm:$0xff]  }
  0x4e   : > { %2421 = vmatprep.mubr.msk.bf16.mxu0 %vm4070_vm2, %v4087_v11  ;;  %v4154_v13 = vsel %vm4083_vm4, %v5040_v47, 0.0  ;;  %v616_v38 = vrot.slane %v4132_v59, 1  ;;  %v560_v12 = vsel %vm555_vm5, %v543_v54, %v551_v42  ;;  %v568_v5 = vsel %vm555_vm5, %v551_v42, %v543_v54 }
  0x4f   : > { %2845 = vmatpush3.bf16.msra.mxu1 %v3305_v21  ;;  %v624_v47 = vrot.slane %v4154_v13, 1  ;;  %v4172_v58 = vpack.c.bf16 %v560_v12, %v568_v5  ;;  %v406_v54 = vmul.f32 %v3704_v31, %v380_v44  ;;  %v464_v42 = vadd.s32 8, %v3648_v15  ;;  %v3311_v5 = vld [vmem:[%s5028_s3 + $0x30] sm:$0xff]   ;;  %v2749_v21 = vld [vmem:[%s335_s22] sm:$0xff]  }
  0x50   : > { %2846 = vmatprep.subr.bf16.mxu1 %v3307_v33  ;;  %v381_v33 = vunpack.c.l.bf16 %v4141_v43  ;;  %v5097_v12 = vmax.f32 %v3981_v48, 0.0  ;;  %v5099_v44 = vmax.f32 %v4135_v1, 0.0  ;;  %v5100_v6 = vmax.f32 %v4138_v4, 0.0 }
  0x51   : > { %v633_v0 = vsel %vm626_vm3, %v616_v38, %v624_v47  ;;  %v641_v43 = vsel %vm626_vm3, %v624_v47, %v616_v38  ;;  %vm474_vm12 = vcmp.ge.s32.totalorder %v464_v42, 0  ;;  %vm484_vm1 = vcmp.lt.s32.totalorder %v464_v42, 16 }
  0x52   : > { %v4194_v53 = vpack.c.bf16 %v5098_v50, %v5097_v12  ;;  %v4204_v51 = vsel %vm4161_vm10, %v5099_v44, 0.0  ;;  %v4210_v48 = vsel %vm4161_vm10, %v5100_v6, 0.0  ;;  %v4215_v52 = vpack.c.bf16 %v641_v43, %v633_v0  ;;  %v3313_v50 = vld [vmem:[%s5028_s3 + $0x78] sm:$0xff]   ;;  %v3316_v6 = vld [vmem:[%s5028_s3 + $0x1e0] sm:$0xff]   ;;  %vm4242_vm6 = vmand %vm474_vm12, %vm484_vm1 }
  0x53   : > { %2847 = vmatpush3.bf16.msra.mxu1 %v3308_v49  ;;  %v617_v47 = vrot.slane %v4204_v51, 1  ;;  %v625_v38 = vrot.slane %v4210_v48, 1  ;;  %v407_v12 = vmul.f32 %v3704_v31, %v381_v33  ;;  %v4230_v0 = vadd.f32 %v3713_v34, %v406_v54  ;;  %2924 = vmatprep.subr.bf16.mxu0 %v3316_v6  ;;  %vm2443_vm7 = vmpackc.low %vm4242_vm6, %vm4242_vm6 }
  0x54   : > { %2848 = vmatprep.subr.bf16.mxu1 %v3309_v8  ;;  %v2750_v49 = vunpack.c.l.bf16 %v2749_v21  ;;  %3021 = vmatmul.mubr.msk.bf16.gmra.mrb[8].mxu1 %vm3791_vm15, %v4215_v52  ;;  %v2751_v42 = vunpack.c.h.bf16 %v2749_v21  ;;  %v3317_v8 = vld [vmem:[%s5028_s3 + $0x1a0] sm:$0xff]   ;;  %v3314_v21 = vld [vmem:[%s5028_s3 + $0x38] sm:$0xff]   ;;  %vm476_vm12 = vcmp.lt.s32.totalorder %v3648_v15, 16 }
  0x55   : > { %2424 = vmatmul.mubr.msk.bf16.gmra.mrb[12].mxu0 %vm3779_vm14, %v4172_v58  ;;  %v634_v43 = vsel %vm626_vm3, %v617_v47, %v625_v38  ;;  %v642_v33 = vsel %vm626_vm3, %v625_v38, %v617_v47  ;;  %v4240_v44 = vadd.f32 %v3713_v34, %v407_v12  ;;  %v5051_v62 = vmax.f32 %v4230_v0, 0.0  ;;  %vm4294_vm1 = vmand %vm466_vm8, %vm476_vm12 }
  0x56   : > { %2427 = vmatprep.mubr.msk.bf16.mxu0 %vm4180_vm13, %v4194_v53  ;;  %v4249_v9 = vpack.c.bf16 %v642_v33, %v634_v43  ;;  %v390_v63 = vmul.f32 %v2750_v49, %v3704_v31  ;;  %v391_v38 = vmul.f32 %v2751_v42, %v3704_v31  ;;  %v544_v12 = vrot.slane %v4029_v24, 7  ;;  %2925 = vmatpush3.bf16.msra.mxu0 %v3317_v8  ;;  %v3315_v24 = vld [vmem:[%s5028_s3 + $0x80] sm:$0xff]   ;;  %v3319_v42 = vld [vmem:[%s5028_s3 + $0x1e8] sm:$0xff]   ;;  %vm4312_vm8 = vmpackc.low %vm4083_vm4, %vm4083_vm4 }
  0x57   : > { %v5050_v47 = vmax.f32 %v4240_v44, 0.0  ;;  %2849 = vmatpush3.bf16.msra.mxu1 %v3311_v5  ;;  %v4268_v5 = vsel %vm4242_vm6, %v5051_v62, 0.0  ;;  %v552_v31 = vrot.slane %v4045_v29, 7  ;;  %v5103_v49 = vmax.f32 %v4081_v57, 0.0  ;;  %v3320_v8 = vld [vmem:[%s5028_s3 + $0x1a8] sm:$0xff]   ;;  %2926 = vmatprep.subr.bf16.mxu0 %v3319_v42  ;;  %vm2497_vm4 = vmpackc.low %vm4294_vm1, %vm4294_vm1  ;;  %v3323_v42 = vld [vmem:[%s5028_s3 + $0x1b0] sm:$0xff]  }
  0x58   : > { %3024 = vmatprep.mubr.msk.bf16.mxu1 %vm3791_vm15, %v4249_v9  ;;  %2850 = vmatprep.subr.bf16.mxu1 %v3313_v50  ;;  %v416_v6 = vadd.f32 %v3713_v34, %v390_v63  ;;  %v5104_v43 = vmax.f32 %v4098_v32, 0.0  ;;  %v729_v29 = vrot.slane %v4268_v5, 1  ;;  %v417_v50 = vadd.f32 %v3713_v34, %v391_v38  ;;  %vm4370_vm12 = vmpackc.low %vm4161_vm10, %vm4161_vm10 }
  0x59   : > { %v4288_v63 = vsel %vm4242_vm6, %v5050_v47, 0.0  ;;  %v545_v32 = vrot.slane %v4132_v59, 7  ;;  %v561_v47 = vsel %vm555_vm5, %v544_v12, %v552_v31  ;;  %v569_v34 = vsel %vm555_vm5, %v552_v31, %v544_v12  ;;  %v3339_v59 = vld [vmem:[%s5026_s1] ss:$0 sm:$0xff] }
  0x5a   : > { %v4279_v33 = vpack.c.bf16 %v5104_v43, %v5103_v49  ;;  %v730_v49 = vrot.slane %v4288_v63, 1  ;;  %v436_v43 = vmax.f32 %v416_v6, 0.0  ;;  %v437_v38 = vmax.f32 %v417_v50, 0.0  ;;  %2927 = vmatpush3.bf16.msra.mxu0 %v3320_v8  ;;  %v3325_v8 = vld [vmem:[%s5028_s3 + $0x1f8] sm:$0xff]  }
  0x5b   : > { %2851 = vmatpush3.bf16.msra.mxu1 %v3314_v21  ;;  %v4307_v62 = vpack.c.bf16 %v561_v47, %v569_v34  ;;  %v553_v6 = vrot.slane %v4154_v13, 7  ;;  %2928 = vmatprep.subr.bf16.mxu0 %v3322_v16  ;;  %v3326_v34 = vld [vmem:[%s5028_s3 + $0x1b8] sm:$0xff]  }
  0x5c   : > { %v731_v21 = vsel %vm626_vm3, %v729_v29, %v730_v49  ;;  %v732_v47 = vsel %vm626_vm3, %v730_v49, %v729_v29  ;;  %v4326_v22 = vsel %vm4294_vm1, %v436_v43, 0.0  ;;  %3028 = vmatprep.subr.bf16.mxu1 %v3315_v24  ;;  %v4332_v13 = vsel %vm4294_vm1, %v437_v38, 0.0 }
  0x5d   : > { %v4328_v12 = vpack.c.bf16 %v732_v47, %v731_v21  ;;  %v539_v31 = vrot.slane %v4326_v22, 7  ;;  %2430 = vmatmul.mubr.msk.bf16.gmra.mrb[16].mxu0 %vm3779_vm14, %v4307_v62  ;;  %v547_v29 = vrot.slane %v4332_v13, 7  ;;  %v2498_v50 = vpack.c.bf16 %v437_v38, %v436_v43 }
  0x5e   : > { %2433 = vmatprep.mubr.msk.bf16.mxu0 %vm4312_vm8, %v4279_v33  ;;  %v562_v57 = vsel %vm555_vm5, %v545_v32, %v553_v6  ;;  %v570_v16 = vsel %vm555_vm5, %v553_v6, %v545_v32  ;;  %2929 = vmatpush3.bf16.msra.mxu0 %v3323_v42  ;;  %v5111_v6 = vmax.f32 %v4135_v1, 0.0  ;;  %v5112_v21 = vmax.f32 %v4138_v4, 0.0  ;;  %v3318_v1 = vld [vmem:[%s5028_s3 + $0x88] sm:$0xff]  }
  0x5f   : > { %3025 = vmatmul.mubr.msk.bf16.gmra.mrb[12].mxu1 %vm3791_vm15, %v4328_v12  ;;  %v556_v49 = vsel %vm555_vm5, %v539_v31, %v547_v29  ;;  %v564_v43 = vsel %vm555_vm5, %v547_v29, %v539_v31  ;;  %v4365_v38 = vpack.c.bf16 %v562_v57, %v570_v16  ;;  %2930 = vmatprep.subr.bf16.mxu0 %v3325_v8  ;;  %v546_v31 = vrot.slane %v4204_v51, 7 }
  0x60   : > { %2499 = vmatprep.mubr.msk.bf16.mxu1 %vm2497_vm4, %v2498_v50  ;;  %v4378_v47 = vpack.c.bf16 %v5112_v21, %v5111_v6  ;;  %v554_v42 = vrot.slane %v4210_v48, 7  ;;  %v2501_v29 = vpack.c.bf16 %v556_v49, %v564_v43  ;;  %v3321_v50 = vld [vmem:[%s5028_s3 + $0x90] sm:$0xff]   ;;  %v5113_v57 = vmax.f32 %v4230_v0, 0.0  ;;  %v4473_v43 = vld [vmem:[%s5028_s3 + $0x208] sm:$0xff]  }
  0x61   : > { %v5114_v16 = vmax.f32 %v4240_v44, 0.0  ;;  %v722_v49 = vrot.slane %v4288_v63, 7  ;;  %v3331_v63 = vld [vmem:[%s5028_s3 + $0xb0] sm:$0xff]   ;;  %v465_v21 = vadd.s32 9, %v3648_v15 }
  0x62   : > { %2931 = vmatpush3.bf16.msra.mxu0 %v3326_v34  ;;  %v563_v51 = vsel %vm555_vm5, %v546_v31, %v554_v42  ;;  %v571_v4 = vsel %vm555_vm5, %v554_v42, %v546_v31  ;;  %v2755_v34 = vunpack.c.h.bf16 %v2753_v55  ;;  %v3340_v31 = vld [vmem:[%s5027_s2] ss:$0 sm:$0xff] }
  0x63   : > { %3060 = vmatprep.subr.bf16.mxu0 %v4385_v41  ;;  %v4409_v48 = vpack.c.bf16 %v563_v51, %v571_v4  ;;  %v4418_v8 = vpack.c.bf16 %v5114_v16, %v5113_v57 }
  0x65   : > { %2436 = vmatmul.mubr.msk.bf16.gmra.mrb[20].mxu0 %vm3779_vm14, %v4365_v38 }
  0x66   : > { %2439 = vmatprep.mubr.msk.bf16.mxu0 %vm4370_vm12, %v4378_v47 }
  0x67   : > { %2502 = vmatmul.mubr.msk.bf16.vlgmr.msra.gmra.mrb[16].mxu1 %vm3779_vm14, %v2501_v29 }
  0x68   : > { %3029 = vmatpush3.bf16.msra.mxu1 %v3315_v24  ;;  %2505 = vmatprep.mubr.msk.bf16.mxu1 %vm2401_vm9, %v3774_v60  ;;  %v721_v24 = vrot.slane %v4268_v5, 7  ;;  %v3327_v5 = vld [vmem:[%s5028_s3 + $0xa0] sm:$0xff]   ;;  %vm475_vm9 = vcmp.ge.s32.totalorder %v465_v21, 0 }
  0x69   : > { %3030 = vmatprep.subr.bf16.mxu1 %v3318_v1 }
  0x6a   : > { %v723_v60 = vsel %vm555_vm5, %v721_v24, %v722_v49  ;;  %v724_v0 = vsel %vm555_vm5, %v722_v49, %v721_v24 }
  0x6b   : > { %v4447_v44 = vpack.c.bf16 %v723_v60, %v724_v0 }
  0x6c   : > { %3031 = vmatpush3.bf16.msra.mxu1 %v3318_v1 }
  0x6d   : > { %2442 = vmatmul.mubr.msk.bf16.gmra.mrb[24].mxu0 %vm3779_vm14, %v4409_v48  ;;  %3032 = vmatprep.subr.bf16.mxu1 %v3321_v50 }
  0x6e   : > { %2445 = vmatprep.mubr.msk.bf16.mxu0 %vm2443_vm7, %v4418_v8 }
  0x6f   : > { %2508 = vmatmul.mubr.msk.bf16.gmra.mrb[20].mxu1 %vm3779_vm14, %v3825_v20  ;;  %v3329_v20 = vld [vmem:[%s5028_s3 + $0xa8] sm:$0xff]  }
  0x70   : > { %2511 = vmatprep.mubr.msk.bf16.mxu1 %vm3832_vm0, %v3839_v28  ;;  %3033 = vmatpush3.bf16.msra.mxu1 %v3321_v50 }
  0x71   : > { %3034 = vmatprep.subr.bf16.mxu1 %v3324_v45 }
  0x74   : > { %3035 = vmatpush3.bf16.msra.mxu1 %v3324_v45 }
  0x75   : > { %2448 = vmatmul.mubr.msk.bf16.gmra.mrb[28].mxu0 %vm3779_vm14, %v4447_v44  ;;  %3036 = vmatprep.subr.bf16.mxu1 %v3327_v5 }
  0x76   : > { %2643 = vmatprep.mubr.msk.bf16.mxu0 %vm3832_vm0, %v3839_v28  ;;  %v4492_v28 = vld [vmem:[%s5028_s3 + $0x210] sm:$0xff]   ;;  %vm485_vm0 = vcmp.lt.s32.totalorder %v465_v21, 16 }
  0x77   : > { %2514 = vmatmul.mubr.msk.bf16.gmra.mrb[24].mxu1 %vm3779_vm14, %v3900_v61 }
  0x78   : > { %2517 = vmatprep.mubr.msk.bf16.mxu1 %vm3953_vm11, %v3966_v39  ;;  %3037 = vmatpush3.bf16.msra.mxu1 %v3327_v5 }
  0x79   : > { %3038 = vmatprep.subr.bf16.mxu1 %v3329_v20 }
  0x7c   : > { %3039 = vmatpush3.bf16.msra.mxu1 %v3329_v20 }
  0x7d   : > { %2646 = vmatmul.mubr.msk.bf16.vlgmr.msra.gmra.mrb[32].mxu0 %vm3779_vm14, %v3900_v61  ;;  %3040 = vmatprep.subr.bf16.mxu1 %v3331_v63  ;;  %v4502_v61 = vld [vmem:[%s5028_s3 + $0x218] sm:$0xff]  }
  0x7e   : > { %3061 = vmatpush3.bf16.msra.mxu0 %v4385_v41  ;;  %2649 = vmatprep.mubr.msk.bf16.mxu0 %vm3953_vm11, %v3966_v39  ;;  %v4529_v39 = vld [vmem:[%s5028_s3 + $0x228] sm:$0xff]   ;;  %vm4597_vm11 = vmand %vm475_vm9, %vm485_vm0 }
  0x7f   : > { %2520 = vmatmul.mubr.msk.bf16.gmra.mrb[28].mxu1 %vm3779_vm14, %v4048_v40  ;;  %3062 = vmatprep.subr.bf16.mxu0 %v4473_v43 }
  0x80   : > { %2523 = vmatprep.mubr.msk.bf16.mxu1 %vm4070_vm2, %v4087_v11  ;;  %3041 = vmatpush3.bf16.msra.mxu1 %v3331_v63 }
  0x81   : > { %3042 = vmatprep.subr.bf16.mxu1 %v3333_v23 }
  0x82   : > { %3063 = vmatpush3.bf16.msra.mxu0 %v4473_v43 }
  0x83   : > { %3064 = vmatprep.subr.bf16.mxu0 %v4492_v28 }
  0x84   : > { %3043 = vmatpush3.bf16.msra.mxu1 %v3333_v23 }
  0x85   : > { %2652 = vmatmul.mubr.msk.bf16.gmra.mrb[36].mxu0 %vm3779_vm14, %v4048_v40  ;;  %3092 = vmatprep.subr.bf16.mxu1 %v4385_v41  ;;  %v4545_v40 = vld [vmem:[%s5028_s3 + $0x230] sm:$0xff]  }
  0x86   : > { %2655 = vmatprep.mubr.msk.bf16.mxu0 %vm4070_vm2, %v4087_v11  ;;  %3065 = vmatpush3.bf16.msra.mxu0 %v4492_v28  ;;  %v618_v11 = vrot.slane %v4332_v13, 1  ;;  %v409_v13 = vmul.f32 %v3339_v59, %v2755_v34  ;;  %vm2683_vm2 = vmpackc.low %vm4597_vm11, %vm4597_vm11 }
  0x87   : > { %2526 = vmatmul.mubr.msk.bf16.gmra.mrb[32].mxu1 %vm3779_vm14, %v4172_v58  ;;  %3066 = vmatprep.subr.bf16.mxu0 %v4502_v61 }
  0x88   : > { %2529 = vmatprep.mubr.msk.bf16.mxu1 %vm4180_vm13, %v4194_v53  ;;  %v435_v29 = vadd.f32 %v3340_v31, %v409_v13 }
  0x8a   : > { %3067 = vmatpush3.bf16.msra.mxu0 %v4502_v61 }
  0x8b   : > { %3068 = vmatprep.subr.bf16.mxu0 %v4519_v30 }
  0x8d   : > { %2658 = vmatmul.mubr.msk.bf16.gmra.mrb[40].mxu0 %vm3779_vm14, %v4172_v58  ;;  %v610_v58 = vrot.slane %v4326_v22, 1 }
  0x8e   : > { %2661 = vmatprep.mubr.msk.bf16.mxu0 %vm4180_vm13, %v4194_v53  ;;  %3069 = vmatpush3.bf16.msra.mxu0 %v4519_v30  ;;  %v2754_v53 = vunpack.c.l.bf16 %v2753_v55 }
  0x8f   : > { %2532 = vmatmul.mubr.msk.bf16.gmra.mrb[36].mxu1 %vm3779_vm14, %v4307_v62  ;;  %3070 = vmatprep.subr.bf16.mxu0 %v4529_v39 }
  0x90   : > { %2535 = vmatprep.mubr.msk.bf16.mxu1 %vm4312_vm8, %v4279_v33  ;;  %v408_v22 = vmul.f32 %v3339_v59, %v2754_v53 }
  0x92   : > { %3071 = vmatpush3.bf16.msra.mxu0 %v4529_v39  ;;  %v434_v42 = vadd.f32 %v3340_v31, %v408_v22 }
  0x93   : > { %3072 = vmatprep.subr.bf16.mxu0 %v4545_v40 }
  0x94   : > { %v454_v15 = vmax.f32 %v434_v42, 0.0 }
  0x95   : > { %2664 = vmatmul.mubr.msk.bf16.gmra.mrb[44].mxu0 %vm3779_vm14, %v4307_v62  ;;  %v627_v62 = vsel %vm626_vm3, %v610_v58, %v618_v11 }
  0x96   : > { %2667 = vmatprep.mubr.msk.bf16.mxu0 %vm4312_vm8, %v4279_v33  ;;  %3073 = vmatpush3.bf16.msra.mxu0 %v4545_v40  ;;  %v635_v33 = vsel %vm626_vm3, %v618_v11, %v610_v58 }
  0x97   : > { %2538 = vmatmul.mubr.msk.bf16.gmra.mrb[40].mxu1 %vm3779_vm14, %v4365_v38  ;;  %3074 = vmatprep.subr.bf16.mxu0 %v4555_v37  ;;  %v2546_v6 = vpack.c.bf16 %v635_v33, %v627_v62 }
  0x98   : > { %2541 = vmatprep.mubr.msk.bf16.mxu1 %vm4370_vm12, %v4378_v47 }
  0x9a   : > { %3075 = vmatpush3.bf16.msra.mxu0 %v4555_v37 }
  0x9d   : > { %2670 = vmatmul.mubr.msk.bf16.gmra.mrb[48].mxu0 %vm3779_vm14, %v4365_v38  ;;  %v455_v38 = vmax.f32 %v435_v29, 0.0 }
  0x9e   : > { %2673 = vmatprep.mubr.msk.bf16.mxu0 %vm4370_vm12, %v4378_v47  ;;  %v534_v47 = vsel %vm4597_vm11, %v454_v15, 0.0 }
  0x9f   : > { %2544 = vmatmul.mubr.msk.bf16.gmra.mrb[44].mxu1 %vm3779_vm14, %v4409_v48  ;;  %v535_v1 = vsel %vm4597_vm11, %v455_v38, 0.0  ;;  %v1461_v54 = vrot.slane %v534_v47, 7  ;;  %v2684_v4 = vpack.c.bf16 %v455_v38, %v454_v15  ;;  %v1469_v2 = vrot.slane %v534_v47, 1 }
  0xa0   : > { %3044 = vmatprep.mubr.msk.bf16.mxu1 %vm3791_vm15, %v2546_v6  ;;  %v1462_v51 = vrot.slane %v535_v1, 7 }
  0xa5   : > { %2676 = vmatmul.mubr.msk.bf16.gmra.mrb[52].mxu0 %vm3779_vm14, %v4409_v48 }
  0xa6   : > { %2679 = vmatprep.mubr.msk.bf16.mxu0 %vm2443_vm7, %v4418_v8 }
  0xa7   : > { %3045 = vmatmul.mubr.msk.bf16.vlgmr.msra.gmra.mrb[0].mxu1 %vm3791_vm15, %v3823_v19  ;;  %v1463_v19 = vsel %vm555_vm5, %v1461_v54, %v1462_v51 }
  0xa8   : > { %3100 = vmatpush3.bf16.msra.mxu1 %v4385_v41  ;;  %3048 = vmatprep.mubr.msk.bf16.mxu1 %vm3791_vm15, %v3866_v46  ;;  %v1464_v41 = vsel %vm555_vm5, %v1462_v51, %v1461_v54 }
  0xa9   : > { %3093 = vmatprep.subr.bf16.mxu1 %v4473_v43  ;;  %v2687_v48 = vpack.c.bf16 %v1463_v19, %v1464_v41 }
  0xac   : > { %3101 = vmatpush3.bf16.msra.mxu1 %v4473_v43 }
  0xad   : > { %3094 = vmatprep.subr.bf16.mxu1 %v4492_v28  ;;  %2682 = vmatmul.mubr.msk.bf16.gmra.mrb[56].mxu0 %vm3779_vm14, %v4447_v44 }
  0xae   : > { %2685 = vmatprep.mubr.msk.bf16.mxu0 %vm2683_vm2, %v2684_v4 }
  0xaf   : > { %3049 = vmatmul.mubr.msk.bf16.gmra.mrb[4].mxu1 %vm3791_vm15, %v4007_v56 }
  0xb0   : > { %3102 = vmatpush3.bf16.msra.mxu1 %v4492_v28  ;;  %3052 = vmatprep.mubr.msk.bf16.mxu1 %vm3791_vm15, %v4020_v10 }
  0xb1   : > { %3095 = vmatprep.subr.bf16.mxu1 %v4502_v61 }
  0xb4   : > { %3103 = vmatpush3.bf16.msra.mxu1 %v4502_v61 }
  0xb5   : > { %3096 = vmatprep.subr.bf16.mxu1 %v4519_v30  ;;  %2688 = vmatmul.mubr.msk.bf16.gmra.mrb[60].mxu0 %vm3779_vm14, %v2687_v48 }
  0xb6   : > { %3076 = vmatprep.mubr.msk.bf16.mxu0 %vm3791_vm15, %v3866_v46  ;;  %v1470_v46 = vrot.slane %v535_v1, 1 }
  0xb7   : > { %3053 = vmatmul.mubr.msk.bf16.gmra.mrb[8].mxu1 %vm3791_vm15, %v4107_v25 }
  0xb8   : > { %3104 = vmatpush3.bf16.msra.mxu1 %v4519_v30  ;;  %3056 = vmatprep.mubr.msk.bf16.mxu1 %vm3791_vm15, %v4215_v52 }
  0xb9   : > { %3097 = vmatprep.subr.bf16.mxu1 %v4529_v39 }
  0xbc   : > { %3105 = vmatpush3.bf16.msra.mxu1 %v4529_v39 }
  0xbd   : > { %3098 = vmatprep.subr.bf16.mxu1 %v4545_v40  ;;  %3077 = vmatmul.mubr.msk.bf16.vlgmr.msra.gmra.mrb[64].mxu0 %vm3791_vm15, %v4007_v56  ;;  %v1471_v56 = vsel %vm626_vm3, %v1469_v2, %v1470_v46 }
  0xbe   : > { %3080 = vmatprep.mubr.msk.bf16.mxu0 %vm3791_vm15, %v4020_v10  ;;  %v1472_v10 = vsel %vm626_vm3, %v1470_v46, %v1469_v2 }
  0xbf   : > { %3057 = vmatmul.mubr.msk.bf16.gmra.mrb[12].mxu1 %vm3791_vm15, %v4249_v9 }
  0xc0   : > { %3106 = vmatpush3.bf16.msra.mxu1 %v4545_v40  ;;  %3084 = vmatprep.mubr.msk.bf16.mxu1 %vm3791_vm15, %v4215_v52  ;;  %v2711_v52 = vpack.c.bf16 %v1472_v10, %v1471_v56 }
  0xc1   : > { %3099 = vmatprep.subr.bf16.mxu1 %v4555_v37 }
  0xc4   : > { %3107 = vmatpush3.bf16.msra.mxu1 %v4555_v37 }
  0xc5   : > { %3081 = vmatmul.mubr.msk.bf16.gmra.mrb[68].mxu0 %vm3791_vm15, %v4107_v25 }
  0xc7   : > { %3085 = vmatmul.mubr.msk.bf16.vlgmr.msra.gmra.mrb[8].mxu1 %vm3791_vm15, %v4249_v9 }
  0xc8   : > { %3088 = vmatprep.mubr.msk.bf16.mxu1 %vm3791_vm15, %v4328_v12 }
  0xcf   : > { %3089 = vmatmul.mubr.msk.bf16.gmra.mrb[12].mxu1 %vm3791_vm15, %v2711_v52 }
 0x110   : > { %v2772_v50 = vpop.f32.mrb[0].mxu0 }
 0x111   : > { %v2773_v25 = vpop.f32.mrb[1].mxu0 }
 0x112   : > { %v2774_v57 = vadd.f32 %v2773_v25, %v2772_v50  ;;  %v2775_v16 = vpop.f32.mrb[2].mxu0 }
 0x113   : > { %v2776_v8 = vpop.f32.mrb[3].mxu0 }
 0x114   : > { %v2777_v9 = vadd.f32 %v2776_v8, %v2775_v16 }
 0x118   : > { %v2778_v24 = vpop.f32.mrb[4].mxu0 }
 0x119   : > { %v2779_v49 = vpop.f32.mrb[5].mxu0 }
 0x11a   : > { %v2780_v45 = vadd.f32 %v2779_v49, %v2778_v24  ;;  %v2781_v12 = vpop.f32.mrb[6].mxu0 }
 0x11b   : > { %v2782_v60 = vpop.f32.mrb[7].mxu0 }
 0x11c   : > { %v2783_v0 = vadd.f32 %v2782_v60, %v2781_v12 }
 0x120   : > { %v2784_v44 = vpop.f32.mrb[8].mxu0 }
 0x121   : > { %v2785_v5 = vpop.f32.mrb[9].mxu0 }
 0x122   : > { %v2786_v20 = vadd.f32 %v2785_v5, %v2784_v44  ;;  %v2787_v63 = vpop.f32.mrb[10].mxu0 }
 0x123   : > { %v2788_v43 = vpop.f32.mrb[11].mxu0 }
 0x124   : > { %v2789_v23 = vadd.f32 %v2788_v43, %v2787_v63 }
 0x128   : > { %v2790_v3 = vpop.f32.mrb[12].mxu0 }
 0x129   : > { %v2791_v28 = vpop.f32.mrb[13].mxu0 }
 0x12a   : > { %v4689_v61 = vadd.f32 %v2791_v28, %v2790_v3  ;;  %v2793_v30 = vpop.f32.mrb[14].mxu0 }
 0x12b   : > { %v2794_v39 = vpop.f32.mrb[15].mxu0 }
 0x12c   : > { %v4691_v40 = vadd.f32 %v2794_v39, %v2793_v30 }
 0x130   : > { %v2796_v37 = vpop.f32.mrb[16].mxu0 }
 0x131   : > { %v2797_v55 = vpop.f32.mrb[17].mxu0 }
 0x132   : > { %v4693_v58 = vadd.f32 %v2797_v55, %v2796_v37  ;;  %v2799_v11 = vpop.f32.mrb[18].mxu0 }
 0x133   : > { %v2800_v53 = vpop.f32.mrb[19].mxu0 }
 0x134   : > { %v4695_v34 = vadd.f32 %v2800_v53, %v2799_v11 }
 0x138   : > { %v2802_v62 = vpop.f32.mrb[20].mxu0 }
 0x139   : > { %v2803_v33 = vpop.f32.mrb[21].mxu0 }
 0x13a   : > { %v2852_v59 = vpop.f32.mrb[16].mxu1  ;;  %v4697_v22 = vadd.f32 %v2803_v33, %v2802_v62  ;;  %v2805_v13 = vpop.f32.mrb[22].mxu0 }
 0x13b   : > { %v2853_v6 = vpop.f32.mrb[17].mxu1  ;;  %v2806_v21 = vpop.f32.mrb[23].mxu0 }
 0x13c   : > { %v2854_v31 = vadd.f32 %v2853_v6, %v2852_v59  ;;  %v2855_v42 = vpop.f32.mrb[18].mxu1  ;;  %v4699_v29 = vadd.f32 %v2806_v21, %v2805_v13 }
 0x13d   : > { %v2856_v15 = vpop.f32.mrb[19].mxu1 }
 0x13e   : > { %v2857_v38 = vadd.f32 %v2856_v15, %v2855_v42  ;;  %v4701_v32 = vadd.f32 %v2854_v31, %v2774_v57 }
 0x140   : > { %v2808_v47 = vpop.f32.mrb[24].mxu0  ;;  %v4703_v1 = vadd.f32 %v2857_v38, %v2777_v9 }
 0x141   : > { %v2809_v54 = vpop.f32.mrb[25].mxu0 }
 0x142   : > { %v2858_v51 = vpop.f32.mrb[20].mxu1  ;;  %v4705_v4 = vadd.f32 %v2809_v54, %v2808_v47  ;;  %v2811_v19 = vpop.f32.mrb[26].mxu0 }
 0x143   : > { %v2859_v41 = vpop.f32.mrb[21].mxu1  ;;  %v2812_v48 = vpop.f32.mrb[27].mxu0 }
 0x144   : > { %v2860_v2 = vadd.f32 %v2859_v41, %v2858_v51  ;;  %v2861_v46 = vpop.f32.mrb[22].mxu1  ;;  %v4707_v56 = vadd.f32 %v2812_v48, %v2811_v19 }
 0x145   : > { %v2862_v10 = vpop.f32.mrb[23].mxu1 }
 0x146   : > { %v2863_v52 = vadd.f32 %v2862_v10, %v2861_v46  ;;  %v4709_v50 = vadd.f32 %v2860_v2, %v2780_v45 }
 0x148   : > { %v2814_v25 = vpop.f32.mrb[28].mxu0  ;;  %v4711_v57 = vadd.f32 %v2863_v52, %v2783_v0 }
 0x149   : > { %v2815_v16 = vpop.f32.mrb[29].mxu0 }
 0x14a   : > { %v2864_v8 = vpop.f32.mrb[24].mxu1  ;;  %v4713_v9 = vadd.f32 %v2815_v16, %v2814_v25  ;;  %v2817_v24 = vpop.f32.mrb[30].mxu0 }
 0x14b   : > { %v2865_v49 = vpop.f32.mrb[25].mxu1  ;;  %v2818_v12 = vpop.f32.mrb[31].mxu0 }
 0x14c   : > { %v2866_v60 = vadd.f32 %v2865_v49, %v2864_v8  ;;  %v2867_v44 = vpop.f32.mrb[26].mxu1  ;;  %v4715_v5 = vadd.f32 %v2818_v12, %v2817_v24 }
 0x14d   : > { %v2868_v63 = vpop.f32.mrb[27].mxu1 }
 0x14e   : > { %v2869_v43 = vadd.f32 %v2868_v63, %v2867_v44  ;;  %v4717_v3 = vadd.f32 %v2866_v60, %v2786_v20 }
 0x150   : > { %v2932_v45 = vpop.f32.mrb[32].mxu0  ;;  %v4719_v28 = vadd.f32 %v2869_v43, %v2789_v23 }
 0x151   : > { %v2933_v0 = vpop.f32.mrb[33].mxu0 }
 0x152   : > { %v2870_v30 = vpop.f32.mrb[28].mxu1  ;;  %v4721_v39 = vadd.f32 %v2933_v0, %v2932_v45  ;;  %v2935_v37 = vpop.f32.mrb[34].mxu0 }
 0x153   : > { %v2871_v55 = vpop.f32.mrb[29].mxu1  ;;  %v2936_v11 = vpop.f32.mrb[35].mxu0 }
 0x154   : > { %v2872_v53 = vadd.f32 %v2871_v55, %v2870_v30  ;;  %v2873_v62 = vpop.f32.mrb[30].mxu1  ;;  %v4723_v33 = vadd.f32 %v2936_v11, %v2935_v37 }
 0x155   : > { %v2874_v59 = vpop.f32.mrb[31].mxu1 }
 0x156   : > { %v2875_v13 = vadd.f32 %v2874_v59, %v2873_v62  ;;  %v4726_v6 = vadd.f32 %v2872_v53, %v4689_v61 }
 0x158   : > { %v2938_v20 = vpop.f32.mrb[36].mxu0  ;;  %v4729_v23 = vadd.f32 %v2875_v13, %v4691_v40 }
 0x159   : > { %v2939_v21 = vpop.f32.mrb[37].mxu0 }
 0x15a   : > { %v2876_v31 = vpop.f32.mrb[32].mxu1  ;;  %v4731_v42 = vadd.f32 %v2939_v21, %v2938_v20  ;;  %v2941_v15 = vpop.f32.mrb[38].mxu0 }
 0x15b   : > { %v2877_v38 = vpop.f32.mrb[33].mxu1  ;;  %v2942_v47 = vpop.f32.mrb[39].mxu0 }
 0x15c   : > { %v2878_v54 = vadd.f32 %v2877_v38, %v2876_v31  ;;  %v2879_v51 = vpop.f32.mrb[34].mxu1  ;;  %v4733_v19 = vadd.f32 %v2942_v47, %v2941_v15 }
 0x15d   : > { %v2880_v41 = vpop.f32.mrb[35].mxu1 }
 0x15e   : > { %v3143_v48 = vadd.f32 %v2878_v54, %v4693_v58  ;;  %v2881_v61 = vadd.f32 %v2880_v41, %v2879_v51 }
 0x160   : > { %v3149_v2 = vadd.f32 %v2881_v61, %v4695_v34  ;;  %v2944_v46 = vpop.f32.mrb[40].mxu0 }
 0x161   : > { %v2945_v40 = vpop.f32.mrb[41].mxu0 }
 0x162   : > { %v2882_v10 = vpop.f32.mrb[36].mxu1  ;;  %v4737_v52 = vadd.f32 %v2945_v40, %v2944_v46  ;;  %v2947_v25 = vpop.f32.mrb[42].mxu0 }
 0x163   : > { %v2883_v16 = vpop.f32.mrb[37].mxu1  ;;  %v2948_v8 = vpop.f32.mrb[43].mxu0 }
 0x164   : > { %v2884_v24 = vadd.f32 %v2883_v16, %v2882_v10  ;;  %v2885_v49 = vpop.f32.mrb[38].mxu1  ;;  %v4739_v12 = vadd.f32 %v2948_v8, %v2947_v25 }
 0x165   : > { %v2886_v60 = vpop.f32.mrb[39].mxu1 }
 0x166   : > { %v3140_v44 = vadd.f32 %v2884_v24, %v4697_v22  ;;  %v2887_v63 = vadd.f32 %v2886_v60, %v2885_v49 }
 0x168   : > { %v3146_v58 = vadd.f32 %v2887_v63, %v4699_v29  ;;  %v2950_v43 = vpop.f32.mrb[44].mxu0 }
 0x169   : > { %v2951_v34 = vpop.f32.mrb[45].mxu0 }
 0x16a   : > { %v2888_v45 = vpop.f32.mrb[40].mxu1  ;;  %v2952_v0 = vadd.f32 %v2951_v34, %v2950_v43  ;;  %v2953_v30 = vpop.f32.mrb[46].mxu0 }
 0x16b   : > { %v2889_v37 = vpop.f32.mrb[41].mxu1  ;;  %v2954_v55 = vpop.f32.mrb[47].mxu0 }
 0x16c   : > { %v2890_v11 = vadd.f32 %v2889_v37, %v2888_v45  ;;  %v2891_v53 = vpop.f32.mrb[42].mxu1  ;;  %v2955_v62 = vadd.f32 %v2954_v55, %v2953_v30 }
 0x16d   : > { %v2892_v59 = vpop.f32.mrb[43].mxu1 }
 0x16e   : > { %v3155_v13 = vadd.f32 %v2890_v11, %v4705_v4  ;;  %v2893_v20 = vadd.f32 %v2892_v59, %v2891_v53 }
 0x170   : > { %v3161_v21 = vadd.f32 %v2893_v20, %v4707_v56  ;;  %v2956_v22 = vpop.f32.mrb[48].mxu0 }
 0x171   : > { %v2957_v31 = vpop.f32.mrb[49].mxu0 }
 0x172   : > { %v2894_v15 = vpop.f32.mrb[44].mxu1  ;;  %v2958_v29 = vadd.f32 %v2957_v31, %v2956_v22  ;;  %v2959_v38 = vpop.f32.mrb[50].mxu0 }
 0x173   : > { %v2895_v47 = vpop.f32.mrb[45].mxu1  ;;  %v2960_v54 = vpop.f32.mrb[51].mxu0 }
 0x174   : > { %v2896_v51 = vadd.f32 %v2895_v47, %v2894_v15  ;;  %v2897_v41 = vpop.f32.mrb[46].mxu1  ;;  %v2961_v61 = vadd.f32 %v2960_v54, %v2959_v38  ;;  %v4745_v46 = vadd.f32 %v3143_v48, %v2958_v29 }
 0x175   : > { %v2898_v40 = vpop.f32.mrb[47].mxu1 }
 0x176   : > { %v3152_v10 = vadd.f32 %v2896_v51, %v4713_v9  ;;  %v2899_v25 = vadd.f32 %v2898_v40, %v2897_v41  ;;  %v4748_v4 = vadd.f32 %v3149_v2, %v2961_v61 }
 0x178   : > { %v3158_v56 = vadd.f32 %v2899_v25, %v4715_v5  ;;  %v2962_v16 = vpop.f32.mrb[52].mxu0 }
 0x179   : > { %v2963_v8 = vpop.f32.mrb[53].mxu0 }
 0x17a   : > { %v3046_v24 = vpop.f32.mrb[0].mxu1  ;;  %v2964_v49 = vadd.f32 %v2963_v8, %v2962_v16  ;;  %v2965_v60 = vpop.f32.mrb[54].mxu0 }
 0x17b   : > { %v3109_v63 = vadd.f32 %v4709_v50, %v3046_v24  ;;  %v1398_v43 = vpop.f32.mrb[1].mxu1  ;;  %v2966_v34 = vpop.f32.mrb[55].mxu0 }
 0x17c   : > { %v3113_v48 = vadd.f32 %v4701_v32, %v1398_v43  ;;  %v3047_v45 = vpop.f32.mrb[2].mxu1  ;;  %v2967_v30 = vadd.f32 %v2966_v34, %v2965_v60  ;;  %v3141_v37 = vadd.f32 %v3140_v44, %v2964_v49 }
 0x17d   : > { %v3117_v9 = vadd.f32 %v4711_v57, %v3047_v45  ;;  %v1401_v2 = vpop.f32.mrb[3].mxu1  ;;  %v3110_v55 = vadd.f32 %v3109_v63, %v4731_v42 }
 0x17e   : > { %v3121_v5 = vadd.f32 %v4703_v1, %v1401_v2  ;;  %v3114_v11 = vadd.f32 %v3113_v48, %v4721_v39  ;;  %v3147_v53 = vadd.f32 %v3146_v58, %v2967_v30 }
 0x17f   : > { %v3118_v59 = vadd.f32 %v3117_v9, %v4733_v19 }
 0x180   : > { %v2968_v50 = vpop.f32.mrb[56].mxu0  ;;  %v3122_v20 = vadd.f32 %v3121_v5, %v4723_v33 }
 0x181   : > { %v2969_v22 = vpop.f32.mrb[57].mxu0 }
 0x182   : > { %v3050_v32 = vpop.f32.mrb[4].mxu1  ;;  %v2970_v31 = vadd.f32 %v2969_v22, %v2968_v50  ;;  %v2971_v15 = vpop.f32.mrb[58].mxu0 }
 0x183   : > { %v3125_v44 = vadd.f32 %v4726_v6, %v3050_v32  ;;  %v1414_v57 = vpop.f32.mrb[5].mxu1  ;;  %v2972_v29 = vpop.f32.mrb[59].mxu0 }
 0x184   : > { %v3129_v42 = vadd.f32 %v4717_v3, %v1414_v57  ;;  %v3051_v38 = vpop.f32.mrb[6].mxu1  ;;  %v2973_v1 = vadd.f32 %v2972_v29, %v2971_v15  ;;  %v3156_v47 = vadd.f32 %v3155_v13, %v2970_v31 }
 0x185   : > { %v3133_v39 = vadd.f32 %v4729_v23, %v3051_v38  ;;  %v1417_v58 = vpop.f32.mrb[7].mxu1  ;;  %v3126_v19 = vadd.f32 %v3125_v44, %v2952_v0  ;;  %v2713_v23 = vld [vmem:[%s5029_s4] ss:$0 sm:$0xff] }
 0x186   : > { %v3137_v54 = vadd.f32 %v4719_v28, %v1417_v58  ;;  %v3130_v33 = vadd.f32 %v3129_v42, %v4737_v52  ;;  %v3162_v51 = vadd.f32 %v3161_v21, %v2973_v1 }
 0x187   : > { %v3134_v41 = vadd.f32 %v3133_v39, %v2955_v62 }
 0x188   : > { %v2974_v61 = vpop.f32.mrb[60].mxu0  ;;  %v3138_v6 = vadd.f32 %v3137_v54, %v4739_v12 }
 0x189   : > { %v2975_v40 = vpop.f32.mrb[61].mxu0 }
 0x18a   : > { %v2976_v25 = vadd.f32 %v2975_v40, %v2974_v61  ;;  %v2977_v16 = vpop.f32.mrb[62].mxu0 }
 0x18b   : > { %v2978_v3 = vpop.f32.mrb[63].mxu0 }
 0x18c   : > { %v2979_v8 = vadd.f32 %v2978_v3, %v2977_v16  ;;  %v3153_v24 = vadd.f32 %v3152_v10, %v2976_v25 }
 0x18e   : > { %v3159_v13 = vadd.f32 %v3158_v56, %v2979_v8 }
 0x190   : > { %v3078_v49 = vpop.f32.mrb[64].mxu0 }
 0x191   : > { %v3111_v28 = vadd.f32 %v3110_v55, %v3078_v49  ;;  %v1800_v0 = vpop.f32.mrb[65].mxu0 }
 0x192   : > { %v3115_v52 = vadd.f32 %v3114_v11, %v1800_v0  ;;  %v3079_v21 = vpop.f32.mrb[66].mxu0 }
 0x193   : > { %v4768_v62 = vadd.f32 %v3111_v28, %v2713_v23  ;;  %v3119_v60 = vadd.f32 %v3118_v59, %v3079_v21  ;;  %v1803_v12 = vpop.f32.mrb[67].mxu0 }
 0x194   : > { %v4770_v63 = vadd.f32 %v3115_v52, %v2713_v23  ;;  %v3123_v43 = vadd.f32 %v3122_v20, %v1803_v12 }
 0x195   : > { %v4772_v34 = vadd.f32 %v3119_v60, %v2713_v23 }
 0x196   : > { %v4774_v10 = vadd.f32 %v3123_v43, %v2713_v23 }
 0x198   : > { %v3082_v56 = vpop.f32.mrb[68].mxu0 }
 0x199   : > { %v3127_v48 = vadd.f32 %v3126_v19, %v3082_v56  ;;  %v1816_v45 = vpop.f32.mrb[69].mxu0 }
 0x19a   : > { %v3086_v30 = vpop.f32.mrb[8].mxu1  ;;  %v3131_v9 = vadd.f32 %v3130_v33, %v1816_v45  ;;  %v3083_v2 = vpop.f32.mrb[70].mxu0 }
 0x19b   : > { %v3142_v55 = vadd.f32 %v3141_v37, %v3086_v30  ;;  %v1832_v5 = vpop.f32.mrb[9].mxu1  ;;  %v4776_v11 = vadd.f32 %v3127_v48, %v2713_v23  ;;  %v3135_v50 = vadd.f32 %v3134_v41, %v3083_v2  ;;  %v1819_v59 = vpop.f32.mrb[71].mxu0 }
 0x19c   : > { %v3145_v22 = vadd.f32 %v4745_v46, %v1832_v5  ;;  %v3087_v32 = vpop.f32.mrb[10].mxu1  ;;  %v4779_v20 = vadd.f32 %v3131_v9, %v2713_v23  ;;  %v3139_v31 = vadd.f32 %v3138_v6, %v1819_v59 }
 0x19d   : > { %v4781_v15 = vadd.f32 %v3142_v55, %v2713_v23  ;;  %v3148_v44 = vadd.f32 %v3147_v53, %v3087_v32  ;;  %v1835_v57 = vpop.f32.mrb[11].mxu1  ;;  %v4783_v29 = vadd.f32 %v3135_v50, %v2713_v23 }
 0x19e   : > { %v4785_v42 = vadd.f32 %v3145_v22, %v2713_v23  ;;  %v3151_v37 = vadd.f32 %v4748_v4, %v1835_v57  ;;  %v4788_v38 = vadd.f32 %v3139_v31, %v2713_v23 }
 0x19f   : > { %v4790_v1 = vadd.f32 %v3148_v44, %v2713_v23 }
 0x1a0   : > { %v4792_v46 = vadd.f32 %v3151_v37, %v2713_v23 }
 0x1a2   : > { %v3090_v39 = vpop.f32.mrb[12].mxu1  ;;  %1905 = sbr.rel (%p2714_p2) target bundleno = 425 (0x1a9), region = 44 }
 0x1a3   : > { %v3154_v58 = vadd.f32 %v3153_v24, %v3090_v39  ;;  %v1848_v19 = vpop.f32.mrb[13].mxu1 }
 0x1a4   : > { %v3157_v54 = vadd.f32 %v3156_v47, %v1848_v19  ;;  %v3091_v53 = vpop.f32.mrb[14].mxu1  ;;  %v3470_v47 = vmov (!%p2714_p2), 0.0  }
 0x1a5   : > { %v4794_v33 = vadd.f32 %v3154_v58, %v2713_v23  ;;  %v3160_v41 = vadd.f32 %v3159_v13, %v3091_v53  ;;  %v1851_v61 = vpop.f32.mrb[15].mxu1  ;;  %1906 = vst [vmem:[%s4803_s11] sm:$0x1] (!%p2714_p2), %v3470_v47  ;;  %1907 = vst [vmem:[%s4806_s17] sm:$0x1] (!%p2714_p2), %v3470_v47 }
 0x1a6   : > { %v4796_v6 = vadd.f32 %v3157_v54, %v2713_v23  ;;  %v3163_v4 = vadd.f32 %v3162_v51, %v1851_v61 }
 0x1a7   : > { %v4798_v40 = vadd.f32 %v3160_v41, %v2713_v23 }
 0x1a8   : > { %v4800_v25 = vadd.f32 %v3163_v4, %v2713_v23 }
 0x1a9 PF: > { %v1909_v51 = vadd.f32 %v4774_v10, %v4770_v63  ;;  %v1933_v16 = vmul.f32 %v4770_v63, %v4770_v63  ;;  %v1934_v3 = vmul.f32 %v4774_v10, %v4774_v10  ;;  %v1935_v24 = vmul.f32 %v4768_v62, %v4768_v62  ;;  %v5122_v39 = vld [vmem:[#allocation17_spill] sm:$0xff]  ;;  %v5124_v54 = vld [vmem:[#allocation19_spill] sm:$0xff]  ;;  %v5125_v61 = vld [vmem:[#allocation22_spill] sm:$0xff]  ;;  %s2739_s27 = sshll.u32 %s3455_s28, 4  ;;  %s2166_s16 = sshll.u32 %s4806_s17, 4  ;;  %s4972_s16 = int_to_ptr.vmem [resolvable:$true] %s2166_s16 }
 0x1aa   : > { %v1936_v13 = vmul.f32 %v4772_v34, %v4772_v34  ;;  %v1937_v49 = vmul.f32 %v4779_v20, %v4779_v20  ;;  %v1938_v23 = vmul.f32 %v4788_v38, %v4788_v38  ;;  %v1939_v0 = vmul.f32 %v4776_v11, %v4776_v11  ;;  %v5126_v4 = vld [vmem:[#allocation21_spill] sm:$0xff]  ;;  %s4934_s12 = scalar_lea.hbm %s5031_s6, %s2739_s27  ;;  %s2133_s20 = scalar_lea.sflag [#allocation3], %s3584_s18 }
 0x1ab   : > { %v1910_v8 = vadd.f32 %v1909_v51, %v4768_v62  ;;  %v1940_v52 = vmul.f32 %v4783_v29, %v4783_v29  ;;  %v1949_v21 = vadd.f32 %v1934_v3, %v1933_v16  ;;  %v1941_v60 = vmul.f32 %v4785_v42, %v4785_v42  ;;  %s3472_s23 = smov [#allocation2]  }
 0x1ac   : > { %v4835_v12 = vmul.f32 %v4792_v46, %v4792_v46  ;;  %v4839_v43 = vmul.f32 %v4781_v15, %v4781_v15  ;;  %v5117_v56 = vlaneseq  ;;  %v4845_v30 = vmul.f32 %v4790_v1, %v4790_v1  ;;  %s3345_s19 = sshll.u32 %s3472_s23, 4  ;;  %s3346_s19 = int_to_ptr.vmem [resolvable:$false] %s3345_s19 }
 0x1ad   : > { %v1911_v28 = vadd.f32 %v1910_v8, %v4772_v34  ;;  %v1950_v9 = vadd.f32 %v1949_v21, %v1935_v24  ;;  %v1977_v2 = vpack.c.bf16 %v4774_v10, %v4770_v63  ;;  %v1991_v55 = vsub.s32 0, %v3658_v18  ;;  %s3347_s30 = scalar_lea.vmem %s3346_s19, 32 }
 0x1ae   : > { %v1973_v48 = vand.u32 127, %v5117_v56  ;;  %v2715_v59 = vcombine.low %v3689_v26, %v3692_v27  ;;  %v1978_v22 = vpack.c.bf16 %v4772_v34, %v4768_v62  ;;  %v2716_v32 = vcombine.low %v3716_v35, %v3719_v36  ;;  %v5118_v62 = vld [vmem:[#allocation14_spill] sm:$0xff]  ;;  %v5119_v36 = vld [vmem:[#allocation16_spill] sm:$0xff] }
 0x1af   : > { %v1912_v45 = vadd.f32 %v1911_v28, %v4779_v20  ;;  %v1951_v50 = vadd.f32 %v1950_v9, %v1936_v13  ;;  %v1979_v63 = vpack.c.bf16 %v4788_v38, %v4779_v20  ;;  %v2717_v18 = vcombine.low %v3801_v7, %v3815_v14  ;;  %v5120_v20 = vld [vmem:[#allocation15_spill] sm:$0xff] }
 0x1b0   : > { %vm1974_vm3 = vcmp.ge.s32.totalorder %v1973_v48, 8  ;;  %vm1975_vm5 = vcmp.lt.s32.totalorder %v1973_v48, 12  ;;  %v1980_v10 = vpack.c.bf16 %v4783_v29, %v4776_v11  ;;  %v3471_v26 = vmov 0  }
 0x1b1   : > { %v1913_v5 = vadd.f32 %v1912_v45, %v4788_v38  ;;  %vm1976_vm14 = vmand %vm1974_vm3, %vm1975_vm5  ;;  %v1952_v44 = vadd.f32 %v1951_v50, %v1937_v49  ;;  %v2718_v34 = vcombine.low %v5118_v62, %v3821_v17  ;;  %v1981_v35 = vpack.c.bf16 %v4792_v46, %v4785_v42  ;;  %v5123_v17 = vld [vmem:[#allocation20_spill] sm:$0xff] }
 0x1b2   : > { %vm1987_vm15 = vmpackc.low %vm1976_vm14, %vm1976_vm14  ;;  %v2719_v37 = vcombine.low %v5120_v20, %v5119_v36  ;;  %v1982_v7 = vpack.c.bf16 %v4790_v1, %v4781_v15  ;;  %v1983_v19 = vpack.c.bf16 %v4800_v25, %v4796_v6  ;;  %v2721_v53 = vcombine.low %v5124_v54, %v5123_v17 }
 0x1b3   : > { %v1914_v31 = vadd.f32 %v1913_v5, %v4776_v11  ;;  %v1988_v27 = vsel %vm1987_vm15, 65537, %v3471_v26  ;;  %v1953_v38 = vadd.f32 %v1952_v44, %v1938_v23  ;;  %v5121_v11 = vld [vmem:[#allocation18_spill] sm:$0xff]  ;;  %v1984_v41 = vpack.c.bf16 %v4798_v40, %v4794_v33 }
 0x1b4   : > { %v1992_v57 = vrot.slane %v1988_v27, %v1991_v55  ;;  %v2720_v58 = vcombine.low %v5122_v39, %v5121_v11  ;;  %v1946_v27 = vmul.f32 %v4800_v25, %v4800_v25 }
 0x1b5   : > { %v1915_v14 = vadd.f32 %v1914_v31, %v4783_v29  ;;  %v2722_v29 = vcombine.low %v5126_v4, %v5125_v61  ;;  %v1954_v51 = vadd.f32 %v1953_v38, %v1939_v0 }
 0x1b6   : > { %vm1993_vm10 = vcmp.ne.s16.totalorder %v1992_v57, 0  ;;  %v1947_v57 = vmul.f32 %v4794_v33, %v4794_v33 }
 0x1b7   : > { %v1916_v47 = vadd.f32 %v1915_v14, %v4785_v42  ;;  %v2042_v16 = vsel %vm1993_vm10, %v1977_v2, %v2715_v59  ;;  %v2043_v3 = vsel %vm1993_vm10, %v1978_v22, %v2716_v32  ;;  %v1955_v28 = vadd.f32 %v1954_v51, %v1940_v52 }
 0x1b8   : > { %v2723_v8 = vcombine.low %v2042_v16, %v2042_v16  ;;  %v2724_v24 = vcombine.high %v2042_v16, %v2042_v16  ;;  %v2725_v13 = vcombine.low %v2043_v3, %v2043_v3  ;;  %v2726_v49 = vcombine.high %v2043_v3, %v2043_v3 }
 0x1b9   : > { %v1917_v23 = vadd.f32 %v1916_v47, %v4792_v46  ;;  %v2044_v21 = vsel %vm1993_vm10, %v1979_v63, %v2717_v18  ;;  %v2045_v56 = vsel %vm1993_vm10, %v1980_v10, %v2718_v34  ;;  %v1956_v46 = vadd.f32 %v1955_v28, %v1941_v60 }
 0x1ba   : > { %2106 = vst [vmem:[%s3641_s29] sm:$0xf] %v2723_v8  ;;  %2107 = vst [vmem:[%s3641_s29 + $0x4] sm:$0xf] %v2724_v24  ;;  %v2727_v42 = vcombine.low %v2044_v21, %v2044_v21  ;;  %v2728_v0 = vcombine.high %v2044_v21, %v2044_v21  ;;  %v2729_v48 = vcombine.low %v2045_v56, %v2045_v56 }
 0x1bb   : > { %2108 = vst [vmem:[%s3641_s29 + $0x8] sm:$0xf] %v2725_v13  ;;  %2109 = vst [vmem:[%s3641_s29 + $0xc] sm:$0xf] %v2726_v49  ;;  %v2730_v45 = vcombine.high %v2045_v56, %v2045_v56  ;;  %v1918_v9 = vadd.f32 %v1917_v23, %v4781_v15  ;;  %v2046_v52 = vsel %vm1993_vm10, %v1981_v35, %v2719_v37 }
 0x1bc   : > { %v2047_v2 = vsel %vm1993_vm10, %v1982_v7, %v2720_v58  ;;  %2110 = vst [vmem:[%s3641_s29 + $0x10] sm:$0xf] %v2727_v42  ;;  %2111 = vst [vmem:[%s3641_s29 + $0x14] sm:$0xf] %v2728_v0  ;;  %v2731_v55 = vcombine.low %v2046_v52, %v2046_v52  ;;  %v2732_v5 = vcombine.high %v2046_v52, %v2046_v52  ;;  %v1908_v58 = vld [vmem:[%s4803_s11] sm:$0x1] }
 0x1bd   : > { %2112 = vst [vmem:[%s3641_s29 + $0x18] sm:$0xf] %v2729_v48  ;;  %2113 = vst [vmem:[%s3641_s29 + $0x1c] sm:$0xf] %v2730_v45  ;;  %v2733_v50 = vcombine.low %v2047_v2, %v2047_v2  ;;  %v2734_v59 = vcombine.high %v2047_v2, %v2047_v2  ;;  %v1919_v15 = vadd.f32 %v1918_v9, %v4790_v1 }
 0x1be   : > { %v1957_v60 = vadd.f32 %v1956_v46, %v4835_v12  ;;  %v2048_v22 = vsel %vm1993_vm10, %v1983_v19, %v2721_v53  ;;  %v2049_v32 = vsel %vm1993_vm10, %v1984_v41, %v2722_v29  ;;  %2114 = vst [vmem:[%s3641_s29 + $0x20] sm:$0xf] %v2731_v55  ;;  %2115 = vst [vmem:[%s3641_s29 + $0x24] sm:$0xf] %v2732_v5  ;;  %v1932_v53 = vld [vmem:[%s4806_s17] sm:$0x1] }
 0x1bf   : > { %2116 = vst [vmem:[%s3641_s29 + $0x28] sm:$0xf] %v2733_v50  ;;  %2117 = vst [vmem:[%s3641_s29 + $0x2c] sm:$0xf] %v2734_v59  ;;  %v2735_v63 = vcombine.low %v2048_v22, %v2048_v22  ;;  %v2736_v18 = vcombine.high %v2048_v22, %v2048_v22  ;;  %v2737_v10 = vcombine.low %v2049_v32, %v2049_v32 }
 0x1c0   : > { %v2738_v31 = vcombine.high %v2049_v32, %v2049_v32  ;;  %v1920_v44 = vadd.f32 %v1919_v15, %v4796_v6  ;;  %v1945_v1 = vmul.f32 %v4796_v6, %v4796_v6  ;;  %v1958_v12 = vadd.f32 %v1957_v60, %v4839_v43 }
 0x1c1   : > { %2118 = vst [vmem:[%s3641_s29 + $0x30] sm:$0xf] %v2735_v63  ;;  %2119 = vst [vmem:[%s3641_s29 + $0x34] sm:$0xf] %v2736_v18  ;;  %v1948_v35 = vmul.f32 %v4798_v40, %v4798_v40 }
 0x1c2   : > { %2120 = vst [vmem:[%s3641_s29 + $0x38] sm:$0xf] %v2737_v10  ;;  %2121 = vst [vmem:[%s3641_s29 + $0x3c] sm:$0xf] %v2738_v31  ;;  %v1921_v26 = vadd.f32 %v1920_v44, %v4800_v25  ;;  %v1959_v62 = vadd.f32 %v1958_v12, %v4845_v30  ;;  %s2153_s29 = sshll.u32 %s4803_s11, 4  ;;  %s4936_s29 = int_to_ptr.vmem [resolvable:$true] %s2153_s29 }
 0x1c3   : > { %s3341_s26 = scalar_lea.vmem %s4936_s29, 16  ;;  %p3348_p7 = scmp.lt.s32.totalorder %s4936_s29, %s3346_s19 }
 0x1c4   : > { %v1922_v34 = vadd.f32 %v1921_v26, %v4794_v33  ;;  %v1960_v6 = vadd.f32 %v1959_v62, %v1945_v1  ;;  %p3342_p4 = scmp.ne.s32.totalorder %s4936_s29, %s3341_s26  ;;  %p3349_p8 = scmp.lt.s32.totalorder %s3347_s30, %s3341_s26 }
 0x1c6   : > { %v1923_v43 = vadd.f32 %v1922_v34, %v4798_v40  ;;  %v1961_v36 = vadd.f32 %v1960_v6, %v1946_v27  ;;  %p3343_p5 = pnand %p3342_p4, %p3563_p3  ;;  %p3350_p10 = por %p3349_p8, %p3348_p7 }
 0x1c8   : > { %v1924_v20 = vrot.slane %v1923_v43, 4  ;;  %v1962_v37 = vadd.f32 %v1961_v36, %v1947_v57  ;;  %p3344_p6 = pneg %p3343_p5 }
 0x1ca   : > { %v1925_v25 = vadd.f32 %v1924_v20, %v1923_v43  ;;  %v1963_v30 = vadd.f32 %v1962_v37, %v1948_v35  ;;  %p3351_p11 = pnand %p3350_p10, %p3344_p6 }
 0x1cc   : > { %v1926_v7 = vrot.slane %v1925_v25, 2  ;;  %v1964_v14 = vrot.slane %v1963_v30, 4 }
 0x1ce   : > { %v1927_v33 = vadd.f32 %v1926_v7, %v1925_v25  ;;  %v1965_v38 = vadd.f32 %v1964_v14, %v1963_v30 }
 0x1d0   : > { %v1928_v11 = vrot.slane %v1927_v33, 1  ;;  %v1966_v39 = vrot.slane %v1965_v38, 2 }
 0x1d2   : > { %v1929_v40 = vadd.f32 %v1928_v11, %v1927_v33  ;;  %v1967_v19 = vadd.f32 %v1966_v39, %v1965_v38 }
 0x1d4   : > { %v1930_v17 = vadd.f32 %v1929_v40, %v1908_v58  ;;  %v1968_v54 = vrot.slane %v1967_v19, 1 }
 0x1d6   : > { %1931 = vst [vmem:[%s4803_s11] sm:$0x1] %v1930_v17  ;;  %v1969_v41 = vadd.f32 %v1968_v54, %v1967_v19 }
 0x1d7   : > { %3354 = shalt.err (!%p3351_p11)
}
 0x1d8   : > { %s3355_s15 = scalar_lea.hbm %s4934_s12, 16  ;;  %s3359_s11 = scalar_lea.hbm %s5031_s6, 32 }
 0x1d9   : > { %p3356_p12 = scmp.ne.s32.totalorder %s4934_s12, %s3355_s15  ;;  %p3360_p1 = scmp.lt.u32.totalorder %s4934_s12, %s5031_s6 }
 0x1da   : > { %p3361_p2 = scmp.lt.u32.totalorder %s3359_s11, %s3355_s15  ;;  %p3363_p5 = scmp.lt.u32.totalorder %s3355_s15, %s4934_s12 }
 0x1db   : > { %p3357_p13 = pnand %p3356_p12, %p3563_p3 }
 0x1dc   : > { %p3362_p4 = por %p3361_p2, %p3360_p1 }
 0x1dd   : > { %p3358_p0 = pneg %p3357_p13 }
 0x1de   : > { %p3364_p6 = por %p3363_p5, %p3362_p4 }
 0x1e0   : > { %p3365_p7 = pnand %p3364_p6, %p3358_p0 }
 0x1e2   : > { %3368 = shalt.err (!%p3365_p7)
}
 0x1e3   : > { %3188 = dma.vmem_to_hbm [thread:$0]  (%p3563_p3), %s4936_s29, 16, %s4934_s12, %s2133_s20   ;;  %v1970_v61 = vadd.f32 %v1969_v41, %v1932_v53 }
 0x1e4   : > { %s4968_s19 = scalar_lea.hbm %s5032_s7, %s2739_s27  ;;  %s2137_s30 = scalar_lea.sflag [#allocation5], %s3584_s18 }
 0x1e5   : > { %1971 = vst [vmem:[%s4806_s17] sm:$0x1] %v1970_v61  ;;  %s3369_s15 = scalar_lea.vmem %s4972_s16, 16  ;;  %s3473_s29 = smov [#allocation4]  }
 0x1e6   : > { %p3370_p8 = scmp.ne.s32.totalorder %s4972_s16, %s3369_s15  ;;  %s3373_s28 = sshll.u32 %s3473_s29, 4  ;;  %s3374_s28 = int_to_ptr.vmem [resolvable:$false] %s3373_s28 }
 0x1e7   : > { %s3375_s12 = scalar_lea.vmem %s3374_s28, 32  ;;  %p3376_p12 = scmp.lt.s32.totalorder %s4972_s16, %s3374_s28 }
 0x1e8   : > { %p3371_p10 = pnand %p3370_p8, %p3563_p3  ;;  %p3377_p13 = scmp.lt.s32.totalorder %s3375_s12, %s3369_s15 }
 0x1ea   : > { %p3372_p11 = pneg %p3371_p10  ;;  %p3378_p0 = por %p3377_p13, %p3376_p12 }
 0x1ec   : > { %p3379_p1 = pnand %p3378_p0, %p3372_p11 }
 0x1ee   : > { %3382 = shalt.err (!%p3379_p1)
}
 0x1ef   : > { %s3383_s18 = scalar_lea.hbm %s4968_s19, 16  ;;  %s3387_s20 = scalar_lea.hbm %s5032_s7, 32 }
 0x1f0   : > { %p3384_p2 = scmp.ne.s32.totalorder %s4968_s19, %s3383_s18  ;;  %p3388_p6 = scmp.lt.u32.totalorder %s4968_s19, %s5032_s7 }
 0x1f1   : > { %p3389_p7 = scmp.lt.u32.totalorder %s3387_s20, %s3383_s18  ;;  %p3391_p10 = scmp.lt.u32.totalorder %s3383_s18, %s4968_s19 }
 0x1f2   : > { %p3385_p4 = pnand %p3384_p2, %p3563_p3 }
 0x1f3   : > { %p3390_p8 = por %p3389_p7, %p3388_p6 }
 0x1f4   : > { %p3386_p5 = pneg %p3385_p4 }
 0x1f5   : > { %p3392_p11 = por %p3391_p10, %p3390_p8 }
 0x1f7   : > { %p3393_p12 = pnand %p3392_p11, %p3386_p5 }
 0x1f9   : > { %3396 = shalt.err (!%p3393_p12)
}
 0x1fa   : > { %3189 = dma.vmem_to_hbm [thread:$0]  (%p3563_p3), %s4972_s16, 16, %s4968_s19, %s2137_s30  }
 0x1fb PF: > { %p3199_p13 = scmp.ge.s32.totalorder %s3467_s8, 2  ;;  %s2191_s11 = sand.u32 1, %s3439_s24  }
 0x1fc   : > { %s2192_s21 = scalar_lea.sflag [#allocation3], %s2191_s11 }
 0x1fd   : > { %p3193_p0 = pnand %p3199_p13, %p3573_p9 }
 0x1ff   : > { %3430 = dma.done.wait (!%p3193_p0), %s2192_s21, 16  }
 0x200   : > { %3432 = vsyncadd (!%p3193_p0), %s2192_s21, 4294967280  ;;  %s2200_s22 = scalar_lea.sflag [#allocation5], %s2191_s11 }
 0x201   : > { %3434 = dma.done.wait (!%p3193_p0), %s2200_s22, 16  }
 0x202   : > { %3436 = vsyncadd (!%p3193_p0), %s2200_s22, 4294967280  ;;  %s24_s8 = sadd.s32 1, %s3467_s8   ;;  %s5127_s13 = sld [smem:[#allocation8_spill]] }
 0x203   : > { %p21_p1 = scmp.ge.s32.totalorder %s24_s8, 6   ;;  %s5128_s26 = sld [smem:[#allocation13_spill]] }
 0x204   : > { %s5129_s27 = sld [smem:[#allocation9_spill]]  ;;  %s5130_s28 = sld [smem:[#allocation10_spill]] }
 0x205   : > { %s5131_s29 = sld [smem:[#allocation11_spill]]  ;;  %s5132_s30 = sld [smem:[#allocation12_spill]] }
 0x206   : > { %s5133_s24 = smov %s3443_s25  ;;  %23 = sbr.rel (!%p21_p1) target bundleno = 7 (0x7), region = 113 }
 0x208   : > { %s5134_s25 = smov %s5127_s13 }
 0x20d   :  { %2204 = vsyncpa [#allocation3], 1 }
 0x20e   :  { %2206 = vsyncpa [#allocation3 + $0x1], 1 }
 0x20f   :  { %2207 = vsyncpa [#allocation5], 1 }
 0x210   :  { %2209 = vsyncpa [#allocation5 + $0x1], 1 }

</bundles_post_ra>
